<compile_context>
chip_gen: v7x
topology: tpu7x:2x2x1
jax: 0.10.0
libtpu: 0.0.40
codegen_flags: <defaults>
</compile_context>

<pallas_src>
import functools
import math

import jax
import jax.numpy as jnp
from jax.experimental import pallas as pl
from jax.experimental.pallas import tpu as pltpu

_HIGHEST = jax.lax.Precision.HIGHEST
_LN_EPS = 1e-5
_SS_NAMES = ("gamma1", "alpha1", "beta1", "gamma2", "alpha2", "beta2")


def _erf(x):
    # Abramowitz & Stegun 7.1.26 rational approximation (max abs err ~1.5e-7).
    # Keeps the kernel to ops with guaranteed Mosaic lowerings (exp/mul/add/where).
    a1, a2, a3, a4, a5 = (0.254829592, -0.284496736, 1.421413741,
                          -1.453152027, 1.061405429)
    p = 0.3275911
    sign = jnp.where(x >= 0.0, 1.0, -1.0)
    ax = jnp.abs(x)
    t = 1.0 / (1.0 + p * ax)
    poly = ((((a5 * t + a4) * t + a3) * t + a2) * t + a1) * t
    return sign * (1.0 - poly * jnp.exp(-ax * ax))


def _gelu(x):
    # Exact (erf-based) GELU, matching torch.nn.GELU() defaults.  Kept in f32.
    return 0.5 * x * (1.0 + _erf(x * 0.7071067811865476))


def _layer_norm(z, w, b):
    mu = jnp.mean(z, axis=-1, keepdims=True)
    var = jnp.mean(jnp.square(z - mu), axis=-1, keepdims=True)
    return (z - mu) * jax.lax.rsqrt(var + _LN_EPS) * w + b


def _encoder_block_kernel(
    x_ref, cond_ref,
    ss_w1_ref, ss_b1_ref, ss_w2_ref, ss_b2_ref,
    ln_w_ref, ln_b_ref,
    w_qkv_ref, b_qkv_ref, w_o_ref, b_o_ref,
    w_m1_ref, b_m1_ref, w_m2_ref, b_m2_ref,
    o_ref,
    *, num_heads,
):
    f32 = jnp.float32
    BT, S, D = x_ref.shape
    H = num_heads
    Dh = D // H
    wdt = w_qkv_ref.dtype                 # bf16 (fast path) or f32 (exact path)
    exact = (wdt == jnp.float32)
    prec = _HIGHEST if exact else None    # bf16 operands -> single MXU pass

    def mm(a, w):
        # MXU matmul: operands in the weight dtype, f32 accumulation.
        return jnp.dot(a.astype(wdt), w, precision=prec,
                       preferred_element_type=f32)

    # Hoist weight/bias loads once (reused across the BT sub-batches).
    ss_w1 = ss_w1_ref[...]                # (D, 6D)
    ss_b1 = ss_b1_ref[...]                # (1, 6D)
    w_qkv = w_qkv_ref[...]                # (D, 3D)  (Q columns pre-scaled)
    b_qkv = b_qkv_ref[...]                # (1, 3D)
    w_o = w_o_ref[...]                    # (D, D)
    b_o = b_o_ref[...]                    # (1, D)
    w_m1 = w_m1_ref[...]                  # (D, dff)
    b_m1 = b_m1_ref[...]                  # (1, dff)
    w_m2 = w_m2_ref[...]                  # (dff, D)
    b_m2 = b_m2_ref[...]                  # (1, D)
    ln1_w, ln1_b = ln_w_ref[0], ln_b_ref[0]
    ln2_w, ln2_b = ln_w_ref[1], ln_b_ref[1]

    for b in range(BT):                   # BT is a small static batch tile
        xb = x_ref[b]                                         # (S, D)

        # ---- six ScaleOrShift conditioning MLPs on an 8-row sublane tile ----
        cond8 = jnp.broadcast_to(cond_ref[b], (8, D))         # (8, D)
        h1 = _gelu(mm(cond8, ss_w1) + ss_b1)                  # (8, 6D)
        mods = []
        for i in range(6):
            mi = mm(h1[:, i * D:(i + 1) * D], ss_w2_ref[i]) + ss_b2_ref[i]
            mods.append(mi[0:1, :])                           # keep (1, D) row
        gamma1, alpha1, beta1, gamma2, alpha2, beta2 = mods

        # ---- attention branch: x + alpha1 * MHA(norm1(x) * gamma1 + beta1) ----
        pre_attn = _layer_norm(xb, ln1_w, ln1_b) * gamma1 + beta1     # (S, D)
        qkv = mm(pre_attn, w_qkv) + b_qkv                     # (S, 3D), Q pre-scaled

        vals = []
        for h in range(H):                                    # per-head only for
            lo = h * Dh                                       # logits/softmax/attn@v
            q = qkv[:, lo:lo + Dh]
            k = qkv[:, D + lo:D + lo + Dh]
            v = qkv[:, 2 * D + lo:2 * D + lo + Dh]
            logits = jax.lax.dot_general(                     # (S, S), f32/HIGHEST
                q, k, (((1,), (1,)), ((), ())),
                precision=_HIGHEST, preferred_element_type=jnp.float32)
            lmax = jnp.max(logits, axis=-1, keepdims=True)
            p = jnp.exp(logits - lmax)
            inv = pl.reciprocal(jnp.sum(p, axis=-1, keepdims=True),
                                approx=not exact)
            attn = p * inv
            vals.append(jnp.dot(attn.astype(wdt), v.astype(wdt),
                                precision=prec,
                                preferred_element_type=jnp.float32))  # (S, Dh)
        vals = jnp.concatenate(vals, axis=-1)                 # (S, D), head-major
        attn_out = mm(vals, w_o) + b_o                        # fused O projection
        x1 = xb + attn_out * alpha1

        # ---- MLP branch: x1 + alpha2 * MLP(norm2(x1) * gamma2 + beta2) ----
        pre_lin = _layer_norm(x1, ln2_w, ln2_b) * gamma2 + beta2
        hmid = _gelu(mm(pre_lin, w_m1) + b_m1)
        mlp_out = mm(hmid, w_m2) + b_m2
        o_ref[b] = (x1 + mlp_out * alpha2).astype(o_ref.dtype)


def _pick_batch_tile(B, S, D):
    """Batch elements per grid step: large enough to amortize the ~0.35us
    per-step pipeline overhead when S*D is small, while keeping >= 2 grid steps
    (when B >= 2) so both v7x TensorCores get work on the 'parallel' axis."""
    if B <= 1:
        return 1
    target = max(1, (64 * 1024) // (S * D))      # ~256 KiB of f32 per step
    best = 1
    for bt in range(1, B // 2 + 1):
        if B % bt == 0 and bt <= target:
            best = bt
    return best


def encoder_block(x, x_cond, params, num_heads, *, single_buffer_weights=True):
    """Fused EncoderBlock forward. x: (B, S, D) f32, x_cond: (B, D) f32."""
    B, S, D = x.shape
    dff = params["w_m1"].shape[1]
    bt = _pick_batch_tile(B, S, D)

    args = (
        x, x_cond.reshape(B, 1, D),
        params["ss_w1"], params["ss_b1"], params["ss_w2"], params["ss_b2"],
        params["ln_w"], params["ln_b"],
        params["w_qkv"], params["b_qkv"], params["w_o"], params["b_o"],
        params["w_m1"], params["b_m1"], params["w_m2"], params["b_m2"],
    )

    wmode = pl.Buffered(1) if single_buffer_weights else None

    def wspec(shape):
        # Constant-index weight window: VMEM-resident across all grid steps.
        if wmode is None:
            return pl.BlockSpec(shape, lambda i: (0,) * len(shape))
        return pl.BlockSpec(shape, lambda i: (0,) * len(shape),
                            pipeline_mode=wmode)

    in_specs = [
        pl.BlockSpec((bt, S, D), lambda i: (i, 0, 0)),         # x
        pl.BlockSpec((bt, 1, D), lambda i: (i, 0, 0)),         # x_cond
        wspec((D, 6 * D)), wspec((1, 6 * D)),                  # fused SS layer 1
        wspec((6, D, D)), wspec((6, 1, D)),                    # SS layer 2 (stacked)
        wspec((2, 1, D)), wspec((2, 1, D)),                    # LayerNorm w / b
        wspec((D, 3 * D)), wspec((1, 3 * D)),                  # fused QKV
        wspec((D, D)), wspec((1, D)),                          # O projection
        wspec((D, dff)), wspec((1, dff)),                      # MLP layer 1
        wspec((dff, D)), wspec((1, D)),                        # MLP layer 2
    ]
    out_specs = pl.BlockSpec((bt, S, D), lambda i: (i, 0, 0))

    # Explicit VMEM budget: single weight copy + double-buffered activation blocks.
    weight_bytes = sum(int(a.size) * a.dtype.itemsize for a in args[2:])
    act_block_bytes = (bt * S * D + bt * D) * 4
    wbufs = 1 if single_buffer_weights else 2
    vmem_est = wbufs * weight_bytes + 4 * act_block_bytes + (8 << 20)
    vmem_limit = int(min(128 << 20, max(32 << 20, vmem_est)))

    flops = B * (2 * 8 * D * 6 * D              # conditioning layer 1 (8 rows)
                 + 6 * 2 * 8 * D * D            # conditioning layer 2
                 + 2 * S * D * 3 * D            # fused QKV projection
                 + 4 * S * S * D                # logits + attn @ v
                 + 2 * S * D * D                # output projection
                 + 2 * 2 * S * D * dff)         # feed-forward MLP
    transcendentals = B * (num_heads * S * S + S * dff + 8 * 6 * D + 2 * S)
    bytes_accessed = sum(int(a.size) * a.dtype.itemsize for a in args) \
        + B * S * D * 4

    return pl.pallas_call(
        functools.partial(_encoder_block_kernel, num_heads=num_heads),
        out_shape=jax.ShapeDtypeStruct((B, S, D), x.dtype),
        grid_spec=pltpu.PrefetchScalarGridSpec(
            num_scalar_prefetch=0,
            grid=(B // bt,),
            in_specs=in_specs,
            out_specs=out_specs,
        ),
        compiler_params=pltpu.CompilerParams(
            dimension_semantics=("parallel",),
            vmem_limit_bytes=vmem_limit),
        cost_estimate=pl.CostEstimate(
            flops=int(flops),
            transcendentals=int(transcendentals),
            bytes_accessed=int(bytes_accessed)),
    )(*args)


def convert_params(pt, num_heads, mxu_dtype=jnp.bfloat16):
    """Rearrange PyTorch-layout weights into the kernel layout:
      * Linear weights transposed to (in, out) and cast to the MXU operand dtype
        (bf16 by default, f32 accumulation); biases / LayerNorm params stay f32.
      * The six ScaleOrShift layer-1 weights are fused column-wise into (D, 6D).
      * qkv_proj regrouped from (head, q|k|v, Dh) to (q|k|v, head, Dh) output
        order so the kernel slices Q / K / V as contiguous D-wide column blocks;
        the 1/sqrt(Dh) attention scale is folded into the Q columns and bias.
      * mxu_dtype=None keeps f32 weights -> the kernel uses HIGHEST-precision
        MXU passes (validation mode)."""
    D = pt["w_o"].shape[0]
    H = num_heads
    Dh = D // H
    dff = pt["w_m1"].shape[0]
    wdt = jnp.float32 if mxu_dtype is None else mxu_dtype

    ss_w1 = jnp.concatenate([pt[n][0].T for n in _SS_NAMES], axis=1)   # (D, 6D)
    ss_b1 = jnp.concatenate([pt[n][1] for n in _SS_NAMES]).reshape(1, 6 * D)
    ss_w2 = jnp.stack([pt[n][2].T for n in _SS_NAMES])                 # (6, D, D)
    ss_b2 = jnp.stack([pt[n][3].reshape(1, D) for n in _SS_NAMES])     # (6, 1, D)

    # qkv_proj: output order (head, q|k|v, Dh) -> regroup to (q|k|v, head, Dh).
    wqkv = pt["w_qkv"].reshape(H, 3, Dh, D).transpose(1, 0, 2, 3).reshape(3 * D, D)
    bqkv = pt["b_qkv"].reshape(H, 3, Dh).transpose(1, 0, 2).reshape(3 * D)
    scale = 1.0 / math.sqrt(Dh)
    q_scale = jnp.concatenate([jnp.full((D,), scale, jnp.float32),
                               jnp.ones((2 * D,), jnp.float32)])
    w_qkv = wqkv.T * q_scale[None, :]                                  # (D, 3D)
    b_qkv = (bqkv * q_scale).reshape(1, 3 * D)

    return dict(
        ss_w1=ss_w1.astype(wdt), ss_b1=ss_b1,
        ss_w2=ss_w2.astype(wdt), ss_b2=ss_b2,
        ln_w=jnp.stack([pt["ln1_w"].reshape(1, D), pt["ln2_w"].reshape(1, D)]),
        ln_b=jnp.stack([pt["ln1_b"].reshape(1, D), pt["ln2_b"].reshape(1, D)]),
        w_qkv=w_qkv.astype(wdt), b_qkv=b_qkv,
        w_o=pt["w_o"].T.astype(wdt), b_o=pt["b_o"].reshape(1, D),
        w_m1=pt["w_m1"].T.astype(wdt), b_m1=pt["b_m1"].reshape(1, dff),
        w_m2=pt["w_m2"].T.astype(wdt), b_m2=pt["b_m2"].reshape(1, D),
    )


def _linear_pt(z, w, b):
    # PyTorch nn.Linear semantics: y = z @ W^T + b, W is (out, in).
    return jnp.dot(z, w.T, precision=_HIGHEST) + b


def encoder_block_ref(x, x_cond, pt, num_heads):
    """Pure-JAX f32/HIGHEST reference mirroring the PyTorch EncoderBlock.forward
    (eval mode, mask=None) on the original-layout weights."""
    def scale_or_shift(z, p):
        w1, b1, w2, b2 = p
        return _linear_pt(jax.nn.gelu(_linear_pt(z, w1, b1), approximate=False),
                          w2, b2)

    g1, a1, bt1, g2, a2, bt2 = (scale_or_shift(x_cond, pt[n])[:, None, :]
                                for n in _SS_NAMES)

    def layer_norm(z, w, b):
        mu = z.mean(-1, keepdims=True)
        var = ((z - mu) ** 2).mean(-1, keepdims=True)
        return (z - mu) / jnp.sqrt(var + _LN_EPS) * w + b

    B, S, D = x.shape
    H = num_heads
    Dh = D // H

    pre_attn = layer_norm(x, pt["ln1_w"], pt["ln1_b"]) * g1 + bt1
    qkv = _linear_pt(pre_attn, pt["w_qkv"], pt["b_qkv"])
    qkv = qkv.reshape(B, S, H, 3 * Dh).transpose(0, 2, 1, 3)
    q, k, v = qkv[..., :Dh], qkv[..., Dh:2 * Dh], qkv[..., 2 * Dh:]
    logits = jnp.einsum("bhqd,bhkd->bhqk", q, k,
                        precision=_HIGHEST) / math.sqrt(Dh)
    attn = jax.nn.softmax(logits, axis=-1)
    vals = jnp.einsum("bhqk,bhkd->bhqd", attn, v, precision=_HIGHEST)
    vals = vals.transpose(0, 2, 1, 3).reshape(B, S, D)
    attn_out = _linear_pt(vals, pt["w_o"], pt["b_o"])
    x1 = x + attn_out * a1

    pre_lin = layer_norm(x1, pt["ln2_w"], pt["ln2_b"]) * g2 + bt2
    hmid = jax.nn.gelu(_linear_pt(pre_lin, pt["w_m1"], pt["b_m1"]),
                       approximate=False)
    mlp_out = _linear_pt(hmid, pt["w_m2"], pt["b_m2"])
    return x1 + mlp_out * a2


if __name__ == "__main__":
    B, S, D = 2, 8, 32          # batch, seq, input_dim
    H = 4                       # num_heads
    dff = 64                    # dim_feedforward (dropout = 0.0)

    keys = iter(jax.random.split(jax.random.PRNGKey(0), 40))

    def unif(fan_in, shape):    # PyTorch nn.Linear default init scale
        bound = 1.0 / math.sqrt(fan_in)
        return jax.random.uniform(next(keys), shape, jnp.float32, -bound, bound)

    def xavier(shape):          # xavier_uniform_ for qkv_proj / o_proj weights
        fan_out, fan_in = shape
        bound = math.sqrt(6.0 / (fan_in + fan_out))
        return jax.random.uniform(next(keys), shape, jnp.float32, -bound, bound)

    # Parameters in the original PyTorch layout (Linear weight = (out, in)).
    pt = {n: (unif(D, (D, D)), unif(D, (D,)), unif(D, (D, D)), unif(D, (D,)))
          for n in _SS_NAMES}
    pt["w_qkv"] = xavier((3 * D, D)); pt["b_qkv"] = jnp.zeros((3 * D,), jnp.float32)
    pt["w_o"] = xavier((D, D));       pt["b_o"] = jnp.zeros((D,), jnp.float32)
    pt["w_m1"] = unif(D, (dff, D));   pt["b_m1"] = unif(D, (dff,))
    pt["w_m2"] = unif(dff, (D, dff)); pt["b_m2"] = unif(dff, (D,))
    pt["ln1_w"] = jnp.ones((D,), jnp.float32); pt["ln1_b"] = jnp.zeros((D,), jnp.float32)
    pt["ln2_w"] = jnp.ones((D,), jnp.float32); pt["ln2_b"] = jnp.zeros((D,), jnp.float32)

    x = jax.random.normal(next(keys), (B, S, D), jnp.float32)
    x_cond = jax.random.normal(next(keys), (B, D), jnp.float32)

    params_fast = convert_params(pt, H)                      # bf16 MXU operands
    params_exact = convert_params(pt, H, mxu_dtype=None)     # f32 / HIGHEST

    def run(p, single_buffer):
        return jax.block_until_ready(
            encoder_block(x, x_cond, p, H, single_buffer_weights=single_buffer))

    try:
        y_fast = run(params_fast, True)
        single = True
    except Exception:
        # pipeline_mode=pl.Buffered(1) not accepted by this jax build; fall back
        # to default double-buffered constant weight windows (numerics identical).
        y_fast = run(params_fast, False)
        single = False
    y_exact = run(params_exact, single)

    ref = encoder_block_ref(x, x_cond, pt, H)
    assert y_fast.shape == (B, S, D)

    # Tight check: f32/HIGHEST weight path verifies the kernel math itself.
    err_exact = float(jnp.max(jnp.abs(y_exact - ref)))
    assert jnp.allclose(y_exact, ref, atol=1e-3, rtol=1e-3), err_exact

    # Loose check: bf16 MXU-operand path; tolerance reflects bf16 quantization
    # (~2^-9 relative per operand) across the ~6 chained matmuls of the block.
    err_fast = float(jnp.max(jnp.abs(y_fast - ref)))
    assert jnp.allclose(y_fast, ref, atol=5e-2, rtol=5e-2), err_fast

    print("KERNEL_OK")
</pallas_src>

<mosaic_0001>
module attributes {stable_mosaic.version = 11 : i64} {
  func.func @_encoder_block_kernel(%arg0: i32, %arg1: memref<1x8x32xf32, #tpu.memory_space<vmem>>, %arg2: memref<1x1x32xf32, #tpu.memory_space<vmem>>, %arg3: memref<32x192xbf16, #tpu.memory_space<vmem>>, %arg4: memref<1x192xf32, #tpu.memory_space<vmem>>, %arg5: memref<6x32x32xbf16, #tpu.memory_space<vmem>>, %arg6: memref<6x1x32xf32, #tpu.memory_space<vmem>>, %arg7: memref<2x1x32xf32, #tpu.memory_space<vmem>>, %arg8: memref<2x1x32xf32, #tpu.memory_space<vmem>>, %arg9: memref<32x96xbf16, #tpu.memory_space<vmem>>, %arg10: memref<1x96xf32, #tpu.memory_space<vmem>>, %arg11: memref<32x32xbf16, #tpu.memory_space<vmem>>, %arg12: memref<1x32xf32, #tpu.memory_space<vmem>>, %arg13: memref<32x64xbf16, #tpu.memory_space<vmem>>, %arg14: memref<1x64xf32, #tpu.memory_space<vmem>>, %arg15: memref<64x32xbf16, #tpu.memory_space<vmem>>, %arg16: memref<1x32xf32, #tpu.memory_space<vmem>>, %arg17: memref<1x8x32xf32, #tpu.memory_space<vmem>>) attributes {dimension_semantics = [#tpu.dimension_semantics<parallel>], iteration_bounds = array<i64: 2>, scalar_prefetch = 0 : i64, scratch_operands = 0 : i64, tpu.core_type = #tpu.core_type<tc>, window_params = [{transform_indices = @transform_0, window_bounds = array<i64: 1, 8, 32>}, {transform_indices = @transform_1, window_bounds = array<i64: 1, 1, 32>}, {pipeline_mode = #tpu.pipeline_mode<synchronous>, transform_indices = @transform_2, window_bounds = array<i64: 32, 192>}, {pipeline_mode = #tpu.pipeline_mode<synchronous>, transform_indices = @transform_3, window_bounds = array<i64: 1, 192>}, {pipeline_mode = #tpu.pipeline_mode<synchronous>, transform_indices = @transform_4, window_bounds = array<i64: 6, 32, 32>}, {pipeline_mode = #tpu.pipeline_mode<synchronous>, transform_indices = @transform_5, window_bounds = array<i64: 6, 1, 32>}, {pipeline_mode = #tpu.pipeline_mode<synchronous>, transform_indices = @transform_6, window_bounds = array<i64: 2, 1, 32>}, {pipeline_mode = #tpu.pipeline_mode<synchronous>, transform_indices = @transform_7, window_bounds = array<i64: 2, 1, 32>}, {pipeline_mode = #tpu.pipeline_mode<synchronous>, transform_indices = @transform_8, window_bounds = array<i64: 32, 96>}, {pipeline_mode = #tpu.pipeline_mode<synchronous>, transform_indices = @transform_9, window_bounds = array<i64: 1, 96>}, {pipeline_mode = #tpu.pipeline_mode<synchronous>, transform_indices = @transform_10, window_bounds = array<i64: 32, 32>}, {pipeline_mode = #tpu.pipeline_mode<synchronous>, transform_indices = @transform_11, window_bounds = array<i64: 1, 32>}, {pipeline_mode = #tpu.pipeline_mode<synchronous>, transform_indices = @transform_12, window_bounds = array<i64: 32, 64>}, {pipeline_mode = #tpu.pipeline_mode<synchronous>, transform_indices = @transform_13, window_bounds = array<i64: 1, 64>}, {pipeline_mode = #tpu.pipeline_mode<synchronous>, transform_indices = @transform_14, window_bounds = array<i64: 64, 32>}, {pipeline_mode = #tpu.pipeline_mode<synchronous>, transform_indices = @transform_15, window_bounds = array<i64: 1, 32>}, {transform_indices = @transform_16, window_bounds = array<i64: 1, 8, 32>}]} {
    %c0 = arith.constant 0 : index
    %c0_0 = arith.constant 0 : index
    %0 = vector.load %arg3[%c0, %c0_0] : memref<32x192xbf16, #tpu.memory_space<vmem>>, vector<32x192xbf16>
    %c0_1 = arith.constant 0 : index
    %c0_2 = arith.constant 0 : index
    %1 = vector.load %arg4[%c0_1, %c0_2] : memref<1x192xf32, #tpu.memory_space<vmem>>, vector<1x192xf32>
    %c0_3 = arith.constant 0 : index
    %c0_4 = arith.constant 0 : index
    %2 = vector.load %arg9[%c0_3, %c0_4] : memref<32x96xbf16, #tpu.memory_space<vmem>>, vector<32x96xbf16>
    %c0_5 = arith.constant 0 : index
    %c0_6 = arith.constant 0 : index
    %3 = vector.load %arg10[%c0_5, %c0_6] : memref<1x96xf32, #tpu.memory_space<vmem>>, vector<1x96xf32>
    %c0_7 = arith.constant 0 : index
    %c0_8 = arith.constant 0 : index
    %4 = vector.load %arg11[%c0_7, %c0_8] : memref<32x32xbf16, #tpu.memory_space<vmem>>, vector<32x32xbf16>
    %c0_9 = arith.constant 0 : index
    %c0_10 = arith.constant 0 : index
    %5 = vector.load %arg12[%c0_9, %c0_10] : memref<1x32xf32, #tpu.memory_space<vmem>>, vector<1x32xf32>
    %c0_11 = arith.constant 0 : index
    %c0_12 = arith.constant 0 : index
    %6 = vector.load %arg13[%c0_11, %c0_12] : memref<32x64xbf16, #tpu.memory_space<vmem>>, vector<32x64xbf16>
    %c0_13 = arith.constant 0 : index
    %c0_14 = arith.constant 0 : index
    %7 = vector.load %arg14[%c0_13, %c0_14] : memref<1x64xf32, #tpu.memory_space<vmem>>, vector<1x64xf32>
    %c0_15 = arith.constant 0 : index
    %c0_16 = arith.constant 0 : index
    %8 = vector.load %arg15[%c0_15, %c0_16] : memref<64x32xbf16, #tpu.memory_space<vmem>>, vector<64x32xbf16>
    %c0_17 = arith.constant 0 : index
    %c0_18 = arith.constant 0 : index
    %9 = vector.load %arg16[%c0_17, %c0_18] : memref<1x32xf32, #tpu.memory_space<vmem>>, vector<1x32xf32>
    %c0_19 = arith.constant 0 : index
    %c0_20 = arith.constant 0 : index
    %c0_21 = arith.constant 0 : index
    %10 = vector.load %arg7[%c0_19, %c0_20, %c0_21] : memref<2x1x32xf32, #tpu.memory_space<vmem>>, vector<1x1x32xf32>
    %11 = vector.shape_cast %10 : vector<1x1x32xf32> to vector<1x32xf32>
    %c0_22 = arith.constant 0 : index
    %c0_23 = arith.constant 0 : index
    %c0_24 = arith.constant 0 : index
    %12 = vector.load %arg8[%c0_22, %c0_23, %c0_24] : memref<2x1x32xf32, #tpu.memory_space<vmem>>, vector<1x1x32xf32>
    %13 = vector.shape_cast %12 : vector<1x1x32xf32> to vector<1x32xf32>
    %c1 = arith.constant 1 : index
    %c0_25 = arith.constant 0 : index
    %c0_26 = arith.constant 0 : index
    %14 = vector.load %arg7[%c1, %c0_25, %c0_26] : memref<2x1x32xf32, #tpu.memory_space<vmem>>, vector<1x1x32xf32>
    %15 = vector.shape_cast %14 : vector<1x1x32xf32> to vector<1x32xf32>
    %c1_27 = arith.constant 1 : index
    %c0_28 = arith.constant 0 : index
    %c0_29 = arith.constant 0 : index
    %16 = vector.load %arg8[%c1_27, %c0_28, %c0_29] : memref<2x1x32xf32, #tpu.memory_space<vmem>>, vector<1x1x32xf32>
    %17 = vector.shape_cast %16 : vector<1x1x32xf32> to vector<1x32xf32>
    %c0_30 = arith.constant 0 : index
    %c0_31 = arith.constant 0 : index
    %c0_32 = arith.constant 0 : index
    %18 = vector.load %arg1[%c0_30, %c0_31, %c0_32] : memref<1x8x32xf32, #tpu.memory_space<vmem>>, vector<1x8x32xf32>
    %19 = vector.shape_cast %18 : vector<1x8x32xf32> to vector<8x32xf32>
    %c0_33 = arith.constant 0 : index
    %c0_34 = arith.constant 0 : index
    %c0_35 = arith.constant 0 : index
    %20 = vector.load %arg2[%c0_33, %c0_34, %c0_35] : memref<1x1x32xf32, #tpu.memory_space<vmem>>, vector<1x1x32xf32>
    %21 = vector.shape_cast %20 : vector<1x1x32xf32> to vector<1x32xf32>
    %22 = vector.shape_cast %21 : vector<1x32xf32> to vector<1x32xf32>
    %23 = vector.broadcast %22 : vector<1x32xf32> to vector<8x32xf32>
    %24 = arith.truncf %23 : vector<8x32xf32> to vector<8x32xbf16>
    %cst = arith.constant dense<0.000000e+00> : vector<8x192xf32>
    %25 = tpu.matmul %24, %0, %cst {dimension_numbers = #tpu.dot_dimension_numbers<[1], [0], [0], [1], [0, 0, 1, 1], [], []>} : vector<8x32xbf16>, vector<32x192xbf16>, vector<8x192xf32> -> vector<8x192xf32>
    %26 = vector.broadcast %1 : vector<1x192xf32> to vector<8x192xf32>
    %27 = arith.addf %25, %26 : vector<8x192xf32>
    %cst_36 = arith.constant 5.000000e-01 : f32
    %28 = vector.broadcast %cst_36 : f32 to vector<8x192xf32>
    %29 = arith.mulf %28, %27 : vector<8x192xf32>
    %cst_37 = arith.constant 0.707106769 : f32
    %30 = vector.broadcast %cst_37 : f32 to vector<8x192xf32>
    %31 = arith.mulf %27, %30 : vector<8x192xf32>
    %cst_38 = arith.constant 0.000000e+00 : f32
    %32 = vector.broadcast %cst_38 : f32 to vector<8x192xf32>
    %33 = arith.cmpf oge, %31, %32 : vector<8x192xf32>
    %cst_39 = arith.constant 1.000000e+00 : f32
    %cst_40 = arith.constant -1.000000e+00 : f32
    %34 = vector.broadcast %cst_39 : f32 to vector<8x192xf32>
    %35 = vector.broadcast %cst_40 : f32 to vector<8x192xf32>
    %36 = arith.select %33, %34, %35 : vector<8x192xi1>, vector<8x192xf32>
    %37 = math.absf %31 : vector<8x192xf32>
    %cst_41 = arith.constant 0.327591091 : f32
    %38 = vector.broadcast %cst_41 : f32 to vector<8x192xf32>
    %39 = arith.mulf %38, %37 : vector<8x192xf32>
    %cst_42 = arith.constant 1.000000e+00 : f32
    %40 = vector.broadcast %cst_42 : f32 to vector<8x192xf32>
    %41 = arith.addf %40, %39 : vector<8x192xf32>
    %cst_43 = arith.constant 1.000000e+00 : f32
    %42 = vector.broadcast %cst_43 : f32 to vector<8x192xf32>
    %43 = arith.divf %42, %41 : vector<8x192xf32>
    %cst_44 = arith.constant 1.06140542 : f32
    %44 = vector.broadcast %cst_44 : f32 to vector<8x192xf32>
    %45 = arith.mulf %44, %43 : vector<8x192xf32>
    %cst_45 = arith.constant -1.45315206 : f32
    %46 = vector.broadcast %cst_45 : f32 to vector<8x192xf32>
    %47 = arith.addf %45, %46 : vector<8x192xf32>
    %48 = arith.mulf %47, %43 : vector<8x192xf32>
    %cst_46 = arith.constant 1.42141378 : f32
    %49 = vector.broadcast %cst_46 : f32 to vector<8x192xf32>
    %50 = arith.addf %48, %49 : vector<8x192xf32>
    %51 = arith.mulf %50, %43 : vector<8x192xf32>
    %cst_47 = arith.constant -0.284496725 : f32
    %52 = vector.broadcast %cst_47 : f32 to vector<8x192xf32>
    %53 = arith.addf %51, %52 : vector<8x192xf32>
    %54 = arith.mulf %53, %43 : vector<8x192xf32>
    %cst_48 = arith.constant 0.254829586 : f32
    %55 = vector.broadcast %cst_48 : f32 to vector<8x192xf32>
    %56 = arith.addf %54, %55 : vector<8x192xf32>
    %57 = arith.mulf %56, %43 : vector<8x192xf32>
    %cst_49 = arith.constant 0.000000e+00 : f32
    %58 = vector.broadcast %cst_49 : f32 to vector<8x192xf32>
    %59 = arith.subf %58, %37 : vector<8x192xf32>
    %60 = arith.mulf %59, %37 : vector<8x192xf32>
    %61 = math.exp %60 : vector<8x192xf32>
    %62 = arith.mulf %57, %61 : vector<8x192xf32>
    %cst_50 = arith.constant 1.000000e+00 : f32
    %63 = vector.broadcast %cst_50 : f32 to vector<8x192xf32>
    %64 = arith.subf %63, %62 : vector<8x192xf32>
    %65 = arith.mulf %36, %64 : vector<8x192xf32>
    %cst_51 = arith.constant 1.000000e+00 : f32
    %66 = vector.broadcast %cst_51 : f32 to vector<8x192xf32>
    %67 = arith.addf %66, %65 : vector<8x192xf32>
    %68 = arith.mulf %29, %67 : vector<8x192xf32>
    %69 = vector.extract_strided_slice %68 {offsets = [0, 0], sizes = [8, 32], strides = [1, 1]} : vector<8x192xf32> to vector<8x32xf32>
    %c0_52 = arith.constant 0 : index
    %c0_53 = arith.constant 0 : index
    %c0_54 = arith.constant 0 : index
    %70 = vector.load %arg5[%c0_52, %c0_53, %c0_54] : memref<6x32x32xbf16, #tpu.memory_space<vmem>>, vector<1x32x32xbf16>
    %71 = vector.shape_cast %70 : vector<1x32x32xbf16> to vector<32x32xbf16>
    %72 = arith.truncf %69 : vector<8x32xf32> to vector<8x32xbf16>
    %cst_55 = arith.constant dense<0.000000e+00> : vector<8x32xf32>
    %73 = tpu.matmul %72, %71, %cst_55 {dimension_numbers = #tpu.dot_dimension_numbers<[1], [0], [0], [1], [0, 0, 1, 1], [], []>} : vector<8x32xbf16>, vector<32x32xbf16>, vector<8x32xf32> -> vector<8x32xf32>
    %c0_56 = arith.constant 0 : index
    %c0_57 = arith.constant 0 : index
    %c0_58 = arith.constant 0 : index
    %74 = vector.load %arg6[%c0_56, %c0_57, %c0_58] : memref<6x1x32xf32, #tpu.memory_space<vmem>>, vector<1x1x32xf32>
    %75 = vector.shape_cast %74 : vector<1x1x32xf32> to vector<1x32xf32>
    %76 = vector.broadcast %75 : vector<1x32xf32> to vector<8x32xf32>
    %77 = arith.addf %73, %76 : vector<8x32xf32>
    %78 = vector.extract_strided_slice %77 {offsets = [0, 0], sizes = [1, 32], strides = [1, 1]} : vector<8x32xf32> to vector<1x32xf32>
    %79 = vector.extract_strided_slice %68 {offsets = [0, 32], sizes = [8, 32], strides = [1, 1]} : vector<8x192xf32> to vector<8x32xf32>
    %c1_59 = arith.constant 1 : index
    %c0_60 = arith.constant 0 : index
    %c0_61 = arith.constant 0 : index
    %80 = vector.load %arg5[%c1_59, %c0_60, %c0_61] : memref<6x32x32xbf16, #tpu.memory_space<vmem>>, vector<1x32x32xbf16>
    %81 = vector.shape_cast %80 : vector<1x32x32xbf16> to vector<32x32xbf16>
    %82 = arith.truncf %79 : vector<8x32xf32> to vector<8x32xbf16>
    %cst_62 = arith.constant dense<0.000000e+00> : vector<8x32xf32>
    %83 = tpu.matmul %82, %81, %cst_62 {dimension_numbers = #tpu.dot_dimension_numbers<[1], [0], [0], [1], [0, 0, 1, 1], [], []>} : vector<8x32xbf16>, vector<32x32xbf16>, vector<8x32xf32> -> vector<8x32xf32>
    %c1_63 = arith.constant 1 : index
    %c0_64 = arith.constant 0 : index
    %c0_65 = arith.constant 0 : index
    %84 = vector.load %arg6[%c1_63, %c0_64, %c0_65] : memref<6x1x32xf32, #tpu.memory_space<vmem>>, vector<1x1x32xf32>
    %85 = vector.shape_cast %84 : vector<1x1x32xf32> to vector<1x32xf32>
    %86 = vector.broadcast %85 : vector<1x32xf32> to vector<8x32xf32>
    %87 = arith.addf %83, %86 : vector<8x32xf32>
    %88 = vector.extract_strided_slice %87 {offsets = [0, 0], sizes = [1, 32], strides = [1, 1]} : vector<8x32xf32> to vector<1x32xf32>
    %89 = vector.extract_strided_slice %68 {offsets = [0, 64], sizes = [8, 32], strides = [1, 1]} : vector<8x192xf32> to vector<8x32xf32>
    %c2 = arith.constant 2 : index
    %c0_66 = arith.constant 0 : index
    %c0_67 = arith.constant 0 : index
    %90 = vector.load %arg5[%c2, %c0_66, %c0_67] : memref<6x32x32xbf16, #tpu.memory_space<vmem>>, vector<1x32x32xbf16>
    %91 = vector.shape_cast %90 : vector<1x32x32xbf16> to vector<32x32xbf16>
    %92 = arith.truncf %89 : vector<8x32xf32> to vector<8x32xbf16>
    %cst_68 = arith.constant dense<0.000000e+00> : vector<8x32xf32>
    %93 = tpu.matmul %92, %91, %cst_68 {dimension_numbers = #tpu.dot_dimension_numbers<[1], [0], [0], [1], [0, 0, 1, 1], [], []>} : vector<8x32xbf16>, vector<32x32xbf16>, vector<8x32xf32> -> vector<8x32xf32>
    %c2_69 = arith.constant 2 : index
    %c0_70 = arith.constant 0 : index
    %c0_71 = arith.constant 0 : index
    %94 = vector.load %arg6[%c2_69, %c0_70, %c0_71] : memref<6x1x32xf32, #tpu.memory_space<vmem>>, vector<1x1x32xf32>
    %95 = vector.shape_cast %94 : vector<1x1x32xf32> to vector<1x32xf32>
    %96 = vector.broadcast %95 : vector<1x32xf32> to vector<8x32xf32>
    %97 = arith.addf %93, %96 : vector<8x32xf32>
    %98 = vector.extract_strided_slice %97 {offsets = [0, 0], sizes = [1, 32], strides = [1, 1]} : vector<8x32xf32> to vector<1x32xf32>
    %99 = vector.extract_strided_slice %68 {offsets = [0, 96], sizes = [8, 32], strides = [1, 1]} : vector<8x192xf32> to vector<8x32xf32>
    %c3 = arith.constant 3 : index
    %c0_72 = arith.constant 0 : index
    %c0_73 = arith.constant 0 : index
    %100 = vector.load %arg5[%c3, %c0_72, %c0_73] : memref<6x32x32xbf16, #tpu.memory_space<vmem>>, vector<1x32x32xbf16>
    %101 = vector.shape_cast %100 : vector<1x32x32xbf16> to vector<32x32xbf16>
    %102 = arith.truncf %99 : vector<8x32xf32> to vector<8x32xbf16>
    %cst_74 = arith.constant dense<0.000000e+00> : vector<8x32xf32>
    %103 = tpu.matmul %102, %101, %cst_74 {dimension_numbers = #tpu.dot_dimension_numbers<[1], [0], [0], [1], [0, 0, 1, 1], [], []>} : vector<8x32xbf16>, vector<32x32xbf16>, vector<8x32xf32> -> vector<8x32xf32>
    %c3_75 = arith.constant 3 : index
    %c0_76 = arith.constant 0 : index
    %c0_77 = arith.constant 0 : index
    %104 = vector.load %arg6[%c3_75, %c0_76, %c0_77] : memref<6x1x32xf32, #tpu.memory_space<vmem>>, vector<1x1x32xf32>
    %105 = vector.shape_cast %104 : vector<1x1x32xf32> to vector<1x32xf32>
    %106 = vector.broadcast %105 : vector<1x32xf32> to vector<8x32xf32>
    %107 = arith.addf %103, %106 : vector<8x32xf32>
    %108 = vector.extract_strided_slice %107 {offsets = [0, 0], sizes = [1, 32], strides = [1, 1]} : vector<8x32xf32> to vector<1x32xf32>
    %109 = vector.extract_strided_slice %68 {offsets = [0, 128], sizes = [8, 32], strides = [1, 1]} : vector<8x192xf32> to vector<8x32xf32>
    %c4 = arith.constant 4 : index
    %c0_78 = arith.constant 0 : index
    %c0_79 = arith.constant 0 : index
    %110 = vector.load %arg5[%c4, %c0_78, %c0_79] : memref<6x32x32xbf16, #tpu.memory_space<vmem>>, vector<1x32x32xbf16>
    %111 = vector.shape_cast %110 : vector<1x32x32xbf16> to vector<32x32xbf16>
    %112 = arith.truncf %109 : vector<8x32xf32> to vector<8x32xbf16>
    %cst_80 = arith.constant dense<0.000000e+00> : vector<8x32xf32>
    %113 = tpu.matmul %112, %111, %cst_80 {dimension_numbers = #tpu.dot_dimension_numbers<[1], [0], [0], [1], [0, 0, 1, 1], [], []>} : vector<8x32xbf16>, vector<32x32xbf16>, vector<8x32xf32> -> vector<8x32xf32>
    %c4_81 = arith.constant 4 : index
    %c0_82 = arith.constant 0 : index
    %c0_83 = arith.constant 0 : index
    %114 = vector.load %arg6[%c4_81, %c0_82, %c0_83] : memref<6x1x32xf32, #tpu.memory_space<vmem>>, vector<1x1x32xf32>
    %115 = vector.shape_cast %114 : vector<1x1x32xf32> to vector<1x32xf32>
    %116 = vector.broadcast %115 : vector<1x32xf32> to vector<8x32xf32>
    %117 = arith.addf %113, %116 : vector<8x32xf32>
    %118 = vector.extract_strided_slice %117 {offsets = [0, 0], sizes = [1, 32], strides = [1, 1]} : vector<8x32xf32> to vector<1x32xf32>
    %119 = vector.extract_strided_slice %68 {offsets = [0, 160], sizes = [8, 32], strides = [1, 1]} : vector<8x192xf32> to vector<8x32xf32>
    %c5 = arith.constant 5 : index
    %c0_84 = arith.constant 0 : index
    %c0_85 = arith.constant 0 : index
    %120 = vector.load %arg5[%c5, %c0_84, %c0_85] : memref<6x32x32xbf16, #tpu.memory_space<vmem>>, vector<1x32x32xbf16>
    %121 = vector.shape_cast %120 : vector<1x32x32xbf16> to vector<32x32xbf16>
    %122 = arith.truncf %119 : vector<8x32xf32> to vector<8x32xbf16>
    %cst_86 = arith.constant dense<0.000000e+00> : vector<8x32xf32>
    %123 = tpu.matmul %122, %121, %cst_86 {dimension_numbers = #tpu.dot_dimension_numbers<[1], [0], [0], [1], [0, 0, 1, 1], [], []>} : vector<8x32xbf16>, vector<32x32xbf16>, vector<8x32xf32> -> vector<8x32xf32>
    %c5_87 = arith.constant 5 : index
    %c0_88 = arith.constant 0 : index
    %c0_89 = arith.constant 0 : index
    %124 = vector.load %arg6[%c5_87, %c0_88, %c0_89] : memref<6x1x32xf32, #tpu.memory_space<vmem>>, vector<1x1x32xf32>
    %125 = vector.shape_cast %124 : vector<1x1x32xf32> to vector<1x32xf32>
    %126 = vector.broadcast %125 : vector<1x32xf32> to vector<8x32xf32>
    %127 = arith.addf %123, %126 : vector<8x32xf32>
    %128 = vector.extract_strided_slice %127 {offsets = [0, 0], sizes = [1, 32], strides = [1, 1]} : vector<8x32xf32> to vector<1x32xf32>
    %cst_90 = arith.constant dense<0.000000e+00> : vector<8xf32>
    %129 = vector.multi_reduction <add>, %19, %cst_90 [1] : vector<8x32xf32> to vector<8xf32>
    %130 = vector.shape_cast %129 : vector<8xf32> to vector<8x1xf32>
    %cst_91 = arith.constant 3.200000e+01 : f32
    %131 = vector.broadcast %cst_91 : f32 to vector<8x1xf32>
    %132 = arith.divf %130, %131 : vector<8x1xf32>
    %133 = vector.broadcast %132 : vector<8x1xf32> to vector<8x32xf32>
    %134 = arith.subf %19, %133 : vector<8x32xf32>
    %135 = arith.mulf %134, %134 : vector<8x32xf32>
    %cst_92 = arith.constant dense<0.000000e+00> : vector<8xf32>
    %136 = vector.multi_reduction <add>, %135, %cst_92 [1] : vector<8x32xf32> to vector<8xf32>
    %137 = vector.shape_cast %136 : vector<8xf32> to vector<8x1xf32>
    %cst_93 = arith.constant 3.200000e+01 : f32
    %138 = vector.broadcast %cst_93 : f32 to vector<8x1xf32>
    %139 = arith.divf %137, %138 : vector<8x1xf32>
    %140 = vector.broadcast %132 : vector<8x1xf32> to vector<8x32xf32>
    %141 = arith.subf %19, %140 : vector<8x32xf32>
    %cst_94 = arith.constant 9.99999974E-6 : f32
    %142 = vector.broadcast %cst_94 : f32 to vector<8x1xf32>
    %143 = arith.addf %139, %142 : vector<8x1xf32>
    %144 = math.rsqrt %143 : vector<8x1xf32>
    %145 = vector.broadcast %144 : vector<8x1xf32> to vector<8x32xf32>
    %146 = arith.mulf %141, %145 : vector<8x32xf32>
    %147 = vector.broadcast %11 : vector<1x32xf32> to vector<8x32xf32>
    %148 = arith.mulf %146, %147 : vector<8x32xf32>
    %149 = vector.broadcast %13 : vector<1x32xf32> to vector<8x32xf32>
    %150 = arith.addf %148, %149 : vector<8x32xf32>
    %151 = vector.broadcast %78 : vector<1x32xf32> to vector<8x32xf32>
    %152 = arith.mulf %150, %151 : vector<8x32xf32>
    %153 = vector.broadcast %98 : vector<1x32xf32> to vector<8x32xf32>
    %154 = arith.addf %152, %153 : vector<8x32xf32>
    %155 = arith.truncf %154 : vector<8x32xf32> to vector<8x32xbf16>
    %cst_95 = arith.constant dense<0.000000e+00> : vector<8x96xf32>
    %156 = tpu.matmul %155, %2, %cst_95 {dimension_numbers = #tpu.dot_dimension_numbers<[1], [0], [0], [1], [0, 0, 1, 1], [], []>} : vector<8x32xbf16>, vector<32x96xbf16>, vector<8x96xf32> -> vector<8x96xf32>
    %157 = vector.broadcast %3 : vector<1x96xf32> to vector<8x96xf32>
    %158 = arith.addf %156, %157 : vector<8x96xf32>
    %159 = vector.extract_strided_slice %158 {offsets = [0, 0], sizes = [8, 8], strides = [1, 1]} : vector<8x96xf32> to vector<8x8xf32>
    %160 = vector.extract_strided_slice %158 {offsets = [0, 32], sizes = [8, 8], strides = [1, 1]} : vector<8x96xf32> to vector<8x8xf32>
    %161 = vector.extract_strided_slice %158 {offsets = [0, 64], sizes = [8, 8], strides = [1, 1]} : vector<8x96xf32> to vector<8x8xf32>
    %cst_96 = arith.constant dense<0.000000e+00> : vector<8x8xf32>
    %162 = tpu.matmul %159, %160, %cst_96 {dimension_numbers = #tpu.dot_dimension_numbers<[1], [1], [0], [0], [0, 0, 1, 0], [], []>, precision = #tpu.contract_precision<fp32>} : vector<8x8xf32>, vector<8x8xf32>, vector<8x8xf32> -> vector<8x8xf32>
    %cst_97 = arith.constant dense<0xFF800000> : vector<8xf32>
    %163 = vector.multi_reduction <maximumf>, %162, %cst_97 [1] : vector<8x8xf32> to vector<8xf32>
    %164 = vector.shape_cast %163 : vector<8xf32> to vector<8x1xf32>
    %165 = vector.broadcast %164 : vector<8x1xf32> to vector<8x8xf32>
    %166 = arith.subf %162, %165 : vector<8x8xf32>
    %167 = math.exp %166 : vector<8x8xf32>
    %cst_98 = arith.constant dense<0.000000e+00> : vector<8xf32>
    %168 = vector.multi_reduction <add>, %167, %cst_98 [1] : vector<8x8xf32> to vector<8xf32>
    %169 = vector.shape_cast %168 : vector<8xf32> to vector<8x1xf32>
    %170 = tpu.reciprocal %169 {approx = true} : vector<8x1xf32> -> vector<8x1xf32>
    %171 = vector.broadcast %170 : vector<8x1xf32> to vector<8x8xf32>
    %172 = arith.mulf %167, %171 : vector<8x8xf32>
    %173 = arith.truncf %172 : vector<8x8xf32> to vector<8x8xbf16>
    %174 = arith.truncf %161 : vector<8x8xf32> to vector<8x8xbf16>
    %cst_99 = arith.constant dense<0.000000e+00> : vector<8x8xf32>
    %175 = tpu.matmul %173, %174, %cst_99 {dimension_numbers = #tpu.dot_dimension_numbers<[1], [0], [0], [1], [0, 0, 1, 1], [], []>} : vector<8x8xbf16>, vector<8x8xbf16>, vector<8x8xf32> -> vector<8x8xf32>
    %176 = vector.extract_strided_slice %158 {offsets = [0, 8], sizes = [8, 8], strides = [1, 1]} : vector<8x96xf32> to vector<8x8xf32>
    %177 = vector.extract_strided_slice %158 {offsets = [0, 40], sizes = [8, 8], strides = [1, 1]} : vector<8x96xf32> to vector<8x8xf32>
    %178 = vector.extract_strided_slice %158 {offsets = [0, 72], sizes = [8, 8], strides = [1, 1]} : vector<8x96xf32> to vector<8x8xf32>
    %cst_100 = arith.constant dense<0.000000e+00> : vector<8x8xf32>
    %179 = tpu.matmul %176, %177, %cst_100 {dimension_numbers = #tpu.dot_dimension_numbers<[1], [1], [0], [0], [0, 0, 1, 0], [], []>, precision = #tpu.contract_precision<fp32>} : vector<8x8xf32>, vector<8x8xf32>, vector<8x8xf32> -> vector<8x8xf32>
    %cst_101 = arith.constant dense<0xFF800000> : vector<8xf32>
    %180 = vector.multi_reduction <maximumf>, %179, %cst_101 [1] : vector<8x8xf32> to vector<8xf32>
    %181 = vector.shape_cast %180 : vector<8xf32> to vector<8x1xf32>
    %182 = vector.broadcast %181 : vector<8x1xf32> to vector<8x8xf32>
    %183 = arith.subf %179, %182 : vector<8x8xf32>
    %184 = math.exp %183 : vector<8x8xf32>
    %cst_102 = arith.constant dense<0.000000e+00> : vector<8xf32>
    %185 = vector.multi_reduction <add>, %184, %cst_102 [1] : vector<8x8xf32> to vector<8xf32>
    %186 = vector.shape_cast %185 : vector<8xf32> to vector<8x1xf32>
    %187 = tpu.reciprocal %186 {approx = true} : vector<8x1xf32> -> vector<8x1xf32>
    %188 = vector.broadcast %187 : vector<8x1xf32> to vector<8x8xf32>
    %189 = arith.mulf %184, %188 : vector<8x8xf32>
    %190 = arith.truncf %189 : vector<8x8xf32> to vector<8x8xbf16>
    %191 = arith.truncf %178 : vector<8x8xf32> to vector<8x8xbf16>
    %cst_103 = arith.constant dense<0.000000e+00> : vector<8x8xf32>
    %192 = tpu.matmul %190, %191, %cst_103 {dimension_numbers = #tpu.dot_dimension_numbers<[1], [0], [0], [1], [0, 0, 1, 1], [], []>} : vector<8x8xbf16>, vector<8x8xbf16>, vector<8x8xf32> -> vector<8x8xf32>
    %193 = vector.extract_strided_slice %158 {offsets = [0, 16], sizes = [8, 8], strides = [1, 1]} : vector<8x96xf32> to vector<8x8xf32>
    %194 = vector.extract_strided_slice %158 {offsets = [0, 48], sizes = [8, 8], strides = [1, 1]} : vector<8x96xf32> to vector<8x8xf32>
    %195 = vector.extract_strided_slice %158 {offsets = [0, 80], sizes = [8, 8], strides = [1, 1]} : vector<8x96xf32> to vector<8x8xf32>
    %cst_104 = arith.constant dense<0.000000e+00> : vector<8x8xf32>
    %196 = tpu.matmul %193, %194, %cst_104 {dimension_numbers = #tpu.dot_dimension_numbers<[1], [1], [0], [0], [0, 0, 1, 0], [], []>, precision = #tpu.contract_precision<fp32>} : vector<8x8xf32>, vector<8x8xf32>, vector<8x8xf32> -> vector<8x8xf32>
    %cst_105 = arith.constant dense<0xFF800000> : vector<8xf32>
    %197 = vector.multi_reduction <maximumf>, %196, %cst_105 [1] : vector<8x8xf32> to vector<8xf32>
    %198 = vector.shape_cast %197 : vector<8xf32> to vector<8x1xf32>
    %199 = vector.broadcast %198 : vector<8x1xf32> to vector<8x8xf32>
    %200 = arith.subf %196, %199 : vector<8x8xf32>
    %201 = math.exp %200 : vector<8x8xf32>
    %cst_106 = arith.constant dense<0.000000e+00> : vector<8xf32>
    %202 = vector.multi_reduction <add>, %201, %cst_106 [1] : vector<8x8xf32> to vector<8xf32>
    %203 = vector.shape_cast %202 : vector<8xf32> to vector<8x1xf32>
    %204 = tpu.reciprocal %203 {approx = true} : vector<8x1xf32> -> vector<8x1xf32>
    %205 = vector.broadcast %204 : vector<8x1xf32> to vector<8x8xf32>
    %206 = arith.mulf %201, %205 : vector<8x8xf32>
    %207 = arith.truncf %206 : vector<8x8xf32> to vector<8x8xbf16>
    %208 = arith.truncf %195 : vector<8x8xf32> to vector<8x8xbf16>
    %cst_107 = arith.constant dense<0.000000e+00> : vector<8x8xf32>
    %209 = tpu.matmul %207, %208, %cst_107 {dimension_numbers = #tpu.dot_dimension_numbers<[1], [0], [0], [1], [0, 0, 1, 1], [], []>} : vector<8x8xbf16>, vector<8x8xbf16>, vector<8x8xf32> -> vector<8x8xf32>
    %210 = vector.extract_strided_slice %158 {offsets = [0, 24], sizes = [8, 8], strides = [1, 1]} : vector<8x96xf32> to vector<8x8xf32>
    %211 = vector.extract_strided_slice %158 {offsets = [0, 56], sizes = [8, 8], strides = [1, 1]} : vector<8x96xf32> to vector<8x8xf32>
    %212 = vector.extract_strided_slice %158 {offsets = [0, 88], sizes = [8, 8], strides = [1, 1]} : vector<8x96xf32> to vector<8x8xf32>
    %cst_108 = arith.constant dense<0.000000e+00> : vector<8x8xf32>
    %213 = tpu.matmul %210, %211, %cst_108 {dimension_numbers = #tpu.dot_dimension_numbers<[1], [1], [0], [0], [0, 0, 1, 0], [], []>, precision = #tpu.contract_precision<fp32>} : vector<8x8xf32>, vector<8x8xf32>, vector<8x8xf32> -> vector<8x8xf32>
    %cst_109 = arith.constant dense<0xFF800000> : vector<8xf32>
    %214 = vector.multi_reduction <maximumf>, %213, %cst_109 [1] : vector<8x8xf32> to vector<8xf32>
    %215 = vector.shape_cast %214 : vector<8xf32> to vector<8x1xf32>
    %216 = vector.broadcast %215 : vector<8x1xf32> to vector<8x8xf32>
    %217 = arith.subf %213, %216 : vector<8x8xf32>
    %218 = math.exp %217 : vector<8x8xf32>
    %cst_110 = arith.constant dense<0.000000e+00> : vector<8xf32>
    %219 = vector.multi_reduction <add>, %218, %cst_110 [1] : vector<8x8xf32> to vector<8xf32>
    %220 = vector.shape_cast %219 : vector<8xf32> to vector<8x1xf32>
    %221 = tpu.reciprocal %220 {approx = true} : vector<8x1xf32> -> vector<8x1xf32>
    %222 = vector.broadcast %221 : vector<8x1xf32> to vector<8x8xf32>
    %223 = arith.mulf %218, %222 : vector<8x8xf32>
    %224 = arith.truncf %223 : vector<8x8xf32> to vector<8x8xbf16>
    %225 = arith.truncf %212 : vector<8x8xf32> to vector<8x8xbf16>
    %cst_111 = arith.constant dense<0.000000e+00> : vector<8x8xf32>
    %226 = tpu.matmul %224, %225, %cst_111 {dimension_numbers = #tpu.dot_dimension_numbers<[1], [0], [0], [1], [0, 0, 1, 1], [], []>} : vector<8x8xbf16>, vector<8x8xbf16>, vector<8x8xf32> -> vector<8x8xf32>
    %227 = tpu.concatenate %175, %192, %209, %226 in 1 : vector<8x8xf32>, vector<8x8xf32>, vector<8x8xf32>, vector<8x8xf32> -> vector<8x32xf32>
    %228 = arith.truncf %227 : vector<8x32xf32> to vector<8x32xbf16>
    %cst_112 = arith.constant dense<0.000000e+00> : vector<8x32xf32>
    %229 = tpu.matmul %228, %4, %cst_112 {dimension_numbers = #tpu.dot_dimension_numbers<[1], [0], [0], [1], [0, 0, 1, 1], [], []>} : vector<8x32xbf16>, vector<32x32xbf16>, vector<8x32xf32> -> vector<8x32xf32>
    %230 = vector.broadcast %5 : vector<1x32xf32> to vector<8x32xf32>
    %231 = arith.addf %229, %230 : vector<8x32xf32>
    %232 = vector.broadcast %88 : vector<1x32xf32> to vector<8x32xf32>
    %233 = arith.mulf %231, %232 : vector<8x32xf32>
    %234 = arith.addf %19, %233 : vector<8x32xf32>
    %cst_113 = arith.constant dense<0.000000e+00> : vector<8xf32>
    %235 = vector.multi_reduction <add>, %234, %cst_113 [1] : vector<8x32xf32> to vector<8xf32>
    %236 = vector.shape_cast %235 : vector<8xf32> to vector<8x1xf32>
    %cst_114 = arith.constant 3.200000e+01 : f32
    %237 = vector.broadcast %cst_114 : f32 to vector<8x1xf32>
    %238 = arith.divf %236, %237 : vector<8x1xf32>
    %239 = vector.broadcast %238 : vector<8x1xf32> to vector<8x32xf32>
    %240 = arith.subf %234, %239 : vector<8x32xf32>
    %241 = arith.mulf %240, %240 : vector<8x32xf32>
    %cst_115 = arith.constant dense<0.000000e+00> : vector<8xf32>
    %242 = vector.multi_reduction <add>, %241, %cst_115 [1] : vector<8x32xf32> to vector<8xf32>
    %243 = vector.shape_cast %242 : vector<8xf32> to vector<8x1xf32>
    %cst_116 = arith.constant 3.200000e+01 : f32
    %244 = vector.broadcast %cst_116 : f32 to vector<8x1xf32>
    %245 = arith.divf %243, %244 : vector<8x1xf32>
    %246 = vector.broadcast %238 : vector<8x1xf32> to vector<8x32xf32>
    %247 = arith.subf %234, %246 : vector<8x32xf32>
    %cst_117 = arith.constant 9.99999974E-6 : f32
    %248 = vector.broadcast %cst_117 : f32 to vector<8x1xf32>
    %249 = arith.addf %245, %248 : vector<8x1xf32>
    %250 = math.rsqrt %249 : vector<8x1xf32>
    %251 = vector.broadcast %250 : vector<8x1xf32> to vector<8x32xf32>
    %252 = arith.mulf %247, %251 : vector<8x32xf32>
    %253 = vector.broadcast %15 : vector<1x32xf32> to vector<8x32xf32>
    %254 = arith.mulf %252, %253 : vector<8x32xf32>
    %255 = vector.broadcast %17 : vector<1x32xf32> to vector<8x32xf32>
    %256 = arith.addf %254, %255 : vector<8x32xf32>
    %257 = vector.broadcast %108 : vector<1x32xf32> to vector<8x32xf32>
    %258 = arith.mulf %256, %257 : vector<8x32xf32>
    %259 = vector.broadcast %128 : vector<1x32xf32> to vector<8x32xf32>
    %260 = arith.addf %258, %259 : vector<8x32xf32>
    %261 = arith.truncf %260 : vector<8x32xf32> to vector<8x32xbf16>
    %cst_118 = arith.constant dense<0.000000e+00> : vector<8x64xf32>
    %262 = tpu.matmul %261, %6, %cst_118 {dimension_numbers = #tpu.dot_dimension_numbers<[1], [0], [0], [1], [0, 0, 1, 1], [], []>} : vector<8x32xbf16>, vector<32x64xbf16>, vector<8x64xf32> -> vector<8x64xf32>
    %263 = vector.broadcast %7 : vector<1x64xf32> to vector<8x64xf32>
    %264 = arith.addf %262, %263 : vector<8x64xf32>
    %cst_119 = arith.constant 5.000000e-01 : f32
    %265 = vector.broadcast %cst_119 : f32 to vector<8x64xf32>
    %266 = arith.mulf %265, %264 : vector<8x64xf32>
    %cst_120 = arith.constant 0.707106769 : f32
    %267 = vector.broadcast %cst_120 : f32 to vector<8x64xf32>
    %268 = arith.mulf %264, %267 : vector<8x64xf32>
    %cst_121 = arith.constant 0.000000e+00 : f32
    %269 = vector.broadcast %cst_121 : f32 to vector<8x64xf32>
    %270 = arith.cmpf oge, %268, %269 : vector<8x64xf32>
    %cst_122 = arith.constant 1.000000e+00 : f32
    %cst_123 = arith.constant -1.000000e+00 : f32
    %271 = vector.broadcast %cst_122 : f32 to vector<8x64xf32>
    %272 = vector.broadcast %cst_123 : f32 to vector<8x64xf32>
    %273 = arith.select %270, %271, %272 : vector<8x64xi1>, vector<8x64xf32>
    %274 = math.absf %268 : vector<8x64xf32>
    %cst_124 = arith.constant 0.327591091 : f32
    %275 = vector.broadcast %cst_124 : f32 to vector<8x64xf32>
    %276 = arith.mulf %275, %274 : vector<8x64xf32>
    %cst_125 = arith.constant 1.000000e+00 : f32
    %277 = vector.broadcast %cst_125 : f32 to vector<8x64xf32>
    %278 = arith.addf %277, %276 : vector<8x64xf32>
    %cst_126 = arith.constant 1.000000e+00 : f32
    %279 = vector.broadcast %cst_126 : f32 to vector<8x64xf32>
    %280 = arith.divf %279, %278 : vector<8x64xf32>
    %cst_127 = arith.constant 1.06140542 : f32
    %281 = vector.broadcast %cst_127 : f32 to vector<8x64xf32>
    %282 = arith.mulf %281, %280 : vector<8x64xf32>
    %cst_128 = arith.constant -1.45315206 : f32
    %283 = vector.broadcast %cst_128 : f32 to vector<8x64xf32>
    %284 = arith.addf %282, %283 : vector<8x64xf32>
    %285 = arith.mulf %284, %280 : vector<8x64xf32>
    %cst_129 = arith.constant 1.42141378 : f32
    %286 = vector.broadcast %cst_129 : f32 to vector<8x64xf32>
    %287 = arith.addf %285, %286 : vector<8x64xf32>
    %288 = arith.mulf %287, %280 : vector<8x64xf32>
    %cst_130 = arith.constant -0.284496725 : f32
    %289 = vector.broadcast %cst_130 : f32 to vector<8x64xf32>
    %290 = arith.addf %288, %289 : vector<8x64xf32>
    %291 = arith.mulf %290, %280 : vector<8x64xf32>
    %cst_131 = arith.constant 0.254829586 : f32
    %292 = vector.broadcast %cst_131 : f32 to vector<8x64xf32>
    %293 = arith.addf %291, %292 : vector<8x64xf32>
    %294 = arith.mulf %293, %280 : vector<8x64xf32>
    %cst_132 = arith.constant 0.000000e+00 : f32
    %295 = vector.broadcast %cst_132 : f32 to vector<8x64xf32>
    %296 = arith.subf %295, %274 : vector<8x64xf32>
    %297 = arith.mulf %296, %274 : vector<8x64xf32>
    %298 = math.exp %297 : vector<8x64xf32>
    %299 = arith.mulf %294, %298 : vector<8x64xf32>
    %cst_133 = arith.constant 1.000000e+00 : f32
    %300 = vector.broadcast %cst_133 : f32 to vector<8x64xf32>
    %301 = arith.subf %300, %299 : vector<8x64xf32>
    %302 = arith.mulf %273, %301 : vector<8x64xf32>
    %cst_134 = arith.constant 1.000000e+00 : f32
    %303 = vector.broadcast %cst_134 : f32 to vector<8x64xf32>
    %304 = arith.addf %303, %302 : vector<8x64xf32>
    %305 = arith.mulf %266, %304 : vector<8x64xf32>
    %306 = arith.truncf %305 : vector<8x64xf32> to vector<8x64xbf16>
    %cst_135 = arith.constant dense<0.000000e+00> : vector<8x32xf32>
    %307 = tpu.matmul %306, %8, %cst_135 {dimension_numbers = #tpu.dot_dimension_numbers<[1], [0], [0], [1], [0, 0, 1, 1], [], []>} : vector<8x64xbf16>, vector<64x32xbf16>, vector<8x32xf32> -> vector<8x32xf32>
    %308 = vector.broadcast %9 : vector<1x32xf32> to vector<8x32xf32>
    %309 = arith.addf %307, %308 : vector<8x32xf32>
    %310 = vector.broadcast %118 : vector<1x32xf32> to vector<8x32xf32>
    %311 = arith.mulf %309, %310 : vector<8x32xf32>
    %312 = arith.addf %234, %311 : vector<8x32xf32>
    %c0_136 = arith.constant 0 : index
    %c0_137 = arith.constant 0 : index
    %c0_138 = arith.constant 0 : index
    %313 = vector.load %arg17[%c0_136, %c0_137, %c0_138] : memref<1x8x32xf32, #tpu.memory_space<vmem>>, vector<1x8x32xf32>
    %314 = vector.shape_cast %313 : vector<1x8x32xf32> to vector<8x32xf32>
    %315 = vector.shape_cast %312 : vector<8x32xf32> to vector<1x8x32xf32>
    tpu.vector_store %arg17[%c0_136, %c0_137, %c0_138], %315 {strides = array<i32>} : memref<1x8x32xf32, #tpu.memory_space<vmem>>, vector<1x8x32xf32>,
    return
  }
  func.func @transform_0(%arg0: i32) -> (i32, i32, i32) {
    %c0_i32 = arith.constant 0 : i32
    %c0_i32_0 = arith.constant 0 : i32
    %c0_i32_1 = arith.constant 0 : i32
    return %arg0, %c0_i32, %c0_i32_0 : i32, i32, i32
  }
  func.func @transform_1(%arg0: i32) -> (i32, i32, i32) {
    %c0_i32 = arith.constant 0 : i32
    %c0_i32_0 = arith.constant 0 : i32
    %c0_i32_1 = arith.constant 0 : i32
    return %arg0, %c0_i32, %c0_i32_0 : i32, i32, i32
  }
  func.func @transform_2(%arg0: i32) -> (i32, i32) {
    %c0_i32 = arith.constant 0 : i32
    %c0_i32_0 = arith.constant 0 : i32
    %c0_i32_1 = arith.constant 0 : i32
    return %c0_i32, %c0_i32_0 : i32, i32
  }
  func.func @transform_3(%arg0: i32) -> (i32, i32) {
    %c0_i32 = arith.constant 0 : i32
    %c0_i32_0 = arith.constant 0 : i32
    %c0_i32_1 = arith.constant 0 : i32
    return %c0_i32, %c0_i32_0 : i32, i32
  }
  func.func @transform_4(%arg0: i32) -> (i32, i32, i32) {
    %c0_i32 = arith.constant 0 : i32
    %c0_i32_0 = arith.constant 0 : i32
    %c0_i32_1 = arith.constant 0 : i32
    %c0_i32_2 = arith.constant 0 : i32
    return %c0_i32, %c0_i32_0, %c0_i32_1 : i32, i32, i32
  }
  func.func @transform_5(%arg0: i32) -> (i32, i32, i32) {
    %c0_i32 = arith.constant 0 : i32
    %c0_i32_0 = arith.constant 0 : i32
    %c0_i32_1 = arith.constant 0 : i32
    %c0_i32_2 = arith.constant 0 : i32
    return %c0_i32, %c0_i32_0, %c0_i32_1 : i32, i32, i32
  }
  func.func @transform_6(%arg0: i32) -> (i32, i32, i32) {
    %c0_i32 = arith.constant 0 : i32
    %c0_i32_0 = arith.constant 0 : i32
    %c0_i32_1 = arith.constant 0 : i32
    %c0_i32_2 = arith.constant 0 : i32
    return %c0_i32, %c0_i32_0, %c0_i32_1 : i32, i32, i32
  }
  func.func @transform_7(%arg0: i32) -> (i32, i32, i32) {
    %c0_i32 = arith.constant 0 : i32
    %c0_i32_0 = arith.constant 0 : i32
    %c0_i32_1 = arith.constant 0 : i32
    %c0_i32_2 = arith.constant 0 : i32
    return %c0_i32, %c0_i32_0, %c0_i32_1 : i32, i32, i32
  }
  func.func @transform_8(%arg0: i32) -> (i32, i32) {
    %c0_i32 = arith.constant 0 : i32
    %c0_i32_0 = arith.constant 0 : i32
    %c0_i32_1 = arith.constant 0 : i32
    return %c0_i32, %c0_i32_0 : i32, i32
  }
  func.func @transform_9(%arg0: i32) -> (i32, i32) {
    %c0_i32 = arith.constant 0 : i32
    %c0_i32_0 = arith.constant 0 : i32
    %c0_i32_1 = arith.constant 0 : i32
    return %c0_i32, %c0_i32_0 : i32, i32
  }
  func.func @transform_10(%arg0: i32) -> (i32, i32) {
    %c0_i32 = arith.constant 0 : i32
    %c0_i32_0 = arith.constant 0 : i32
    %c0_i32_1 = arith.constant 0 : i32
    return %c0_i32, %c0_i32_0 : i32, i32
  }
  func.func @transform_11(%arg0: i32) -> (i32, i32) {
    %c0_i32 = arith.constant 0 : i32
    %c0_i32_0 = arith.constant 0 : i32
    %c0_i32_1 = arith.constant 0 : i32
    return %c0_i32, %c0_i32_0 : i32, i32
  }
  func.func @transform_12(%arg0: i32) -> (i32, i32) {
    %c0_i32 = arith.constant 0 : i32
    %c0_i32_0 = arith.constant 0 : i32
    %c0_i32_1 = arith.constant 0 : i32
    return %c0_i32, %c0_i32_0 : i32, i32
  }
  func.func @transform_13(%arg0: i32) -> (i32, i32) {
    %c0_i32 = arith.constant 0 : i32
    %c0_i32_0 = arith.constant 0 : i32
    %c0_i32_1 = arith.constant 0 : i32
    return %c0_i32, %c0_i32_0 : i32, i32
  }
  func.func @transform_14(%arg0: i32) -> (i32, i32) {
    %c0_i32 = arith.constant 0 : i32
    %c0_i32_0 = arith.constant 0 : i32
    %c0_i32_1 = arith.constant 0 : i32
    return %c0_i32, %c0_i32_0 : i32, i32
  }
  func.func @transform_15(%arg0: i32) -> (i32, i32) {
    %c0_i32 = arith.constant 0 : i32
    %c0_i32_0 = arith.constant 0 : i32
    %c0_i32_1 = arith.constant 0 : i32
    return %c0_i32, %c0_i32_0 : i32, i32
  }
  func.func @transform_16(%arg0: i32) -> (i32, i32, i32) {
    %c0_i32 = arith.constant 0 : i32
    %c0_i32_0 = arith.constant 0 : i32
    %c0_i32_1 = arith.constant 0 : i32
    return %arg0, %c0_i32, %c0_i32_0 : i32, i32, i32
  }
}

module attributes {stable_mosaic.version = 11 : i64} {
  func.func @_encoder_block_kernel(%arg0: i32, %arg1: memref<1x8x32xf32, #tpu.memory_space<vmem>>, %arg2: memref<1x1x32xf32, #tpu.memory_space<vmem>>, %arg3: memref<32x192xbf16, #tpu.memory_space<vmem>>, %arg4: memref<1x192xf32, #tpu.memory_space<vmem>>, %arg5: memref<6x32x32xbf16, #tpu.memory_space<vmem>>, %arg6: memref<6x1x32xf32, #tpu.memory_space<vmem>>, %arg7: memref<2x1x32xf32, #tpu.memory_space<vmem>>, %arg8: memref<2x1x32xf32, #tpu.memory_space<vmem>>, %arg9: memref<32x96xbf16, #tpu.memory_space<vmem>>, %arg10: memref<1x96xf32, #tpu.memory_space<vmem>>, %arg11: memref<32x32xbf16, #tpu.memory_space<vmem>>, %arg12: memref<1x32xf32, #tpu.memory_space<vmem>>, %arg13: memref<32x64xbf16, #tpu.memory_space<vmem>>, %arg14: memref<1x64xf32, #tpu.memory_space<vmem>>, %arg15: memref<64x32xbf16, #tpu.memory_space<vmem>>, %arg16: memref<1x32xf32, #tpu.memory_space<vmem>>, %arg17: memref<1x8x32xf32, #tpu.memory_space<vmem>>) attributes {dimension_semantics = [#tpu.dimension_semantics<parallel>], iteration_bounds = array<i64: 2>, scalar_prefetch = 0 : i64, scratch_operands = 0 : i64, tpu.core_type = #tpu.core_type<tc>, window_params = [{transform_indices = @transform_0, window_bounds = array<i64: 1, 8, 32>}, {transform_indices = @transform_1, window_bounds = array<i64: 1, 1, 32>}, {pipeline_mode = #tpu.pipeline_mode<synchronous>, transform_indices = @transform_2, window_bounds = array<i64: 32, 192>}, {pipeline_mode = #tpu.pipeline_mode<synchronous>, transform_indices = @transform_3, window_bounds = array<i64: 1, 192>}, {pipeline_mode = #tpu.pipeline_mode<synchronous>, transform_indices = @transform_4, window_bounds = array<i64: 6, 32, 32>}, {pipeline_mode = #tpu.pipeline_mode<synchronous>, transform_indices = @transform_5, window_bounds = array<i64: 6, 1, 32>}, {pipeline_mode = #tpu.pipeline_mode<synchronous>, transform_indices = @transform_6, window_bounds = array<i64: 2, 1, 32>}, {pipeline_mode = #tpu.pipeline_mode<synchronous>, transform_indices = @transform_7, window_bounds = array<i64: 2, 1, 32>}, {pipeline_mode = #tpu.pipeline_mode<synchronous>, transform_indices = @transform_8, window_bounds = array<i64: 32, 96>}, {pipeline_mode = #tpu.pipeline_mode<synchronous>, transform_indices = @transform_9, window_bounds = array<i64: 1, 96>}, {pipeline_mode = #tpu.pipeline_mode<synchronous>, transform_indices = @transform_10, window_bounds = array<i64: 32, 32>}, {pipeline_mode = #tpu.pipeline_mode<synchronous>, transform_indices = @transform_11, window_bounds = array<i64: 1, 32>}, {pipeline_mode = #tpu.pipeline_mode<synchronous>, transform_indices = @transform_12, window_bounds = array<i64: 32, 64>}, {pipeline_mode = #tpu.pipeline_mode<synchronous>, transform_indices = @transform_13, window_bounds = array<i64: 1, 64>}, {pipeline_mode = #tpu.pipeline_mode<synchronous>, transform_indices = @transform_14, window_bounds = array<i64: 64, 32>}, {pipeline_mode = #tpu.pipeline_mode<synchronous>, transform_indices = @transform_15, window_bounds = array<i64: 1, 32>}, {transform_indices = @transform_16, window_bounds = array<i64: 1, 8, 32>}]} {
    %c0 = arith.constant 0 : index
    %c0_0 = arith.constant 0 : index
    %0 = vector.load %arg3[%c0, %c0_0] : memref<32x192xbf16, #tpu.memory_space<vmem>>, vector<32x192xbf16>
    %c0_1 = arith.constant 0 : index
    %c0_2 = arith.constant 0 : index
    %1 = vector.load %arg4[%c0_1, %c0_2] : memref<1x192xf32, #tpu.memory_space<vmem>>, vector<1x192xf32>
    %c0_3 = arith.constant 0 : index
    %c0_4 = arith.constant 0 : index
    %2 = vector.load %arg9[%c0_3, %c0_4] : memref<32x96xbf16, #tpu.memory_space<vmem>>, vector<32x96xbf16>
    %c0_5 = arith.constant 0 : index
    %c0_6 = arith.constant 0 : index
    %3 = vector.load %arg10[%c0_5, %c0_6] : memref<1x96xf32, #tpu.memory_space<vmem>>, vector<1x96xf32>
    %c0_7 = arith.constant 0 : index
    %c0_8 = arith.constant 0 : index
    %4 = vector.load %arg11[%c0_7, %c0_8] : memref<32x32xbf16, #tpu.memory_space<vmem>>, vector<32x32xbf16>
    %c0_9 = arith.constant 0 : index
    %c0_10 = arith.constant 0 : index
    %5 = vector.load %arg12[%c0_9, %c0_10] : memref<1x32xf32, #tpu.memory_space<vmem>>, vector<1x32xf32>
    %c0_11 = arith.constant 0 : index
    %c0_12 = arith.constant 0 : index
    %6 = vector.load %arg13[%c0_11, %c0_12] : memref<32x64xbf16, #tpu.memory_space<vmem>>, vector<32x64xbf16>
    %c0_13 = arith.constant 0 : index
    %c0_14 = arith.constant 0 : index
    %7 = vector.load %arg14[%c0_13, %c0_14] : memref<1x64xf32, #tpu.memory_space<vmem>>, vector<1x64xf32>
    %c0_15 = arith.constant 0 : index
    %c0_16 = arith.constant 0 : index
    %8 = vector.load %arg15[%c0_15, %c0_16] : memref<64x32xbf16, #tpu.memory_space<vmem>>, vector<64x32xbf16>
    %c0_17 = arith.constant 0 : index
    %c0_18 = arith.constant 0 : index
    %9 = vector.load %arg16[%c0_17, %c0_18] : memref<1x32xf32, #tpu.memory_space<vmem>>, vector<1x32xf32>
    %c0_19 = arith.constant 0 : index
    %c0_20 = arith.constant 0 : index
    %c0_21 = arith.constant 0 : index
    %10 = vector.load %arg7[%c0_19, %c0_20, %c0_21] : memref<2x1x32xf32, #tpu.memory_space<vmem>>, vector<1x1x32xf32>
    %11 = vector.shape_cast %10 : vector<1x1x32xf32> to vector<1x32xf32>
    %c0_22 = arith.constant 0 : index
    %c0_23 = arith.constant 0 : index
    %c0_24 = arith.constant 0 : index
    %12 = vector.load %arg8[%c0_22, %c0_23, %c0_24] : memref<2x1x32xf32, #tpu.memory_space<vmem>>, vector<1x1x32xf32>
    %13 = vector.shape_cast %12 : vector<1x1x32xf32> to vector<1x32xf32>
    %c1 = arith.constant 1 : index
    %c0_25 = arith.constant 0 : index
    %c0_26 = arith.constant 0 : index
    %14 = vector.load %arg7[%c1, %c0_25, %c0_26] : memref<2x1x32xf32, #tpu.memory_space<vmem>>, vector<1x1x32xf32>
    %15 = vector.shape_cast %14 : vector<1x1x32xf32> to vector<1x32xf32>
    %c1_27 = arith.constant 1 : index
    %c0_28 = arith.constant 0 : index
    %c0_29 = arith.constant 0 : index
    %16 = vector.load %arg8[%c1_27, %c0_28, %c0_29] : memref<2x1x32xf32, #tpu.memory_space<vmem>>, vector<1x1x32xf32>
    %17 = vector.shape_cast %16 : vector<1x1x32xf32> to vector<1x32xf32>
    %c0_30 = arith.constant 0 : index
    %c0_31 = arith.constant 0 : index
    %c0_32 = arith.constant 0 : index
    %18 = vector.load %arg1[%c0_30, %c0_31, %c0_32] : memref<1x8x32xf32, #tpu.memory_space<vmem>>, vector<1x8x32xf32>
    %19 = vector.shape_cast %18 : vector<1x8x32xf32> to vector<8x32xf32>
    %c0_33 = arith.constant 0 : index
    %c0_34 = arith.constant 0 : index
    %c0_35 = arith.constant 0 : index
    %20 = vector.load %arg2[%c0_33, %c0_34, %c0_35] : memref<1x1x32xf32, #tpu.memory_space<vmem>>, vector<1x1x32xf32>
    %21 = vector.shape_cast %20 : vector<1x1x32xf32> to vector<1x32xf32>
    %22 = vector.shape_cast %21 : vector<1x32xf32> to vector<1x32xf32>
    %23 = vector.broadcast %22 : vector<1x32xf32> to vector<8x32xf32>
    %24 = arith.truncf %23 : vector<8x32xf32> to vector<8x32xbf16>
    %cst = arith.constant dense<0.000000e+00> : vector<8x192xf32>
    %25 = tpu.matmul %24, %0, %cst {dimension_numbers = #tpu.dot_dimension_numbers<[1], [0], [0], [1], [0, 0, 1, 1], [], []>} : vector<8x32xbf16>, vector<32x192xbf16>, vector<8x192xf32> -> vector<8x192xf32>
    %26 = vector.broadcast %1 : vector<1x192xf32> to vector<8x192xf32>
    %27 = arith.addf %25, %26 : vector<8x192xf32>
    %cst_36 = arith.constant 5.000000e-01 : f32
    %28 = vector.broadcast %cst_36 : f32 to vector<8x192xf32>
    %29 = arith.mulf %28, %27 : vector<8x192xf32>
    %cst_37 = arith.constant 0.707106769 : f32
    %30 = vector.broadcast %cst_37 : f32 to vector<8x192xf32>
    %31 = arith.mulf %27, %30 : vector<8x192xf32>
    %cst_38 = arith.constant 0.000000e+00 : f32
    %32 = vector.broadcast %cst_38 : f32 to vector<8x192xf32>
    %33 = arith.cmpf oge, %31, %32 : vector<8x192xf32>
    %cst_39 = arith.constant 1.000000e+00 : f32
    %cst_40 = arith.constant -1.000000e+00 : f32
    %34 = vector.broadcast %cst_39 : f32 to vector<8x192xf32>
    %35 = vector.broadcast %cst_40 : f32 to vector<8x192xf32>
    %36 = arith.select %33, %34, %35 : vector<8x192xi1>, vector<8x192xf32>
    %37 = math.absf %31 : vector<8x192xf32>
    %cst_41 = arith.constant 0.327591091 : f32
    %38 = vector.broadcast %cst_41 : f32 to vector<8x192xf32>
    %39 = arith.mulf %38, %37 : vector<8x192xf32>
    %cst_42 = arith.constant 1.000000e+00 : f32
    %40 = vector.broadcast %cst_42 : f32 to vector<8x192xf32>
    %41 = arith.addf %40, %39 : vector<8x192xf32>
    %cst_43 = arith.constant 1.000000e+00 : f32
    %42 = vector.broadcast %cst_43 : f32 to vector<8x192xf32>
    %43 = arith.divf %42, %41 : vector<8x192xf32>
    %cst_44 = arith.constant 1.06140542 : f32
    %44 = vector.broadcast %cst_44 : f32 to vector<8x192xf32>
    %45 = arith.mulf %44, %43 : vector<8x192xf32>
    %cst_45 = arith.constant -1.45315206 : f32
    %46 = vector.broadcast %cst_45 : f32 to vector<8x192xf32>
    %47 = arith.addf %45, %46 : vector<8x192xf32>
    %48 = arith.mulf %47, %43 : vector<8x192xf32>
    %cst_46 = arith.constant 1.42141378 : f32
    %49 = vector.broadcast %cst_46 : f32 to vector<8x192xf32>
    %50 = arith.addf %48, %49 : vector<8x192xf32>
    %51 = arith.mulf %50, %43 : vector<8x192xf32>
    %cst_47 = arith.constant -0.284496725 : f32
    %52 = vector.broadcast %cst_47 : f32 to vector<8x192xf32>
    %53 = arith.addf %51, %52 : vector<8x192xf32>
    %54 = arith.mulf %53, %43 : vector<8x192xf32>
    %cst_48 = arith.constant 0.254829586 : f32
    %55 = vector.broadcast %cst_48 : f32 to vector<8x192xf32>
    %56 = arith.addf %54, %55 : vector<8x192xf32>
    %57 = arith.mulf %56, %43 : vector<8x192xf32>
    %cst_49 = arith.constant 0.000000e+00 : f32
    %58 = vector.broadcast %cst_49 : f32 to vector<8x192xf32>
    %59 = arith.subf %58, %37 : vector<8x192xf32>
    %60 = arith.mulf %59, %37 : vector<8x192xf32>
    %61 = math.exp %60 : vector<8x192xf32>
    %62 = arith.mulf %57, %61 : vector<8x192xf32>
    %cst_50 = arith.constant 1.000000e+00 : f32
    %63 = vector.broadcast %cst_50 : f32 to vector<8x192xf32>
    %64 = arith.subf %63, %62 : vector<8x192xf32>
    %65 = arith.mulf %36, %64 : vector<8x192xf32>
    %cst_51 = arith.constant 1.000000e+00 : f32
    %66 = vector.broadcast %cst_51 : f32 to vector<8x192xf32>
    %67 = arith.addf %66, %65 : vector<8x192xf32>
    %68 = arith.mulf %29, %67 : vector<8x192xf32>
    %69 = vector.extract_strided_slice %68 {offsets = [0, 0], sizes = [8, 32], strides = [1, 1]} : vector<8x192xf32> to vector<8x32xf32>
    %c0_52 = arith.constant 0 : index
    %c0_53 = arith.constant 0 : index
    %c0_54 = arith.constant 0 : index
    %70 = vector.load %arg5[%c0_52, %c0_53, %c0_54] : memref<6x32x32xbf16, #tpu.memory_space<vmem>>, vector<1x32x32xbf16>
    %71 = vector.shape_cast %70 : vector<1x32x32xbf16> to vector<32x32xbf16>
    %72 = arith.truncf %69 : vector<8x32xf32> to vector<8x32xbf16>
    %cst_55 = arith.constant dense<0.000000e+00> : vector<8x32xf32>
    %73 = tpu.matmul %72, %71, %cst_55 {dimension_numbers = #tpu.dot_dimension_numbers<[1], [0], [0], [1], [0, 0, 1, 1], [], []>} : vector<8x32xbf16>, vector<32x32xbf16>, vector<8x32xf32> -> vector<8x32xf32>
    %c0_56 = arith.constant 0 : index
    %c0_57 = arith.constant 0 : index
    %c0_58 = arith.constant 0 : index
    %74 = vector.load %arg6[%c0_56, %c0_57, %c0_58] : memref<6x1x32xf32, #tpu.memory_space<vmem>>, vector<1x1x32xf32>
    %75 = vector.shape_cast %74 : vector<1x1x32xf32> to vector<1x32xf32>
    %76 = vector.broadcast %75 : vector<1x32xf32> to vector<8x32xf32>
    %77 = arith.addf %73, %76 : vector<8x32xf32>
    %78 = vector.extract_strided_slice %77 {offsets = [0, 0], sizes = [1, 32], strides = [1, 1]} : vector<8x32xf32> to vector<1x32xf32>
    %79 = vector.extract_strided_slice %68 {offsets = [0, 32], sizes = [8, 32], strides = [1, 1]} : vector<8x192xf32> to vector<8x32xf32>
    %c1_59 = arith.constant 1 : index
    %c0_60 = arith.constant 0 : index
    %c0_61 = arith.constant 0 : index
    %80 = vector.load %arg5[%c1_59, %c0_60, %c0_61] : memref<6x32x32xbf16, #tpu.memory_space<vmem>>, vector<1x32x32xbf16>
    %81 = vector.shape_cast %80 : vector<1x32x32xbf16> to vector<32x32xbf16>
    %82 = arith.truncf %79 : vector<8x32xf32> to vector<8x32xbf16>
    %cst_62 = arith.constant dense<0.000000e+00> : vector<8x32xf32>
    %83 = tpu.matmul %82, %81, %cst_62 {dimension_numbers = #tpu.dot_dimension_numbers<[1], [0], [0], [1], [0, 0, 1, 1], [], []>} : vector<8x32xbf16>, vector<32x32xbf16>, vector<8x32xf32> -> vector<8x32xf32>
    %c1_63 = arith.constant 1 : index
    %c0_64 = arith.constant 0 : index
    %c0_65 = arith.constant 0 : index
    %84 = vector.load %arg6[%c1_63, %c0_64, %c0_65] : memref<6x1x32xf32, #tpu.memory_space<vmem>>, vector<1x1x32xf32>
    %85 = vector.shape_cast %84 : vector<1x1x32xf32> to vector<1x32xf32>
    %86 = vector.broadcast %85 : vector<1x32xf32> to vector<8x32xf32>
    %87 = arith.addf %83, %86 : vector<8x32xf32>
    %88 = vector.extract_strided_slice %87 {offsets = [0, 0], sizes = [1, 32], strides = [1, 1]} : vector<8x32xf32> to vector<1x32xf32>
    %89 = vector.extract_strided_slice %68 {offsets = [0, 64], sizes = [8, 32], strides = [1, 1]} : vector<8x192xf32> to vector<8x32xf32>
    %c2 = arith.constant 2 : index
    %c0_66 = arith.constant 0 : index
    %c0_67 = arith.constant 0 : index
    %90 = vector.load %arg5[%c2, %c0_66, %c0_67] : memref<6x32x32xbf16, #tpu.memory_space<vmem>>, vector<1x32x32xbf16>
    %91 = vector.shape_cast %90 : vector<1x32x32xbf16> to vector<32x32xbf16>
    %92 = arith.truncf %89 : vector<8x32xf32> to vector<8x32xbf16>
    %cst_68 = arith.constant dense<0.000000e+00> : vector<8x32xf32>
    %93 = tpu.matmul %92, %91, %cst_68 {dimension_numbers = #tpu.dot_dimension_numbers<[1], [0], [0], [1], [0, 0, 1, 1], [], []>} : vector<8x32xbf16>, vector<32x32xbf16>, vector<8x32xf32> -> vector<8x32xf32>
    %c2_69 = arith.constant 2 : index
    %c0_70 = arith.constant 0 : index
    %c0_71 = arith.constant 0 : index
    %94 = vector.load %arg6[%c2_69, %c0_70, %c0_71] : memref<6x1x32xf32, #tpu.memory_space<vmem>>, vector<1x1x32xf32>
    %95 = vector.shape_cast %94 : vector<1x1x32xf32> to vector<1x32xf32>
    %96 = vector.broadcast %95 : vector<1x32xf32> to vector<8x32xf32>
    %97 = arith.addf %93, %96 : vector<8x32xf32>
    %98 = vector.extract_strided_slice %97 {offsets = [0, 0], sizes = [1, 32], strides = [1, 1]} : vector<8x32xf32> to vector<1x32xf32>
    %99 = vector.extract_strided_slice %68 {offsets = [0, 96], sizes = [8, 32], strides = [1, 1]} : vector<8x192xf32> to vector<8x32xf32>
    %c3 = arith.constant 3 : index
    %c0_72 = arith.constant 0 : index
    %c0_73 = arith.constant 0 : index
    %100 = vector.load %arg5[%c3, %c0_72, %c0_73] : memref<6x32x32xbf16, #tpu.memory_space<vmem>>, vector<1x32x32xbf16>
    %101 = vector.shape_cast %100 : vector<1x32x32xbf16> to vector<32x32xbf16>
    %102 = arith.truncf %99 : vector<8x32xf32> to vector<8x32xbf16>
    %cst_74 = arith.constant dense<0.000000e+00> : vector<8x32xf32>
    %103 = tpu.matmul %102, %101, %cst_74 {dimension_numbers = #tpu.dot_dimension_numbers<[1], [0], [0], [1], [0, 0, 1, 1], [], []>} : vector<8x32xbf16>, vector<32x32xbf16>, vector<8x32xf32> -> vector<8x32xf32>
    %c3_75 = arith.constant 3 : index
    %c0_76 = arith.constant 0 : index
    %c0_77 = arith.constant 0 : index
    %104 = vector.load %arg6[%c3_75, %c0_76, %c0_77] : memref<6x1x32xf32, #tpu.memory_space<vmem>>, vector<1x1x32xf32>
    %105 = vector.shape_cast %104 : vector<1x1x32xf32> to vector<1x32xf32>
    %106 = vector.broadcast %105 : vector<1x32xf32> to vector<8x32xf32>
    %107 = arith.addf %103, %106 : vector<8x32xf32>
    %108 = vector.extract_strided_slice %107 {offsets = [0, 0], sizes = [1, 32], strides = [1, 1]} : vector<8x32xf32> to vector<1x32xf32>
    %109 = vector.extract_strided_slice %68 {offsets = [0, 128], sizes = [8, 32], strides = [1, 1]} : vector<8x192xf32> to vector<8x32xf32>
    %c4 = arith.constant 4 : index
    %c0_78 = arith.constant 0 : index
    %c0_79 = arith.constant 0 : index
    %110 = vector.load %arg5[%c4, %c0_78, %c0_79] : memref<6x32x32xbf16, #tpu.memory_space<vmem>>, vector<1x32x32xbf16>
    %111 = vector.shape_cast %110 : vector<1x32x32xbf16> to vector<32x32xbf16>
    %112 = arith.truncf %109 : vector<8x32xf32> to vector<8x32xbf16>
    %cst_80 = arith.constant dense<0.000000e+00> : vector<8x32xf32>
    %113 = tpu.matmul %112, %111, %cst_80 {dimension_numbers = #tpu.dot_dimension_numbers<[1], [0], [0], [1], [0, 0, 1, 1], [], []>} : vector<8x32xbf16>, vector<32x32xbf16>, vector<8x32xf32> -> vector<8x32xf32>
    %c4_81 = arith.constant 4 : index
    %c0_82 = arith.constant 0 : index
    %c0_83 = arith.constant 0 : index
    %114 = vector.load %arg6[%c4_81, %c0_82, %c0_83] : memref<6x1x32xf32, #tpu.memory_space<vmem>>, vector<1x1x32xf32>
    %115 = vector.shape_cast %114 : vector<1x1x32xf32> to vector<1x32xf32>
    %116 = vector.broadcast %115 : vector<1x32xf32> to vector<8x32xf32>
    %117 = arith.addf %113, %116 : vector<8x32xf32>
    %118 = vector.extract_strided_slice %117 {offsets = [0, 0], sizes = [1, 32], strides = [1, 1]} : vector<8x32xf32> to vector<1x32xf32>
    %119 = vector.extract_strided_slice %68 {offsets = [0, 160], sizes = [8, 32], strides = [1, 1]} : vector<8x192xf32> to vector<8x32xf32>
    %c5 = arith.constant 5 : index
    %c0_84 = arith.constant 0 : index
    %c0_85 = arith.constant 0 : index
    %120 = vector.load %arg5[%c5, %c0_84, %c0_85] : memref<6x32x32xbf16, #tpu.memory_space<vmem>>, vector<1x32x32xbf16>
    %121 = vector.shape_cast %120 : vector<1x32x32xbf16> to vector<32x32xbf16>
    %122 = arith.truncf %119 : vector<8x32xf32> to vector<8x32xbf16>
    %cst_86 = arith.constant dense<0.000000e+00> : vector<8x32xf32>
    %123 = tpu.matmul %122, %121, %cst_86 {dimension_numbers = #tpu.dot_dimension_numbers<[1], [0], [0], [1], [0, 0, 1, 1], [], []>} : vector<8x32xbf16>, vector<32x32xbf16>, vector<8x32xf32> -> vector<8x32xf32>
    %c5_87 = arith.constant 5 : index
    %c0_88 = arith.constant 0 : index
    %c0_89 = arith.constant 0 : index
    %124 = vector.load %arg6[%c5_87, %c0_88, %c0_89] : memref<6x1x32xf32, #tpu.memory_space<vmem>>, vector<1x1x32xf32>
    %125 = vector.shape_cast %124 : vector<1x1x32xf32> to vector<1x32xf32>
    %126 = vector.broadcast %125 : vector<1x32xf32> to vector<8x32xf32>
    %127 = arith.addf %123, %126 : vector<8x32xf32>
    %128 = vector.extract_strided_slice %127 {offsets = [0, 0], sizes = [1, 32], strides = [1, 1]} : vector<8x32xf32> to vector<1x32xf32>
    %cst_90 = arith.constant dense<0.000000e+00> : vector<8xf32>
    %129 = vector.multi_reduction <add>, %19, %cst_90 [1] : vector<8x32xf32> to vector<8xf32>
    %130 = vector.shape_cast %129 : vector<8xf32> to vector<8x1xf32>
    %cst_91 = arith.constant 3.200000e+01 : f32
    %131 = vector.broadcast %cst_91 : f32 to vector<8x1xf32>
    %132 = arith.divf %130, %131 : vector<8x1xf32>
    %133 = vector.broadcast %132 : vector<8x1xf32> to vector<8x32xf32>
    %134 = arith.subf %19, %133 : vector<8x32xf32>
    %135 = arith.mulf %134, %134 : vector<8x32xf32>
    %cst_92 = arith.constant dense<0.000000e+00> : vector<8xf32>
    %136 = vector.multi_reduction <add>, %135, %cst_92 [1] : vector<8x32xf32> to vector<8xf32>
    %137 = vector.shape_cast %136 : vector<8xf32> to vector<8x1xf32>
    %cst_93 = arith.constant 3.200000e+01 : f32
    %138 = vector.broadcast %cst_93 : f32 to vector<8x1xf32>
    %139 = arith.divf %137, %138 : vector<8x1xf32>
    %140 = vector.broadcast %132 : vector<8x1xf32> to vector<8x32xf32>
    %141 = arith.subf %19, %140 : vector<8x32xf32>
    %cst_94 = arith.constant 9.99999974E-6 : f32
    %142 = vector.broadcast %cst_94 : f32 to vector<8x1xf32>
    %143 = arith.addf %139, %142 : vector<8x1xf32>
    %144 = math.rsqrt %143 : vector<8x1xf32>
    %145 = vector.broadcast %144 : vector<8x1xf32> to vector<8x32xf32>
    %146 = arith.mulf %141, %145 : vector<8x32xf32>
    %147 = vector.broadcast %11 : vector<1x32xf32> to vector<8x32xf32>
    %148 = arith.mulf %146, %147 : vector<8x32xf32>
    %149 = vector.broadcast %13 : vector<1x32xf32> to vector<8x32xf32>
    %150 = arith.addf %148, %149 : vector<8x32xf32>
    %151 = vector.broadcast %78 : vector<1x32xf32> to vector<8x32xf32>
    %152 = arith.mulf %150, %151 : vector<8x32xf32>
    %153 = vector.broadcast %98 : vector<1x32xf32> to vector<8x32xf32>
    %154 = arith.addf %152, %153 : vector<8x32xf32>
    %155 = arith.truncf %154 : vector<8x32xf32> to vector<8x32xbf16>
    %cst_95 = arith.constant dense<0.000000e+00> : vector<8x96xf32>
    %156 = tpu.matmul %155, %2, %cst_95 {dimension_numbers = #tpu.dot_dimension_numbers<[1], [0], [0], [1], [0, 0, 1, 1], [], []>} : vector<8x32xbf16>, vector<32x96xbf16>, vector<8x96xf32> -> vector<8x96xf32>
    %157 = vector.broadcast %3 : vector<1x96xf32> to vector<8x96xf32>
    %158 = arith.addf %156, %157 : vector<8x96xf32>
    %159 = vector.extract_strided_slice %158 {offsets = [0, 0], sizes = [8, 8], strides = [1, 1]} : vector<8x96xf32> to vector<8x8xf32>
    %160 = vector.extract_strided_slice %158 {offsets = [0, 32], sizes = [8, 8], strides = [1, 1]} : vector<8x96xf32> to vector<8x8xf32>
    %161 = vector.extract_strided_slice %158 {offsets = [0, 64], sizes = [8, 8], strides = [1, 1]} : vector<8x96xf32> to vector<8x8xf32>
    %cst_96 = arith.constant dense<0.000000e+00> : vector<8x8xf32>
    %162 = tpu.matmul %159, %160, %cst_96 {dimension_numbers = #tpu.dot_dimension_numbers<[1], [1], [0], [0], [0, 0, 1, 0], [], []>, precision = #tpu.contract_precision<fp32>} : vector<8x8xf32>, vector<8x8xf32>, vector<8x8xf32> -> vector<8x8xf32>
    %cst_97 = arith.constant dense<0xFF800000> : vector<8xf32>
    %163 = vector.multi_reduction <maximumf>, %162, %cst_97 [1] : vector<8x8xf32> to vector<8xf32>
    %164 = vector.shape_cast %163 : vector<8xf32> to vector<8x1xf32>
    %165 = vector.broadcast %164 : vector<8x1xf32> to vector<8x8xf32>
    %166 = arith.subf %162, %165 : vector<8x8xf32>
    %167 = math.exp %166 : vector<8x8xf32>
    %cst_98 = arith.constant dense<0.000000e+00> : vector<8xf32>
    %168 = vector.multi_reduction <add>, %167, %cst_98 [1] : vector<8x8xf32> to vector<8xf32>
    %169 = vector.shape_cast %168 : vector<8xf32> to vector<8x1xf32>
    %170 = tpu.reciprocal %169 {approx = true} : vector<8x1xf32> -> vector<8x1xf32>
    %171 = vector.broadcast %170 : vector<8x1xf32> to vector<8x8xf32>
    %172 = arith.mulf %167, %171 : vector<8x8xf32>
    %173 = arith.truncf %172 : vector<8x8xf32> to vector<8x8xbf16>
    %174 = arith.truncf %161 : vector<8x8xf32> to vector<8x8xbf16>
    %cst_99 = arith.constant dense<0.000000e+00> : vector<8x8xf32>
    %175 = tpu.matmul %173, %174, %cst_99 {dimension_numbers = #tpu.dot_dimension_numbers<[1], [0], [0], [1], [0, 0, 1, 1], [], []>} : vector<8x8xbf16>, vector<8x8xbf16>, vector<8x8xf32> -> vector<8x8xf32>
    %176 = vector.extract_strided_slice %158 {offsets = [0, 8], sizes = [8, 8], strides = [1, 1]} : vector<8x96xf32> to vector<8x8xf32>
    %177 = vector.extract_strided_slice %158 {offsets = [0, 40], sizes = [8, 8], strides = [1, 1]} : vector<8x96xf32> to vector<8x8xf32>
    %178 = vector.extract_strided_slice %158 {offsets = [0, 72], sizes = [8, 8], strides = [1, 1]} : vector<8x96xf32> to vector<8x8xf32>
    %cst_100 = arith.constant dense<0.000000e+00> : vector<8x8xf32>
    %179 = tpu.matmul %176, %177, %cst_100 {dimension_numbers = #tpu.dot_dimension_numbers<[1], [1], [0], [0], [0, 0, 1, 0], [], []>, precision = #tpu.contract_precision<fp32>} : vector<8x8xf32>, vector<8x8xf32>, vector<8x8xf32> -> vector<8x8xf32>
    %cst_101 = arith.constant dense<0xFF800000> : vector<8xf32>
    %180 = vector.multi_reduction <maximumf>, %179, %cst_101 [1] : vector<8x8xf32> to vector<8xf32>
    %181 = vector.shape_cast %180 : vector<8xf32> to vector<8x1xf32>
    %182 = vector.broadcast %181 : vector<8x1xf32> to vector<8x8xf32>
    %183 = arith.subf %179, %182 : vector<8x8xf32>
    %184 = math.exp %183 : vector<8x8xf32>
    %cst_102 = arith.constant dense<0.000000e+00> : vector<8xf32>
    %185 = vector.multi_reduction <add>, %184, %cst_102 [1] : vector<8x8xf32> to vector<8xf32>
    %186 = vector.shape_cast %185 : vector<8xf32> to vector<8x1xf32>
    %187 = tpu.reciprocal %186 {approx = true} : vector<8x1xf32> -> vector<8x1xf32>
    %188 = vector.broadcast %187 : vector<8x1xf32> to vector<8x8xf32>
    %189 = arith.mulf %184, %188 : vector<8x8xf32>
    %190 = arith.truncf %189 : vector<8x8xf32> to vector<8x8xbf16>
    %191 = arith.truncf %178 : vector<8x8xf32> to vector<8x8xbf16>
    %cst_103 = arith.constant dense<0.000000e+00> : vector<8x8xf32>
    %192 = tpu.matmul %190, %191, %cst_103 {dimension_numbers = #tpu.dot_dimension_numbers<[1], [0], [0], [1], [0, 0, 1, 1], [], []>} : vector<8x8xbf16>, vector<8x8xbf16>, vector<8x8xf32> -> vector<8x8xf32>
    %193 = vector.extract_strided_slice %158 {offsets = [0, 16], sizes = [8, 8], strides = [1, 1]} : vector<8x96xf32> to vector<8x8xf32>
    %194 = vector.extract_strided_slice %158 {offsets = [0, 48], sizes = [8, 8], strides = [1, 1]} : vector<8x96xf32> to vector<8x8xf32>
    %195 = vector.extract_strided_slice %158 {offsets = [0, 80], sizes = [8, 8], strides = [1, 1]} : vector<8x96xf32> to vector<8x8xf32>
    %cst_104 = arith.constant dense<0.000000e+00> : vector<8x8xf32>
    %196 = tpu.matmul %193, %194, %cst_104 {dimension_numbers = #tpu.dot_dimension_numbers<[1], [1], [0], [0], [0, 0, 1, 0], [], []>, precision = #tpu.contract_precision<fp32>} : vector<8x8xf32>, vector<8x8xf32>, vector<8x8xf32> -> vector<8x8xf32>
    %cst_105 = arith.constant dense<0xFF800000> : vector<8xf32>
    %197 = vector.multi_reduction <maximumf>, %196, %cst_105 [1] : vector<8x8xf32> to vector<8xf32>
    %198 = vector.shape_cast %197 : vector<8xf32> to vector<8x1xf32>
    %199 = vector.broadcast %198 : vector<8x1xf32> to vector<8x8xf32>
    %200 = arith.subf %196, %199 : vector<8x8xf32>
    %201 = math.exp %200 : vector<8x8xf32>
    %cst_106 = arith.constant dense<0.000000e+00> : vector<8xf32>
    %202 = vector.multi_reduction <add>, %201, %cst_106 [1] : vector<8x8xf32> to vector<8xf32>
    %203 = vector.shape_cast %202 : vector<8xf32> to vector<8x1xf32>
    %204 = tpu.reciprocal %203 {approx = true} : vector<8x1xf32> -> vector<8x1xf32>
    %205 = vector.broadcast %204 : vector<8x1xf32> to vector<8x8xf32>
    %206 = arith.mulf %201, %205 : vector<8x8xf32>
    %207 = arith.truncf %206 : vector<8x8xf32> to vector<8x8xbf16>
    %208 = arith.truncf %195 : vector<8x8xf32> to vector<8x8xbf16>
    %cst_107 = arith.constant dense<0.000000e+00> : vector<8x8xf32>
    %209 = tpu.matmul %207, %208, %cst_107 {dimension_numbers = #tpu.dot_dimension_numbers<[1], [0], [0], [1], [0, 0, 1, 1], [], []>} : vector<8x8xbf16>, vector<8x8xbf16>, vector<8x8xf32> -> vector<8x8xf32>
    %210 = vector.extract_strided_slice %158 {offsets = [0, 24], sizes = [8, 8], strides = [1, 1]} : vector<8x96xf32> to vector<8x8xf32>
    %211 = vector.extract_strided_slice %158 {offsets = [0, 56], sizes = [8, 8], strides = [1, 1]} : vector<8x96xf32> to vector<8x8xf32>
    %212 = vector.extract_strided_slice %158 {offsets = [0, 88], sizes = [8, 8], strides = [1, 1]} : vector<8x96xf32> to vector<8x8xf32>
    %cst_108 = arith.constant dense<0.000000e+00> : vector<8x8xf32>
    %213 = tpu.matmul %210, %211, %cst_108 {dimension_numbers = #tpu.dot_dimension_numbers<[1], [1], [0], [0], [0, 0, 1, 0], [], []>, precision = #tpu.contract_precision<fp32>} : vector<8x8xf32>, vector<8x8xf32>, vector<8x8xf32> -> vector<8x8xf32>
    %cst_109 = arith.constant dense<0xFF800000> : vector<8xf32>
    %214 = vector.multi_reduction <maximumf>, %213, %cst_109 [1] : vector<8x8xf32> to vector<8xf32>
    %215 = vector.shape_cast %214 : vector<8xf32> to vector<8x1xf32>
    %216 = vector.broadcast %215 : vector<8x1xf32> to vector<8x8xf32>
    %217 = arith.subf %213, %216 : vector<8x8xf32>
    %218 = math.exp %217 : vector<8x8xf32>
    %cst_110 = arith.constant dense<0.000000e+00> : vector<8xf32>
    %219 = vector.multi_reduction <add>, %218, %cst_110 [1] : vector<8x8xf32> to vector<8xf32>
    %220 = vector.shape_cast %219 : vector<8xf32> to vector<8x1xf32>
    %221 = tpu.reciprocal %220 {approx = true} : vector<8x1xf32> -> vector<8x1xf32>
    %222 = vector.broadcast %221 : vector<8x1xf32> to vector<8x8xf32>
    %223 = arith.mulf %218, %222 : vector<8x8xf32>
    %224 = arith.truncf %223 : vector<8x8xf32> to vector<8x8xbf16>
    %225 = arith.truncf %212 : vector<8x8xf32> to vector<8x8xbf16>
    %cst_111 = arith.constant dense<0.000000e+00> : vector<8x8xf32>
    %226 = tpu.matmul %224, %225, %cst_111 {dimension_numbers = #tpu.dot_dimension_numbers<[1], [0], [0], [1], [0, 0, 1, 1], [], []>} : vector<8x8xbf16>, vector<8x8xbf16>, vector<8x8xf32> -> vector<8x8xf32>
    %227 = tpu.concatenate %175, %192, %209, %226 in 1 : vector<8x8xf32>, vector<8x8xf32>, vector<8x8xf32>, vector<8x8xf32> -> vector<8x32xf32>
    %228 = arith.truncf %227 : vector<8x32xf32> to vector<8x32xbf16>
    %cst_112 = arith.constant dense<0.000000e+00> : vector<8x32xf32>
    %229 = tpu.matmul %228, %4, %cst_112 {dimension_numbers = #tpu.dot_dimension_numbers<[1], [0], [0], [1], [0, 0, 1, 1], [], []>} : vector<8x32xbf16>, vector<32x32xbf16>, vector<8x32xf32> -> vector<8x32xf32>
    %230 = vector.broadcast %5 : vector<1x32xf32> to vector<8x32xf32>
    %231 = arith.addf %229, %230 : vector<8x32xf32>
    %232 = vector.broadcast %88 : vector<1x32xf32> to vector<8x32xf32>
    %233 = arith.mulf %231, %232 : vector<8x32xf32>
    %234 = arith.addf %19, %233 : vector<8x32xf32>
    %cst_113 = arith.constant dense<0.000000e+00> : vector<8xf32>
    %235 = vector.multi_reduction <add>, %234, %cst_113 [1] : vector<8x32xf32> to vector<8xf32>
    %236 = vector.shape_cast %235 : vector<8xf32> to vector<8x1xf32>
    %cst_114 = arith.constant 3.200000e+01 : f32
    %237 = vector.broadcast %cst_114 : f32 to vector<8x1xf32>
    %238 = arith.divf %236, %237 : vector<8x1xf32>
    %239 = vector.broadcast %238 : vector<8x1xf32> to vector<8x32xf32>
    %240 = arith.subf %234, %239 : vector<8x32xf32>
    %241 = arith.mulf %240, %240 : vector<8x32xf32>
    %cst_115 = arith.constant dense<0.000000e+00> : vector<8xf32>
    %242 = vector.multi_reduction <add>, %241, %cst_115 [1] : vector<8x32xf32> to vector<8xf32>
    %243 = vector.shape_cast %242 : vector<8xf32> to vector<8x1xf32>
    %cst_116 = arith.constant 3.200000e+01 : f32
    %244 = vector.broadcast %cst_116 : f32 to vector<8x1xf32>
    %245 = arith.divf %243, %244 : vector<8x1xf32>
    %246 = vector.broadcast %238 : vector<8x1xf32> to vector<8x32xf32>
    %247 = arith.subf %234, %246 : vector<8x32xf32>
    %cst_117 = arith.constant 9.99999974E-6 : f32
    %248 = vector.broadcast %cst_117 : f32 to vector<8x1xf32>
    %249 = arith.addf %245, %248 : vector<8x1xf32>
    %250 = math.rsqrt %249 : vector<8x1xf32>
    %251 = vector.broadcast %250 : vector<8x1xf32> to vector<8x32xf32>
    %252 = arith.mulf %247, %251 : vector<8x32xf32>
    %253 = vector.broadcast %15 : vector<1x32xf32> to vector<8x32xf32>
    %254 = arith.mulf %252, %253 : vector<8x32xf32>
    %255 = vector.broadcast %17 : vector<1x32xf32> to vector<8x32xf32>
    %256 = arith.addf %254, %255 : vector<8x32xf32>
    %257 = vector.broadcast %108 : vector<1x32xf32> to vector<8x32xf32>
    %258 = arith.mulf %256, %257 : vector<8x32xf32>
    %259 = vector.broadcast %128 : vector<1x32xf32> to vector<8x32xf32>
    %260 = arith.addf %258, %259 : vector<8x32xf32>
    %261 = arith.truncf %260 : vector<8x32xf32> to vector<8x32xbf16>
    %cst_118 = arith.constant dense<0.000000e+00> : vector<8x64xf32>
    %262 = tpu.matmul %261, %6, %cst_118 {dimension_numbers = #tpu.dot_dimension_numbers<[1], [0], [0], [1], [0, 0, 1, 1], [], []>} : vector<8x32xbf16>, vector<32x64xbf16>, vector<8x64xf32> -> vector<8x64xf32>
    %263 = vector.broadcast %7 : vector<1x64xf32> to vector<8x64xf32>
    %264 = arith.addf %262, %263 : vector<8x64xf32>
    %cst_119 = arith.constant 5.000000e-01 : f32
    %265 = vector.broadcast %cst_119 : f32 to vector<8x64xf32>
    %266 = arith.mulf %265, %264 : vector<8x64xf32>
    %cst_120 = arith.constant 0.707106769 : f32
    %267 = vector.broadcast %cst_120 : f32 to vector<8x64xf32>
    %268 = arith.mulf %264, %267 : vector<8x64xf32>
    %cst_121 = arith.constant 0.000000e+00 : f32
    %269 = vector.broadcast %cst_121 : f32 to vector<8x64xf32>
    %270 = arith.cmpf oge, %268, %269 : vector<8x64xf32>
    %cst_122 = arith.constant 1.000000e+00 : f32
    %cst_123 = arith.constant -1.000000e+00 : f32
    %271 = vector.broadcast %cst_122 : f32 to vector<8x64xf32>
    %272 = vector.broadcast %cst_123 : f32 to vector<8x64xf32>
    %273 = arith.select %270, %271, %272 : vector<8x64xi1>, vector<8x64xf32>
    %274 = math.absf %268 : vector<8x64xf32>
    %cst_124 = arith.constant 0.327591091 : f32
    %275 = vector.broadcast %cst_124 : f32 to vector<8x64xf32>
    %276 = arith.mulf %275, %274 : vector<8x64xf32>
    %cst_125 = arith.constant 1.000000e+00 : f32
    %277 = vector.broadcast %cst_125 : f32 to vector<8x64xf32>
    %278 = arith.addf %277, %276 : vector<8x64xf32>
    %cst_126 = arith.constant 1.000000e+00 : f32
    %279 = vector.broadcast %cst_126 : f32 to vector<8x64xf32>
    %280 = arith.divf %279, %278 : vector<8x64xf32>
    %cst_127 = arith.constant 1.06140542 : f32
    %281 = vector.broadcast %cst_127 : f32 to vector<8x64xf32>
    %282 = arith.mulf %281, %280 : vector<8x64xf32>
    %cst_128 = arith.constant -1.45315206 : f32
    %283 = vector.broadcast %cst_128 : f32 to vector<8x64xf32>
    %284 = arith.addf %282, %283 : vector<8x64xf32>
    %285 = arith.mulf %284, %280 : vector<8x64xf32>
    %cst_129 = arith.constant 1.42141378 : f32
    %286 = vector.broadcast %cst_129 : f32 to vector<8x64xf32>
    %287 = arith.addf %285, %286 : vector<8x64xf32>
    %288 = arith.mulf %287, %280 : vector<8x64xf32>
    %cst_130 = arith.constant -0.284496725 : f32
    %289 = vector.broadcast %cst_130 : f32 to vector<8x64xf32>
    %290 = arith.addf %288, %289 : vector<8x64xf32>
    %291 = arith.mulf %290, %280 : vector<8x64xf32>
    %cst_131 = arith.constant 0.254829586 : f32
    %292 = vector.broadcast %cst_131 : f32 to vector<8x64xf32>
    %293 = arith.addf %291, %292 : vector<8x64xf32>
    %294 = arith.mulf %293, %280 : vector<8x64xf32>
    %cst_132 = arith.constant 0.000000e+00 : f32
    %295 = vector.broadcast %cst_132 : f32 to vector<8x64xf32>
    %296 = arith.subf %295, %274 : vector<8x64xf32>
    %297 = arith.mulf %296, %274 : vector<8x64xf32>
    %298 = math.exp %297 : vector<8x64xf32>
    %299 = arith.mulf %294, %298 : vector<8x64xf32>
    %cst_133 = arith.constant 1.000000e+00 : f32
    %300 = vector.broadcast %cst_133 : f32 to vector<8x64xf32>
    %301 = arith.subf %300, %299 : vector<8x64xf32>
    %302 = arith.mulf %273, %301 : vector<8x64xf32>
    %cst_134 = arith.constant 1.000000e+00 : f32
    %303 = vector.broadcast %cst_134 : f32 to vector<8x64xf32>
    %304 = arith.addf %303, %302 : vector<8x64xf32>
    %305 = arith.mulf %266, %304 : vector<8x64xf32>
    %306 = arith.truncf %305 : vector<8x64xf32> to vector<8x64xbf16>
    %cst_135 = arith.constant dense<0.000000e+00> : vector<8x32xf32>
    %307 = tpu.matmul %306, %8, %cst_135 {dimension_numbers = #tpu.dot_dimension_numbers<[1], [0], [0], [1], [0, 0, 1, 1], [], []>} : vector<8x64xbf16>, vector<64x32xbf16>, vector<8x32xf32> -> vector<8x32xf32>
    %308 = vector.broadcast %9 : vector<1x32xf32> to vector<8x32xf32>
    %309 = arith.addf %307, %308 : vector<8x32xf32>
    %310 = vector.broadcast %118 : vector<1x32xf32> to vector<8x32xf32>
    %311 = arith.mulf %309, %310 : vector<8x32xf32>
    %312 = arith.addf %234, %311 : vector<8x32xf32>
    %c0_136 = arith.constant 0 : index
    %c0_137 = arith.constant 0 : index
    %c0_138 = arith.constant 0 : index
    %313 = vector.load %arg17[%c0_136, %c0_137, %c0_138] : memref<1x8x32xf32, #tpu.memory_space<vmem>>, vector<1x8x32xf32>
    %314 = vector.shape_cast %313 : vector<1x8x32xf32> to vector<8x32xf32>
    %315 = vector.shape_cast %312 : vector<8x32xf32> to vector<1x8x32xf32>
    tpu.vector_store %arg17[%c0_136, %c0_137, %c0_138], %315 {strides = array<i32>} : memref<1x8x32xf32, #tpu.memory_space<vmem>>, vector<1x8x32xf32>,
    return
  }
  func.func @transform_0(%arg0: i32) -> (i32, i32, i32) {
    %c0_i32 = arith.constant 0 : i32
    %c0_i32_0 = arith.constant 0 : i32
    %c0_i32_1 = arith.constant 0 : i32
    return %arg0, %c0_i32, %c0_i32_0 : i32, i32, i32
  }
  func.func @transform_1(%arg0: i32) -> (i32, i32, i32) {
    %c0_i32 = arith.constant 0 : i32
    %c0_i32_0 = arith.constant 0 : i32
    %c0_i32_1 = arith.constant 0 : i32
    return %arg0, %c0_i32, %c0_i32_0 : i32, i32, i32
  }
  func.func @transform_2(%arg0: i32) -> (i32, i32) {
    %c0_i32 = arith.constant 0 : i32
    %c0_i32_0 = arith.constant 0 : i32
    %c0_i32_1 = arith.constant 0 : i32
    return %c0_i32, %c0_i32_0 : i32, i32
  }
  func.func @transform_3(%arg0: i32) -> (i32, i32) {
    %c0_i32 = arith.constant 0 : i32
    %c0_i32_0 = arith.constant 0 : i32
    %c0_i32_1 = arith.constant 0 : i32
    return %c0_i32, %c0_i32_0 : i32, i32
  }
  func.func @transform_4(%arg0: i32) -> (i32, i32, i32) {
    %c0_i32 = arith.constant 0 : i32
    %c0_i32_0 = arith.constant 0 : i32
    %c0_i32_1 = arith.constant 0 : i32
    %c0_i32_2 = arith.constant 0 : i32
    return %c0_i32, %c0_i32_0, %c0_i32_1 : i32, i32, i32
  }
  func.func @transform_5(%arg0: i32) -> (i32, i32, i32) {
    %c0_i32 = arith.constant 0 : i32
    %c0_i32_0 = arith.constant 0 : i32
    %c0_i32_1 = arith.constant 0 : i32
    %c0_i32_2 = arith.constant 0 : i32
    return %c0_i32, %c0_i32_0, %c0_i32_1 : i32, i32, i32
  }
  func.func @transform_6(%arg0: i32) -> (i32, i32, i32) {
    %c0_i32 = arith.constant 0 : i32
    %c0_i32_0 = arith.constant 0 : i32
    %c0_i32_1 = arith.constant 0 : i32
    %c0_i32_2 = arith.constant 0 : i32
    return %c0_i32, %c0_i32_0, %c0_i32_1 : i32, i32, i32
  }
  func.func @transform_7(%arg0: i32) -> (i32, i32, i32) {
    %c0_i32 = arith.constant 0 : i32
    %c0_i32_0 = arith.constant 0 : i32
    %c0_i32_1 = arith.constant 0 : i32
    %c0_i32_2 = arith.constant 0 : i32
    return %c0_i32, %c0_i32_0, %c0_i32_1 : i32, i32, i32
  }
  func.func @transform_8(%arg0: i32) -> (i32, i32) {
    %c0_i32 = arith.constant 0 : i32
    %c0_i32_0 = arith.constant 0 : i32
    %c0_i32_1 = arith.constant 0 : i32
    return %c0_i32, %c0_i32_0 : i32, i32
  }
  func.func @transform_9(%arg0: i32) -> (i32, i32) {
    %c0_i32 = arith.constant 0 : i32
    %c0_i32_0 = arith.constant 0 : i32
    %c0_i32_1 = arith.constant 0 : i32
    return %c0_i32, %c0_i32_0 : i32, i32
  }
  func.func @transform_10(%arg0: i32) -> (i32, i32) {
    %c0_i32 = arith.constant 0 : i32
    %c0_i32_0 = arith.constant 0 : i32
    %c0_i32_1 = arith.constant 0 : i32
    return %c0_i32, %c0_i32_0 : i32, i32
  }
  func.func @transform_11(%arg0: i32) -> (i32, i32) {
    %c0_i32 = arith.constant 0 : i32
    %c0_i32_0 = arith.constant 0 : i32
    %c0_i32_1 = arith.constant 0 : i32
    return %c0_i32, %c0_i32_0 : i32, i32
  }
  func.func @transform_12(%arg0: i32) -> (i32, i32) {
    %c0_i32 = arith.constant 0 : i32
    %c0_i32_0 = arith.constant 0 : i32
    %c0_i32_1 = arith.constant 0 : i32
    return %c0_i32, %c0_i32_0 : i32, i32
  }
  func.func @transform_13(%arg0: i32) -> (i32, i32) {
    %c0_i32 = arith.constant 0 : i32
    %c0_i32_0 = arith.constant 0 : i32
    %c0_i32_1 = arith.constant 0 : i32
    return %c0_i32, %c0_i32_0 : i32, i32
  }
  func.func @transform_14(%arg0: i32) -> (i32, i32) {
    %c0_i32 = arith.constant 0 : i32
    %c0_i32_0 = arith.constant 0 : i32
    %c0_i32_1 = arith.constant 0 : i32
    return %c0_i32, %c0_i32_0 : i32, i32
  }
  func.func @transform_15(%arg0: i32) -> (i32, i32) {
    %c0_i32 = arith.constant 0 : i32
    %c0_i32_0 = arith.constant 0 : i32
    %c0_i32_1 = arith.constant 0 : i32
    return %c0_i32, %c0_i32_0 : i32, i32
  }
  func.func @transform_16(%arg0: i32) -> (i32, i32, i32) {
    %c0_i32 = arith.constant 0 : i32
    %c0_i32_0 = arith.constant 0 : i32
    %c0_i32_1 = arith.constant 0 : i32
    return %arg0, %c0_i32, %c0_i32_0 : i32, i32, i32
  }
}

</mosaic_0001>

<bundles_post_ra>
// kernel: tpu_custom_call.1
= control target key start
LH: loop header
LB: loop body
LE: loop exit
PB: predicated region body
PF: predicated region fallthrough
CT: control target
= control target key end

     0   :  { %s5500_s0 = inlined_call_operand.vmem [shape: f32[2,8,32], index: 0, kind: input, shape index: {}]   ;;  %s5501_s1 = inlined_call_operand.vmem [shape: f32[2,1,32], index: 1, kind: input, shape index: {}]   ;;  %s5502_s2 = inlined_call_operand.vmem [shape: bf16[32,192], index: 2, kind: input, shape index: {}]   ;;  %s5503_s3 = inlined_call_operand.hbm [shape: f32[1,192], index: 3, kind: input, shape index: {}]   ;;  %s5504_s4 = inlined_call_operand.hbm [shape: bf16[6,32,32], index: 4, kind: input, shape index: {}]   ;;  %s5505_s5 = inlined_call_operand.hbm [shape: f32[6,1,32], index: 5, kind: input, shape index: {}]   ;;  %s5506_s6 = inlined_call_operand.hbm [shape: f32[2,1,32], index: 6, kind: input, shape index: {}]   ;;  %s5507_s7 = inlined_call_operand.hbm [shape: f32[2,1,32], index: 7, kind: input, shape index: {}]   ;;  %s5508_s8 = inlined_call_operand.hbm [shape: bf16[32,96], index: 8, kind: input, shape index: {}]   ;;  %s5509_s9 = inlined_call_operand.hbm [shape: f32[1,96], index: 9, kind: input, shape index: {}]   ;;  %s5510_s10 = inlined_call_operand.vmem [shape: bf16[32,32], index: 10, kind: input, shape index: {}]   ;;  %s5511_s11 = inlined_call_operand.vmem [shape: f32[1,32], index: 11, kind: input, shape index: {}]   ;;  %s5512_s12 = inlined_call_operand.hbm [shape: bf16[32,64], index: 12, kind: input, shape index: {}]   ;;  %s5513_s13 = inlined_call_operand.vmem [shape: f32[1,64], index: 13, kind: input, shape index: {}]   ;;  %s5514_s14 = inlined_call_operand.vmem [shape: bf16[64,32], index: 14, kind: input, shape index: {}]   ;;  %s5515_s15 = inlined_call_operand.vmem [shape: f32[1,32], index: 15, kind: input, shape index: {}]   ;;  %s5516_s16 = inlined_call_operand.hbm [shape: f32[2,8,32], index: 16, kind: output, shape index: {}]  }
   0x1   :  { %5537 = sst [smem:[#allocation31_spill]] %s5500_s0 }
   0x2   :  { %5538 = sst [smem:[#allocation32_spill]] %s5513_s13 }
   0x3   :  { %5539 = sst [smem:[#allocation33_spill]] %s5514_s14 }
   0x4   :  { %5540 = sst [smem:[#allocation34_spill]] %s5515_s15 }
   0x5   :  { %5541 = sst [smem:[#allocation35_spill]] %s5516_s16 }
   0x6   :  { %21 = vsyncpa [#allocation3], 0 }
   0x7   :  { %22 = vsyncpa [#allocation6], 0 }
   0x8   :  { %23 = vsyncpa [#allocation9], 0 }
   0x9   :  { %24 = vsyncpa [#allocation12], 0 }
   0xa   :  { %25 = vsyncpa [#allocation15], 0 }
   0xb   :  { %26 = vsyncpa [#allocation4], 0 }
   0xc   :  { %28 = vsyncpa [#allocation4 + $0x1], 0  ;;  %s4916_s21 = smov 0   ;;  %s4918_s22 = smov 0  }
   0xd   :  { %s4920_s23 = smov 0   ;;  %s4922_s24 = smov 0  }
   0xe LB: > { %5542 = sst [smem:[#allocation23_spill]] %s4785_s21  ;;  %s4937_s25 = sadd.s32 4294967295, %s4797_s24   ;;  %s4797_s24 = sphi %s4922_s24, %s5583_s24   ;;  %s4793_s23 = sphi %s4920_s23, %s5586_s23   ;;  %s4789_s22 = sphi %s4918_s22, %s5585_s22   ;;  %s4785_s21 = sphi %s4916_s21, %s5584_s21  }
   0xf   : > { %5543 = sst [smem:[#allocation24_spill]] %s4789_s22  ;;  %s3850_s26 = sadd.s32 4294967294, %s4797_s24  }
  0x10   : > { %5544 = sst [smem:[#allocation25_spill]] %s4793_s23  ;;  %s4941_s27 = sadd.s32 1, %s4797_s24  }
  0x11   : > { %5545 = sst [smem:[#allocation26_spill]] %s4797_s24  ;;  %s387_s28 = sadd.s32 1, %s4793_s23 }
  0x12   : > { %5546 = sst [smem:[#allocation27_spill]] %s4941_s27  ;;  %s384_s29 = ssub.s32 %s4797_s24, %s4941_s27 }
  0x13   : > { %p397_p0 = scmp.ne.s32.totalorder %s4793_s23, %s4789_s22  ;;  %p385_p1 = scmp.eq.s32.totalorder %s384_s29, 0 }
  0x14   : > { %p398_p2 = scmp.eq.s32.totalorder %s4937_s25, 1  ;;  %p403_p3 = scmp.ne.s32.totalorder %s4789_s22, %s4785_s21 }
  0x15   : > { %p404_p4 = scmp.eq.s32.totalorder %s3850_s26, 1  ;;  %p3851_p7 = scmp.ge.s32.totalorder %s4797_s24, 1 }
  0x16   : > { %s4952_s30 = scalar_select %p385_p1, %s4793_s23, %s387_s28  }
  0x17   : > { %p4954_p5 = por %p398_p2, %p397_p0  ;;  %p4958_p6 = por %p404_p4, %p403_p3 }
  0x18   : > { %5547 = sst [smem:[#allocation28_spill]] %s4952_s30  ;;  %p411_p8 = scmp.lt.s32.totalorder %s4797_s24, 3 }
  0x19   : > { %s5548_s0 = scalar_select %p4954_p5, 1, 0 }
  0x1a   : > { %s5550_s17 = scalar_select %p4958_p6, 1, 0 }
  0x1b   : > { %5549 = sst [smem:[#allocation29_spill]] %s5548_s0  ;;  %p5524_p9 = scmp.eq.s32.totalorder %s4937_s25, 0 }
  0x1c   : > { %5551 = sst [smem:[#allocation30_spill]] %s5550_s17  ;;  %p4965_p10 = pnand %p3851_p7, %p411_p8 }
  0x1d   : > { %s4799_s19 = smov [#allocation5]   ;;  %s4800_s28 = smov [#allocation8]  }
  0x1e   : > { %s5552_s18 = scalar_select %p4965_p10, 1, 0 }
  0x1f   : > { %s437_s20 = sshll.u32 %s4799_s19, 4  ;;  %p4322_p11 = pneg %p4965_p10  ;;  %s438_s20 = int_to_ptr.vmem [resolvable:$true] %s437_s20 }
  0x20   : > { %s463_s29 = sshll.u32 %s4800_s28, 4  ;;  %s4491_s27 = scalar_lea.hbm %s5504_s4, 1536  ;;  %s464_s29 = int_to_ptr.vmem [resolvable:$true] %s463_s29 }
  0x21   : > { %p4973_p12 = pnand %p5524_p9, %p4322_p11  ;;  %p4492_p13 = scmp.ne.s32.totalorder %s5504_s4, %s4491_s27 }
  0x22   : > { %p4498_p3 = scmp.lt.u32.totalorder %s4491_s27, %s5504_s4 }
  0x23   : > { %p4985_p0 = pneg %p4973_p12 }
  0x25   : > { %p4494_p1 = pnand %p4985_p0, %p4492_p13 }
  0x27   : > { %p4495_p2 = pneg %p4494_p1 }
  0x29   : > { %p4500_p4 = pnand %p4498_p3, %p4495_p2 }
  0x2b   : > { %4503 = shalt.err (!%p4500_p4)
}
  0x2c   : > { %s4504_s23 = scalar_lea.vmem %s438_s20, 1536  ;;  %p4512_p9 = scmp.lt.s32.totalorder %s438_s20, %s438_s20 }
  0x2d   : > { %p4505_p7 = scmp.ne.s32.totalorder %s438_s20, %s4504_s23  ;;  %p4513_p6 = scmp.lt.s32.totalorder %s4504_s23, %s4504_s23 }
  0x2f   : > { %p4507_p8 = pnand %p4505_p7, %p4985_p0  ;;  %p4514_p5 = por %p4513_p6, %p4512_p9 }
  0x31   : > { %p4508_p11 = pneg %p4507_p8 }
  0x33   : > { %p4515_p10 = pnand %p4514_p5, %p4508_p11 }
  0x35   : > { %4518 = shalt.err (!%p4515_p10)
}
  0x36   : > { %s5535_s21 = smov 64   ;;  %s5536_s30 = smov 4  }
  0x37   : > { %4328 = dma.hbm_to_vmem [thread:$0]  (!%p4973_p12), %s5504_s4, 1536, %s438_s20, [#allocation6], %s5535_s21, %s5535_s21, %s5536_s30  }
  0x38   : > { %s4803_s27 = smov [#allocation11]   ;;  %s4519_s0 = scalar_lea.hbm %s5506_s6, 32 }
  0x39   : > { %s489_s17 = sshll.u32 %s4803_s27, 4  ;;  %p4520_p5 = scmp.ne.s32.totalorder %s5506_s6, %s4519_s0  ;;  %s490_s17 = int_to_ptr.vmem [resolvable:$true] %s489_s17 }
  0x3a   : > { %p4526_p10 = scmp.lt.u32.totalorder %s4519_s0, %s5506_s6 }
  0x3b   : > { %p4522_p6 = pnand %p4520_p5, %p4985_p0 }
  0x3d   : > { %p4523_p9 = pneg %p4522_p6 }
  0x3f   : > { %p4528_p13 = pnand %p4526_p10, %p4523_p9 }
  0x41   : > { %4531 = shalt.err (!%p4528_p13)
}
  0x42   : > { %s4532_s20 = scalar_lea.vmem %s464_s29, 32  ;;  %p4540_p4 = scmp.lt.s32.totalorder %s464_s29, %s464_s29 }
  0x43   : > { %p4533_p1 = scmp.ne.s32.totalorder %s464_s29, %s4532_s20  ;;  %p4541_p7 = scmp.lt.s32.totalorder %s4532_s20, %s4532_s20 }
  0x45   : > { %p4535_p2 = pnand %p4533_p1, %p4985_p0  ;;  %p4542_p8 = por %p4541_p7, %p4540_p4 }
  0x47   : > { %p4536_p3 = pneg %p4535_p2 }
  0x49   : > { %p4543_p11 = pnand %p4542_p8, %p4536_p3 }
  0x4b   : > { %4546 = shalt.err (!%p4543_p11)
}
  0x4c   : > { %s5531_s15 = smov 16   ;;  %s5533_s22 = smov 1  }
  0x4d   : > { %4334 = dma.hbm_to_vmem [thread:$0]  (!%p4973_p12), %s5506_s6, 32, %s464_s29, [#allocation9], %s5531_s15, %s5531_s15, %s5533_s22  }
  0x4e   : > { %s4547_s24 = scalar_lea.hbm %s5508_s8, 256 }
  0x4f   : > { %p4548_p5 = scmp.ne.s32.totalorder %s5508_s8, %s4547_s24  ;;  %p4554_p10 = scmp.lt.u32.totalorder %s4547_s24, %s5508_s8 }
  0x51   : > { %p4550_p6 = pnand %p4548_p5, %p4985_p0 }
  0x53   : > { %p4551_p9 = pneg %p4550_p6 }
  0x55   : > { %p4556_p13 = pnand %p4554_p10, %p4551_p9 }
  0x57   : > { %4559 = shalt.err (!%p4556_p13)
}
  0x58   : > { %s4560_s13 = scalar_lea.vmem %s490_s17, 256  ;;  %p4568_p4 = scmp.lt.s32.totalorder %s490_s17, %s490_s17 }
  0x59   : > { %p4561_p1 = scmp.ne.s32.totalorder %s490_s17, %s4560_s13  ;;  %p4569_p7 = scmp.lt.s32.totalorder %s4560_s13, %s4560_s13 }
  0x5b   : > { %p4563_p2 = pnand %p4561_p1, %p4985_p0  ;;  %p4570_p8 = por %p4569_p7, %p4568_p4 }
  0x5d   : > { %p4564_p3 = pneg %p4563_p2 }
  0x5f   : > { %p4571_p11 = pnand %p4570_p8, %p4564_p3 }
  0x61   : > { %4574 = shalt.err (!%p4571_p11)
}
  0x62   : > { %4340 = dma.hbm_to_vmem [thread:$0]  (!%p4973_p12), %s5508_s8, 256, %s490_s17, [#allocation12], %s5535_s21, %s5535_s21, %s5536_s30  }
  0x63   : > { %s4806_s0 = smov [#allocation2]   ;;  %s4807_s24 = smov [#allocation7]  }
  0x64   : > { %s427_s16 = sshll.u32 %s4806_s0, 4  ;;  %s450_s27 = sshll.u32 %s4807_s24, 4  ;;  %s428_s16 = int_to_ptr.vmem [resolvable:$true] %s427_s16  ;;  %s451_s27 = int_to_ptr.vmem [resolvable:$true] %s450_s27 }
  0x65   : > { %s4575_s20 = scalar_lea.hbm %s5503_s3, 32 }
  0x66   : > { %p4576_p5 = scmp.ne.s32.totalorder %s5503_s3, %s4575_s20  ;;  %p4582_p10 = scmp.lt.u32.totalorder %s4575_s20, %s5503_s3 }
  0x68   : > { %p4578_p6 = pnand %p4576_p5, %p4985_p0 }
  0x6a   : > { %p4579_p9 = pneg %p4578_p6 }
  0x6c   : > { %p4584_p13 = pnand %p4582_p10, %p4579_p9 }
  0x6e   : > { %4587 = shalt.err (!%p4584_p13)
}
  0x6f   : > { %s4588_s17 = scalar_lea.vmem %s428_s16, 32  ;;  %p4596_p4 = scmp.lt.s32.totalorder %s428_s16, %s428_s16 }
  0x70   : > { %p4589_p1 = scmp.ne.s32.totalorder %s428_s16, %s4588_s17  ;;  %p4597_p7 = scmp.lt.s32.totalorder %s4588_s17, %s4588_s17 }
  0x72   : > { %p4591_p2 = pnand %p4589_p1, %p4985_p0  ;;  %p4598_p8 = por %p4597_p7, %p4596_p4 }
  0x74   : > { %p4592_p3 = pneg %p4591_p2 }
  0x76   : > { %p4599_p11 = pnand %p4598_p8, %p4592_p3 }
  0x78   : > { %4602 = shalt.err (!%p4599_p11)
}
  0x79   : > { %4325 = dma.hbm_to_vmem [thread:$0]  (!%p4973_p12), %s5503_s3, 32, %s428_s16, [#allocation3]  }
  0x7a   : > { %s4603_s24 = scalar_lea.hbm %s5505_s5, 96 }
  0x7b   : > { %p4604_p5 = scmp.ne.s32.totalorder %s5505_s5, %s4603_s24  ;;  %p4610_p10 = scmp.lt.u32.totalorder %s4603_s24, %s5505_s5 }
  0x7d   : > { %p4606_p6 = pnand %p4604_p5, %p4985_p0 }
  0x7f   : > { %p4607_p9 = pneg %p4606_p6 }
  0x81   : > { %p4612_p13 = pnand %p4610_p10, %p4607_p9 }
  0x83   : > { %4615 = shalt.err (!%p4612_p13)
}
  0x84   : > { %s4616_s29 = scalar_lea.vmem %s451_s27, 96  ;;  %p4624_p4 = scmp.lt.s32.totalorder %s451_s27, %s451_s27 }
  0x85   : > { %p4617_p1 = scmp.ne.s32.totalorder %s451_s27, %s4616_s29  ;;  %p4625_p7 = scmp.lt.s32.totalorder %s4616_s29, %s4616_s29 }
  0x87   : > { %p4619_p2 = pnand %p4617_p1, %p4985_p0  ;;  %p4626_p8 = por %p4625_p7, %p4624_p4 }
  0x89   : > { %p4620_p3 = pneg %p4619_p2 }
  0x8b   : > { %p4627_p11 = pnand %p4626_p8, %p4620_p3 }
  0x8d   : > { %4630 = shalt.err (!%p4627_p11)
}
  0x8e   : > { %s5555_s16 = smov 1   ;;  %s5556_s17 = smov 16  }
  0x8f   : > { %4331 = dma.hbm_to_vmem [thread:$0]  (!%p4973_p12), %s5505_s5, 96, %s451_s27, [#allocation6], %s5556_s17, %s5556_s17, %s5555_s16  }
  0x90   : > { %s4808_s22 = smov [#allocation10]   ;;  %s4809_s24 = smov [#allocation13]  }
  0x91   : > { %s476_s0 = sshll.u32 %s4808_s22, 4  ;;  %s503_s28 = sshll.u32 %s4809_s24, 4  ;;  %s477_s0 = int_to_ptr.vmem [resolvable:$true] %s476_s0  ;;  %s504_s28 = int_to_ptr.vmem [resolvable:$true] %s503_s28 }
  0x92   : > { %s4631_s13 = scalar_lea.hbm %s5507_s7, 32 }
  0x93   : > { %p4632_p5 = scmp.ne.s32.totalorder %s5507_s7, %s4631_s13  ;;  %p4638_p10 = scmp.lt.u32.totalorder %s4631_s13, %s5507_s7 }
  0x95   : > { %p4634_p6 = pnand %p4632_p5, %p4985_p0 }
  0x97   : > { %p4635_p9 = pneg %p4634_p6 }
  0x99   : > { %p4640_p13 = pnand %p4638_p10, %p4635_p9 }
  0x9b   : > { %4643 = shalt.err (!%p4640_p13)
}
  0x9c   : > { %s4644_s27 = scalar_lea.vmem %s477_s0, 32  ;;  %p4652_p4 = scmp.lt.s32.totalorder %s477_s0, %s477_s0 }
  0x9d   : > { %p4645_p1 = scmp.ne.s32.totalorder %s477_s0, %s4644_s27  ;;  %p4653_p7 = scmp.lt.s32.totalorder %s4644_s27, %s4644_s27 }
  0x9f   : > { %p4647_p2 = pnand %p4645_p1, %p4985_p0  ;;  %p4654_p8 = por %p4653_p7, %p4652_p4 }
  0xa1   : > { %p4648_p3 = pneg %p4647_p2 }
  0xa3   : > { %p4655_p11 = pnand %p4654_p8, %p4648_p3 }
  0xa5   : > { %4658 = shalt.err (!%p4655_p11)
}
  0xa6   : > { %4337 = dma.hbm_to_vmem [thread:$0]  (!%p4973_p12), %s5507_s7, 32, %s477_s0, [#allocation9], %s5556_s17, %s5556_s17, %s5555_s16  }
  0xa7   : > { %s4659_s24 = scalar_lea.hbm %s5509_s9, 16 }
  0xa8   : > { %p4660_p5 = scmp.ne.s32.totalorder %s5509_s9, %s4659_s24  ;;  %p4666_p10 = scmp.lt.u32.totalorder %s4659_s24, %s5509_s9 }
  0xaa   : > { %p4662_p6 = pnand %p4660_p5, %p4985_p0 }
  0xac   : > { %p4663_p9 = pneg %p4662_p6 }
  0xae   : > { %p4668_p13 = pnand %p4666_p10, %p4663_p9 }
  0xb0   : > { %4671 = shalt.err (!%p4668_p13)
}
  0xb1   : > { %s4672_s15 = scalar_lea.vmem %s504_s28, 16  ;;  %s4679_s16 = scalar_lea.vmem %s504_s28, 32 }
  0xb2   : > { %p4673_p1 = scmp.ne.s32.totalorder %s504_s28, %s4672_s15  ;;  %p4680_p4 = scmp.lt.s32.totalorder %s504_s28, %s504_s28 }
  0xb3   : > { %p4681_p7 = scmp.lt.s32.totalorder %s4679_s16, %s4672_s15 }
  0xb4   : > { %p4675_p2 = pnand %p4673_p1, %p4985_p0 }
  0xb5   : > { %p4682_p8 = por %p4681_p7, %p4680_p4 }
  0xb6   : > { %p4676_p3 = pneg %p4675_p2 }
  0xb8   : > { %p4683_p11 = pnand %p4682_p8, %p4676_p3 }
  0xba   : > { %4686 = shalt.err (!%p4683_p11)
}
  0xbb   : > { %4343 = dma.hbm_to_vmem [thread:$0]  (!%p4973_p12), %s5509_s9, 16, %s504_s28, [#allocation12]  }
  0xbc   : > { %s4810_s27 = smov [#allocation14]   ;;  %s4687_s22 = scalar_lea.hbm %s5512_s12, 256 }
  0xbd   : > { %s519_s21 = sshll.u32 %s4810_s27, 4  ;;  %p4688_p5 = scmp.ne.s32.totalorder %s5512_s12, %s4687_s22  ;;  %s520_s21 = int_to_ptr.vmem [resolvable:$true] %s519_s21 }
  0xbe   : > { %p4694_p10 = scmp.lt.u32.totalorder %s4687_s22, %s5512_s12 }
  0xbf   : > { %p4690_p6 = pnand %p4688_p5, %p4985_p0 }
  0xc1   : > { %p4691_p9 = pneg %p4690_p6 }
  0xc3   : > { %p4696_p13 = pnand %p4694_p10, %p4691_p9 }
  0xc5   : > { %4699 = shalt.err (!%p4696_p13)
}
  0xc6   : > { %s4700_s28 = scalar_lea.vmem %s520_s21, 256  ;;  %p4708_p4 = scmp.lt.s32.totalorder %s520_s21, %s520_s21 }
  0xc7   : > { %p4701_p1 = scmp.ne.s32.totalorder %s520_s21, %s4700_s28  ;;  %p4709_p7 = scmp.lt.s32.totalorder %s4700_s28, %s4700_s28 }
  0xc9   : > { %p4703_p2 = pnand %p4701_p1, %p4985_p0  ;;  %p4710_p8 = por %p4709_p7, %p4708_p4 }
  0xcb   : > { %p4704_p3 = pneg %p4703_p2 }
  0xcd   : > { %p4711_p11 = pnand %p4710_p8, %p4704_p3 }
  0xcf   : > { %4714 = shalt.err (!%p4711_p11)
}
  0xd0   : > { %s5557_s29 = smov 4   ;;  %s5558_s15 = smov 64  }
  0xd1   : > { %4346 = dma.hbm_to_vmem [thread:$0]  (!%p4973_p12), %s5512_s12, 256, %s520_s21, [#allocation15], %s5558_s15, %s5558_s15, %s5557_s29  }
  0xd2   : > { %p5559_p5 = scmp.ne.s32.totalorder %s5552_s18, 0 }
  0xd3   : > { %p5560_p0 = scmp.eq.s32.totalorder (!%p5559_p5), %s4937_s25, 0 }
  0xd4   : > { %557 = sbr.rel (%p5559_p5) target bundleno = 4846 (0x12ee), region = 84 }
  0xdb   : > { %4760 = dma.done.wait (%p5560_p0), [#allocation3], 32   ;;  %p5561_p6 = pmov %p5560_p0 }
  0xdc   : > { %p5562_p9 = pmov %p5560_p0 }
  0xdd   : > { %4762 = vsyncadd (%p5561_p6), [#allocation3], 4294967264 }
  0xde   : > { %4764 = dma.done.wait (%p5562_p9), [#allocation6], 1632   ;;  %p5563_p10 = pmov %p5560_p0 }
  0xdf   : > { %p5564_p13 = pmov %p5560_p0 }
  0xe0   : > { %4766 = vsyncadd (%p5563_p10), [#allocation6], 4294965664 }
  0xe1   : > { %4768 = dma.done.wait (%p5564_p13), [#allocation9], 64   ;;  %p5565_p12 = pmov %p5560_p0 }
  0xe2   : > { %p5566_p1 = pmov %p5560_p0 }
  0xe3   : > { %4770 = vsyncadd (%p5565_p12), [#allocation9], 4294967232 }
  0xe4   : > { %4772 = dma.done.wait (%p5566_p1), [#allocation12], 272   ;;  %p5567_p2 = pmov %p5560_p0 }
  0xe5   : > { %p5568_p3 = pmov %p5560_p0 }
  0xe6   : > { %4774 = vsyncadd (%p5567_p2), [#allocation12], 4294967024 }
  0xe7   : > { %4776 = dma.done.wait (%p5568_p3), [#allocation15], 256   ;;  %p5569_p4 = pmov %p5560_p0 }
  0xe8   : > { %p637_p7 = scmp.lt.s32.totalorder %s4937_s25, 1  ;;  %v4811_v0 = vmov 0   ;;  %v4431_v1 = vld [vmem:[%s5502_s2 + $0x4] ss:$8 sps:$4 sm:$0xff]   ;;  %v4433_v2 = vld [vmem:[%s5502_s2] ss:$8 sps:$4 sm:$0xff]   ;;  %v690_v10 = vlaneseq }
  0xe9   : > { %4778 = vsyncadd (%p5569_p4), [#allocation15], 4294967040  ;;  %756 = vmatprep.mubr.bf16.mxu1 %v4811_v0  ;;  %724 = vmatprep.subr.bf16.mxu1 %v4431_v1  ;;  %v4434_v3 = vld [vmem:[%s5502_s2 + $0x14] ss:$8 sps:$4 sm:$0xff]   ;;  %v4436_v4 = vld [vmem:[%s5502_s2 + $0x10] ss:$8 sps:$4 sm:$0xff]  }
  0xea   : > { %s5169_s18 = scalar_select %p637_p7, %s4937_s25, 1  ;;  %vm720_vm0 = vcmask 261120   ;;  %725 = vmatpush1.bf16.msra.mxu1 %v4433_v2  ;;  %v4437_v7 = vld [vmem:[#allocation5] sm:$0xff]   ;;  %v4812_v8 = vmov 0.0   ;;  %v4438_v9 = vld [vmem:[#allocation5 + $0x8] sm:$0xff]   ;;  %vm4813_vm1 = vmmov 0  }
  0xeb   : > { %726 = vmatprep.subr.bf16.mxu1 %v4434_v3  ;;  %4028 = vmatprep.subr.bf16.mxu0 %v4812_v8  ;;  %v691_v11 = vshrl.u32 %v690_v10, 7  ;;  %v649_v13 = vld [vmem:[#allocation2] sm:$0x3]  ;;  %v4814_v40 = vmov -1.0   ;;  %v4439_v46 = vld [vmem:[#allocation5 + $0x20] sm:$0xff]   ;;  %s4815_s13 = smov 64  }
  0xec   : > { %s643_s21 = scalar_lea.vmem %s5501_s1, %s5169_s18  ;;  %4032 = vmatprep.mubr.msk.bf16.mxu0 %vm4813_vm1, %v4812_v8  ;;  %v4440_v48 = vld [vmem:[#allocation5 + $0x28] sm:$0xff]   ;;  %s3871_s28 = sshll.u32 %s5169_s18, 3  ;;  %vm1340_vm4 = vcmask 64512   ;;  %vm1810_vm5 = vcmask 1043456   ;;  %vm3409_vm6 = vcmask 130048   ;;  %vm3411_vm7 = vcmask 195584  }
  0xed   : > { %v3872_v5 = vld [vmem:[%s643_s21] ss:$0 sm:$0xff]  ;;  %v5196_v12 = vsub.s32 0, %v691_v11  ;;  %s5570_s16 = sld [smem:[#allocation31_spill]]  ;;  %v696_v49 = vsub.s32 1, %v691_v11  ;;  %s4816_s18 = smov 96  }
  0xee   : > { %v688_v6 = vpack.c.bf16 %v3872_v5, %v3872_v5  ;;  %727 = vmatpush1.bf16.msra.mxu1 %v4436_v4  ;;  %v4443_v4 = vld [vmem:[#allocation5 + $0x10] sm:$0xff]   ;;  %s4817_s26 = smov 32   ;;  %s4818_s19 = smov 120   ;;  %vm3638_vm9 = vcmask 523264  }
  0xef   : > { %4020 = vmatprep.subr.bf16.mxu1 %v4812_v8  ;;  %v693_v14 = vrot.slane %v649_v13, %v5196_v12  ;;  %v697_v51 = vrot.slane %v649_v13, %v696_v49  ;;  %4029 = vmatpush3.bf16.msra.mxu0 %v4443_v4  ;;  %s4819_s0 = smov 56   ;;  %s4820_s27 = smov 112  }
  0xf0   : > { %4030 = vmatprep.subr.bf16.mxu0 %v4812_v8  ;;  %s4821_s21 = smov 88   ;;  %s4822_s30 = smov 48  }
  0xf1   : > { %3877 = vmatmul.mubr.msk.bf16.vlgmr.msra.gmra.mrb[0].mxu1 %vm720_vm0, %v688_v6  ;;  %s4823_s14 = smov 104   ;;  %s4824_s22 = smov 80  }
  0xf2   : > { %4021 = vmatpush3.bf16.msra.mxu1 %v4437_v7  ;;  %4024 = vmatprep.mubr.msk.bf16.mxu1 %vm4813_vm1, %v4812_v8  ;;  %s4825_s24 = smov 72   ;;  %s4826_s23 = smov 40  }
  0xf3   : > { %4022 = vmatprep.subr.bf16.mxu1 %v4812_v8  ;;  %s640_s17 = scalar_lea.vmem %s5570_s16, %s3871_s28  ;;  %s4827_s20 = smov 8  }
  0xf4   : > { %v5214_v50 = vld [vmem:[%s640_s17] sm:$0xff]  ;;  %s4829_s17 = smov 24   ;;  %s5572_s28 = sld [smem:[#allocation32_spill]] }
  0xf5   : > { %v1237_v52 = vsel %vm720_vm0, %v5214_v50, 0.0  ;;  %s5573_s29 = sld [smem:[#allocation24_spill]] }
  0xf6   : > { %4023 = vmatpush3.bf16.msra.mxu1 %v4438_v9 }
  0xf7   : > { %4036 = vmatprep.subr.bf16.mxu1 %v4812_v8 }
  0xfb   : > { %s634_s15 = sand.u32 1, %s5573_s29  }
  0xfc   : > { %s3870_s16 = sshll.u32 %s634_s15, 3 }
 0x1c4   : > { %v758_v15 = vpop.f32.mrb[0].mxu1 }
 0x1c5   : > { %v759_v16 = vadd.f32 %v758_v15, %v693_v14  ;;  %v760_v17 = vpop.f32.mrb[1].mxu1  ;;  %v4441_v15 = vld [vmem:[#allocation5 + $0x40] sm:$0xff]  }
 0x1c6   : > { %v762_v18 = vpop.f32.mrb[2].mxu1  ;;  %v761_v53 = vadd.f32 %v760_v17, %v697_v51  ;;  %v4448_v51 = vld [vmem:[#allocation5 + $0x58] sm:$0xff]  }
 0x1c7   : > { %v767_v19 = vmul.f32 0.70710677, %v759_v16  ;;  %v763_v20 = vpop.f32.mrb[3].mxu1  ;;  %v765_v43 = vmul.f32 0.5, %v759_v16 }
 0x1c8   : > { %v768_v54 = vmul.f32 0.70710677, %v761_v53  ;;  %v766_v18 = vmul.f32 0.5, %v761_v53  ;;  %v3902_v53 = vld [vmem:[#allocation8] ss:$0 sm:$0xff] }
 0x1c9   : > { %v773_v21 = vand.u32 2147483647, %v767_v19  ;;  %vm769_vm2 = vcmp.ge.f32.partialorder %v767_v19, 0.0  ;;  %v4442_v19 = vld [vmem:[#allocation5 + $0x48] sm:$0xff]  }
 0x1ca   : > { %v771_v41 = vsel %vm769_vm2, 1.0, %v4814_v40  ;;  %v774_v55 = vand.u32 2147483647, %v768_v54  ;;  %vm770_vm3 = vcmp.ge.f32.partialorder %v768_v54, 0.0  ;;  %v3886_v54 = vld [vmem:[#allocation7 + $0x2] ss:$0 sm:$0xff] }
 0x1cb   : > { %v775_v22 = vmul.f32 0.3275911, %v773_v21  ;;  %v801_v24 = vsub.f32 0.0, %v773_v21  ;;  %v772_v13 = vsel %vm770_vm3, 1.0, %v4814_v40 }
 0x1cc   : > { %v776_v56 = vmul.f32 0.3275911, %v774_v55  ;;  %v802_v63 = vsub.f32 0.0, %v774_v55 }
 0x1cd   : > { %v777_v23 = vadd.f32 1.0, %v775_v22  ;;  %v803_v26 = vmul.f32 %v801_v24, %v773_v21 }
 0x1ce   : > { %v778_v57 = vadd.f32 1.0, %v776_v56  ;;  %v804_v1 = vmul.f32 %v802_v63, %v774_v55 }
 0x1cf   : > { %4459 = vrcp.f32 %v777_v23  ;;  %v805_v29 = vmul.f32 1.442695, %v803_v26 }
 0x1d0   : > { %v807_v3 = vmul.f32 1.442695, %v804_v1 }
 0x1d1   : > { %4461 = vpow2.f32 %v805_v29 }
 0x1d2   : > { %4463 = vrcp.f32 %v778_v57 }
 0x1d3   : > { %4465 = vpow2.f32 %v807_v3 }
 0x1d9   : > { %v4460_v25 = vpop.eup %4459 }
 0x1da   : > { %v783_v27 = vmul.f32 1.0614054, %v4460_v25 }
 0x1db   : > { %v4462_v37 = vpop.eup %4461 }
 0x1dc   : > { %v785_v28 = vadd.f32 -1.4531521, %v783_v27  ;;  %v4464_v58 = vpop.eup %4463  ;;  %v4444_v27 = vld [vmem:[#allocation5 + $0x18] sm:$0xff]  }
 0x1dd   : > { %v784_v59 = vmul.f32 1.0614054, %v4464_v58  ;;  %v4466_v9 = vpop.eup %4465  ;;  %4031 = vmatpush3.bf16.msra.mxu0 %v4444_v27 }
 0x1de   : > { %v787_v30 = vmul.f32 %v4460_v25, %v785_v28  ;;  %4044 = vmatprep.subr.bf16.mxu0 %v4812_v8 }
 0x1df   : > { %v786_v60 = vadd.f32 -1.4531521, %v784_v59  ;;  %v3903_v59 = vld [vmem:[#allocation10] ss:$0 sm:$0xff] }
 0x1e0   : > { %v789_v31 = vadd.f32 1.4214138, %v787_v30  ;;  %v4449_v30 = vld [vmem:[#allocation11] sm:$0xff]  }
 0x1e1   : > { %v788_v61 = vmul.f32 %v4464_v58, %v786_v60 }
 0x1e2   : > { %v791_v32 = vmul.f32 %v4460_v25, %v789_v31 }
 0x1e3   : > { %v790_v62 = vadd.f32 1.4214138, %v788_v61 }
 0x1e4   : > { %v793_v33 = vadd.f32 -0.28449672, %v791_v32 }
 0x1e5   : > { %v792_v0 = vmul.f32 %v4464_v58, %v790_v62 }
 0x1e6   : > { %v795_v34 = vmul.f32 %v4460_v25, %v793_v33  ;;  %v4450_v33 = vld [vmem:[#allocation11 + $0x8] sm:$0xff]  }
 0x1e7   : > { %v794_v2 = vadd.f32 -0.28449672, %v792_v0 }
 0x1e8   : > { %v797_v35 = vadd.f32 0.2548296, %v795_v34 }
 0x1e9   : > { %v796_v5 = vmul.f32 %v4464_v58, %v794_v2 }
 0x1ea   : > { %v799_v36 = vmul.f32 %v4460_v25, %v797_v35 }
 0x1eb   : > { %v798_v6 = vadd.f32 0.2548296, %v796_v5 }
 0x1ec   : > { %v809_v38 = vmul.f32 %v4462_v37, %v799_v36  ;;  %v4445_v36 = vld [vmem:[#allocation5 + $0x30] sm:$0xff]  }
 0x1ed   : > { %v800_v7 = vmul.f32 %v4464_v58, %v798_v6 }
 0x1ee   : > { %v811_v39 = vsub.f32 1.0, %v809_v38 }
 0x1ef   : > { %v810_v10 = vmul.f32 %v4466_v9, %v800_v7 }
 0x1f0   : > { %v813_v42 = vmul.f32 %v811_v39, %v771_v41 }
 0x1f1   : > { %v812_v11 = vsub.f32 1.0, %v810_v10 }
 0x1f2   : > { %v815_v44 = vadd.f32 1.0, %v813_v42  ;;  %v4446_v42 = vld [vmem:[#allocation5 + $0x38] sm:$0xff]  }
 0x1f3   : > { %v814_v14 = vmul.f32 %v812_v11, %v772_v13 }
 0x1f4   : > { %v817_v45 = vmul.f32 %v815_v44, %v765_v43 }
 0x1f5   : > { %v816_v16 = vadd.f32 1.0, %v814_v14 }
 0x1f6   : > { %v5200_v47 = vpack.c.bf16 %v817_v45, %v817_v45  ;;  %v4447_v45 = vld [vmem:[#allocation5 + $0x50] sm:$0xff]  }
 0x1f7   : > { %v818_v20 = vmul.f32 %v816_v16, %v766_v18 }
 0x1f8   : > { %970 = vrot.lane.b32.xlu0 %v5200_v47, %s4815_s13  ;;  %4025 = vmatmul.mubr.msk.bf16.vlgmr.msra.gmra.mrb[4].mxu1 %vm720_vm0, %v5200_v47 }
 0x1f9   : > { %4037 = vmatpush3.bf16.msra.mxu1 %v4439_v46  ;;  %4040 = vmatprep.mubr.msk.bf16.mxu1 %vm4813_vm1, %v4812_v8  ;;  %v1102_v21 = vpack.c.bf16 %v818_v20, %v818_v20 }
 0x1fa   : > { %4038 = vmatprep.subr.bf16.mxu1 %v4812_v8 }
 0x1fd   : > { %4039 = vmatpush3.bf16.msra.mxu1 %v4440_v48 }
 0x1fe   : > { %4052 = vmatprep.subr.bf16.mxu1 %v4812_v8 }
 0x217   : > { %1238 = vadd.xlane.f32.xlu0 %v1237_v52 }
 0x26a   : > { %v971_v17 = vpop.permute.xlu0 %970 }
 0x26b   : > { %4041 = vmatmul.mubr.msk.bf16.vlgmr.msra.gmra.mrb[8].mxu1 %vm720_vm0, %v971_v17 }
 0x26c   : > { %4053 = vmatpush3.bf16.msra.mxu1 %v4441_v15  ;;  %4056 = vmatprep.mubr.msk.bf16.mxu1 %vm4813_vm1, %v4812_v8 }
 0x26d   : > { %4054 = vmatprep.subr.bf16.mxu1 %v4812_v8 }
 0x270   : > { %4055 = vmatpush3.bf16.msra.mxu1 %v4442_v19  ;;  %v3904_v19 = vld [vmem:[#allocation13] ss:$0 sm:$0xff] }
 0x271   : > { %4068 = vmatprep.subr.bf16.mxu1 %v4812_v8 }
 0x273   : > { %4057 = vmatmul.mubr.msk.bf16.vlgmr.msra.gmra.mrb[12].mxu1 %vm720_vm0, %v1102_v21 }
 0x274   : > { %4072 = vmatprep.mubr.msk.bf16.mxu1 %vm4813_vm1, %v4812_v8  ;;  %4069 = vmatpush3.bf16.msra.mxu1 %v4449_v30 }
 0x275   : > { %4070 = vmatprep.subr.bf16.mxu1 %v4812_v8 }
 0x278   : > { %4071 = vmatpush3.bf16.msra.mxu1 %v4450_v33 }
 0x279   : > { %4106 = vmatprep.subr.bf16.mxu1 %v4812_v8 }
 0x2a4   : > { %v1239_v22 = vpop.xlane.xlu0 %1238 }
 0x2a5   : > { %v1241_v23 = vmul.f32 0.03125, %v1239_v22 }
 0x2a7   : > { %v1242_v24 = vsub.f32 %v5214_v50, %v1241_v23 }
 0x2a9   : > { %v1243_v25 = vmul.f32 %v1242_v24, %v1242_v24 }
 0x2ab   : > { %v1244_v26 = vsel %vm720_vm0, %v1243_v25, 0.0 }
 0x2ac   : > { %1245 = vadd.xlane.f32.xlu1 %v1244_v26 }
 0x2bd   : > { %900 = vrot.lane.b32.xlu1 %v5200_v47, %s4816_s18 }
 0x2c1   : > { %1040 = vrot.lane.b32.xlu1 %v5200_v47, %s4817_s26  ;;  %v3878_v47 = vld [vmem:[#allocation7] ss:$0 sm:$0xff]  ;;  %s5574_s26 = sld [smem:[#allocation34_spill]] }
 0x2c5   : > { %1180 = vrot.lane.b32.xlu1 %v1102_v21, %s4816_s18 }
 0x2cb   : > { %v880_v28 = vpop.f32.mrb[4].mxu1 }
 0x2cc   : > { %v4026_v29 = vpop.f32.mrb[5].mxu1  ;;  %v881_v56 = vadd.f32 %v3878_v47, %v880_v28 }
 0x2cd   : > { %v883_v31 = vpop.f32.mrb[6].mxu1 }
 0x2ce   : > { %v4027_v32 = vpop.f32.mrb[7].mxu1  ;;  %v1268_v62 = vrot.slane %v881_v56, %v5196_v12 }
 0x339   : > { %v1246_v34 = vpop.xlane.xlu1 %1245 }
 0x33a   : > { %v1247_v35 = vmul.f32 0.03125, %v1246_v34 }
 0x33c   : > { %v1248_v37 = vadd.f32 1e-05, %v1247_v35 }
 0x33d   : > { %v901_v38 = vpop.permute.xlu1 %900 }
 0x33e   : > { %4467 = vrsqrt.f32 %v1248_v37  ;;  %4033 = vmatmul.mubr.msk.bf16.vlgmr.msra.gmra.mrb[0].mxu0 %vm720_vm0, %v901_v38  ;;  %v1021_v39 = vpop.f32.mrb[8].mxu1 }
 0x33f   : > { %v4042_v41 = vpop.f32.mrb[9].mxu1  ;;  %4045 = vmatpush3.bf16.msra.mxu0 %v4445_v36  ;;  %4048 = vmatprep.mubr.msk.bf16.mxu0 %vm4813_vm1, %v4812_v8  ;;  %v1022_v60 = vadd.f32 %v3886_v54, %v1021_v39 }
 0x340   : > { %v1024_v43 = vpop.f32.mrb[10].mxu1  ;;  %4046 = vmatprep.subr.bf16.mxu0 %v4812_v8 }
 0x341   : > { %v4043_v44 = vpop.f32.mrb[11].mxu1  ;;  %v1041_v46 = vpop.permute.xlu1 %1040  ;;  %v1273_v2 = vrot.slane %v1022_v60, %v5196_v12 }
 0x343   : > { %4047 = vmatpush3.bf16.msra.mxu0 %v4446_v42 }
 0x344   : > { %4060 = vmatprep.subr.bf16.mxu0 %v4812_v8 }
 0x345   : > { %v1181_v0 = vpop.permute.xlu1 %1180 }
 0x346   : > { %4049 = vmatmul.mubr.msk.bf16.vlgmr.msra.gmra.mrb[4].mxu0 %vm720_vm0, %v1041_v46  ;;  %v5243_v48 = vpop.f32.mrb[12].mxu1 }
 0x347   : > { %v4058_v49 = vpop.f32.mrb[13].mxu1  ;;  %4061 = vmatpush3.bf16.msra.mxu0 %v4447_v45  ;;  %4064 = vmatprep.mubr.msk.bf16.mxu0 %vm4813_vm1, %v4812_v8 }
 0x348   : > { %v4468_v52 = vpop.eup %4467  ;;  %v1163_v55 = vpop.f32.mrb[14].mxu1  ;;  %4062 = vmatprep.subr.bf16.mxu0 %v4812_v8 }
 0x349   : > { %v1250_v57 = vmul.f32 %v4468_v52, %v1242_v24  ;;  %v4059_v58 = vpop.f32.mrb[15].mxu1 }
 0x34b   : > { %v1257_v61 = vmul.f32 %v3902_v53, %v1250_v57  ;;  %4063 = vmatpush3.bf16.msra.mxu0 %v4448_v51 }
 0x34c   : > { %4076 = vmatprep.subr.mxu0 %v4812_v8 }
 0x34d   : > { %v1264_v63 = vadd.f32 %v3903_v59, %v1257_v61 }
 0x34e   : > { %4065 = vmatmul.mubr.msk.bf16.vlgmr.msra.gmra.mrb[8].mxu0 %vm720_vm0, %v1181_v0 }
 0x34f   : > { %v1269_v1 = vmul.f32 %v1268_v62, %v1264_v63  ;;  %4078 = vmatprep.mubr.msk.f32.mxu0 %vm4813_vm1, %v4812_v8 }
 0x351   : > { %v1274_v3 = vadd.f32 %v1273_v2, %v1269_v1 }
 0x353   : > { %v1275_v4 = vpack.c.bf16 %v1274_v3, %v1274_v3 }
 0x355   : > { %4073 = vmatmul.mubr.msk.bf16.vlgmr.msra.gmra.mrb[16].mxu1 %vm720_vm0, %v1275_v4 }
 0x356   : > { %4108 = vmatprep.mubr.msk.bf16.mxu1 %vm4813_vm1, %v4812_v8 }
 0x411   : > { %v5257_v5 = vpop.f32.mrb[0].mxu0 }
 0x412   : > { %v4034_v6 = vpop.f32.mrb[1].mxu0 }
 0x413   : > { %v954_v7 = vpop.f32.mrb[2].mxu0 }
 0x414   : > { %v4035_v9 = vpop.f32.mrb[3].mxu0 }
 0x419   : > { %v5259_v10 = vpop.f32.mrb[4].mxu0 }
 0x41a   : > { %v4050_v11 = vpop.f32.mrb[5].mxu0 }
 0x41b   : > { %v1094_v13 = vpop.f32.mrb[6].mxu0 }
 0x41c   : > { %v4051_v14 = vpop.f32.mrb[7].mxu0 }
 0x421   : > { %v5261_v15 = vpop.f32.mrb[8].mxu0 }
 0x422   : > { %v4066_v16 = vpop.f32.mrb[9].mxu0 }
 0x423   : > { %v1234_v17 = vpop.f32.mrb[10].mxu0 }
 0x424   : > { %v4067_v18 = vpop.f32.mrb[11].mxu0 }
 0x428   : > { %v1331_v20 = vpop.f32.mrb[16].mxu1 }
 0x429   : > { %v5263_v21 = vadd.f32 %v3904_v19, %v1331_v20  ;;  %v4074_v22 = vpop.f32.mrb[17].mxu1 }
 0x42a   : > { %v1334_v23 = vpop.f32.mrb[18].mxu1 }
 0x42b   : > { %1338 = vrot.lane.b32.xlu1 %v5263_v21, %s4816_s18  ;;  %v4075_v24 = vpop.f32.mrb[19].mxu1  ;;  %v5269_v25 = vpack.c.bf16 %v5263_v21, %v5263_v21  ;;  %v1341_v26 = vsel %vm1340_vm4, %v5263_v21, 0 }
 0x42c   : > { %v1411_v27 = vand.u32 4294901760, %v1341_v26 }
 0x42d   : > { %1805 = vrot.lane.b32.xlu0 %v5269_v25, %s4815_s13  ;;  %s4828_s13 = smov 16  }
 0x42e   : > { %v1412_v28 = vsub.f32 %v1341_v26, %v1411_v27 }
 0x430   : > { %v1413_v29 = vand.u32 4294901760, %v1412_v28 }
 0x431   : > { %1854 = vrot.lane.b32.xlu0 %v5263_v21, %s4818_s19  ;;  %s5575_s19 = sld [smem:[#allocation29_spill]] }
 0x432   : > { %v1414_v32 = vsub.f32 %v1412_v28, %v1413_v29 }
 0x434   : > { %v1415_v37 = vand.u32 4294901760, %v1414_v32 }
 0x437   : > { %p5578_p11 = scmp.ne.s32.totalorder %s5575_s19, 0 }
 0x49d   : > { %v1339_v30 = vpop.permute.xlu1 %1338 }
 0x49e   : > { %v1343_v31 = vsel %vm1340_vm4, %v1339_v30, 0 }
 0x49f   : > { %v1346_v33 = vand.u32 4294901760, %v1343_v31  ;;  %v1806_v34 = vpop.permute.xlu0 %1805 }
 0x4a0   : > { %v1812_v35 = vsel %vm1810_vm5, %v1806_v34, 0 }
 0x4a1   : > { %v1423_v36 = vsub.f32 %v1343_v31, %v1346_v33  ;;  %4077 = vmatpush3.xpose.msra.mxu0 %v1346_v33  ;;  %4107 = vmatpush3.bf16.msra.mxu1 %v1812_v35 }
 0x4a2   : > { %4081 = vmatprep.subr.mxu0 %v4812_v8  ;;  %4112 = vmatprep.subr.mxu1 %v4812_v8 }
 0x4a3   : > { %v1424_v38 = vand.u32 4294901760, %v1423_v36  ;;  %v1855_v54 = vpop.permute.xlu0 %1854 }
 0x4a4   : > { %4079 = vmatmul.mubr.f32.vlgmr.msra.gmra.mrb[12].mxu0 %v1415_v37  ;;  %v1858_v56 = vsel %vm1340_vm4, %v1855_v54, 0 }
 0x4a5   : > { %v1425_v39 = vsub.f32 %v1423_v36, %v1424_v38  ;;  %4083 = vmatprep.mubr.msk.f32.mxu0 %vm4813_vm1, %v4812_v8  ;;  %v1928_v59 = vand.u32 4294901760, %v1858_v56 }
 0x4a7   : > { %v1426_v41 = vand.u32 4294901760, %v1425_v39  ;;  %v1929_v61 = vsub.f32 %v1858_v56, %v1928_v59 }
 0x4a9   : > { %4082 = vmatpush3.xpose.msra.mxu0 %v1426_v41  ;;  %v1930_v1 = vand.u32 4294901760, %v1929_v61 }
 0x4aa   : > { %4086 = vmatprep.subr.mxu0 %v4812_v8 }
 0x4ab   : > { %v1931_v4 = vsub.f32 %v1929_v61, %v1930_v1 }
 0x4ac   : > { %4084 = vmatmul.mubr.f32.vlgmr.msra.gmra.mrb[12].mxu0 %v1411_v27 }
 0x4ad   : > { %4087 = vmatpush3.xpose.msra.mxu0 %v1423_v36  ;;  %4088 = vmatprep.mubr.msk.f32.mxu0 %vm4813_vm1, %v4812_v8  ;;  %v1932_v7 = vand.u32 4294901760, %v1931_v4 }
 0x4ae   : > { %4091 = vmatprep.subr.mxu0 %v4812_v8 }
 0x4b4   : > { %4089 = vmatmul.mubr.f32.vlgmr.msra.gmra.mrb[12].mxu0 %v1412_v28 }
 0x4b5   : > { %4092 = vmatpush3.xpose.msra.mxu0 %v1346_v33  ;;  %4093 = vmatprep.mubr.msk.f32.mxu0 %vm4813_vm1, %v4812_v8 }
 0x4b6   : > { %4096 = vmatprep.subr.mxu0 %v4812_v8 }
 0x4bc   : > { %4094 = vmatmul.mubr.f32.vlgmr.msra.gmra.mrb[12].mxu0 %v1413_v29 }
 0x4bd   : > { %4097 = vmatpush3.xpose.msra.mxu0 %v1424_v38  ;;  %4098 = vmatprep.mubr.msk.f32.mxu0 %vm4813_vm1, %v4812_v8 }
 0x4be   : > { %4101 = vmatprep.subr.mxu0 %v4812_v8 }
 0x4c4   : > { %4099 = vmatmul.mubr.f32.vlgmr.msra.gmra.mrb[12].mxu0 %v1411_v27 }
 0x4c5   : > { %4102 = vmatpush3.xpose.msra.mxu0 %v1346_v33  ;;  %4103 = vmatprep.mubr.msk.f32.mxu0 %vm4813_vm1, %v4812_v8 }
 0x4c6   : > { %4142 = vmatprep.subr.bf16.mxu0 %v4812_v8 }
 0x4cc   : > { %4104 = vmatmul.mubr.f32.vlgmr.msra.gmra.mrb[12].mxu0 %v1411_v27 }
 0x4cd   : > { %4144 = vmatprep.mubr.msk.bf16.mxu0 %vm4813_vm1, %v4812_v8 }
 0x59f   : > { %v1787_v42 = vpop.f32.mrb[12].mxu0 }
 0x5a0   : > { %v4105_v43 = vpop.f32.mrb[13].mxu0  ;;  %v1791_v44 = vsel %vm1340_vm4, %v1787_v42, -inf }
 0x5a1   : > { %1792 = vmax.xlane.f32.xlu1 %v1791_v44 }
 0x5b2   : > { %2320 = vrot.lane.b32.xlu1 %v5269_v25, %s4819_s0  ;;  %s3929_s0 = sshll.u32 %s4937_s25, 7 }
 0x5b6   : > { %2368 = vrot.lane.b32.xlu1 %v5263_v21, %s4820_s27  ;;  %s5571_s27 = sld [smem:[#allocation33_spill]] }
 0x62e   : > { %v1793_v45 = vpop.xlane.xlu1 %1792 }
 0x62f   : > { %v1794_v46 = vsub.f32 %v1787_v42, %v1793_v45 }
 0x631   : > { %v1795_v47 = vmul.f32 1.442695, %v1794_v46 }
 0x632   : > { %v2321_v49 = vpop.permute.xlu1 %2320 }
 0x633   : > { %4469 = vpow2.f32 %v1795_v47  ;;  %v2326_v51 = vsel %vm1810_vm5, %v2321_v49, 0 }
 0x634   : > { %4143 = vmatpush3.bf16.msra.mxu0 %v2326_v51 }
 0x635   : > { %4148 = vmatprep.subr.mxu0 %v4812_v8 }
 0x636   : > { %v2369_v29 = vpop.permute.xlu1 %2368 }
 0x637   : > { %v2372_v31 = vsel %vm1340_vm4, %v2369_v29, 0 }
 0x638   : > { %v2442_v34 = vand.u32 4294901760, %v2372_v31 }
 0x63a   : > { %v2443_v36 = vsub.f32 %v2372_v31, %v2442_v34 }
 0x63c   : > { %v2444_v41 = vand.u32 4294901760, %v2443_v36 }
 0x63d   : > { %v4470_v52 = vpop.eup %4469 }
 0x63e   : > { %v1797_v53 = vsel %vm1340_vm4, %v4470_v52, 0.0  ;;  %v2445_v44 = vsub.f32 %v2443_v36, %v2444_v41 }
 0x63f   : > { %1798 = vadd.xlane.f32.xlu0 %v1797_v53 }
 0x640   : > { %v2446_v46 = vand.u32 4294901760, %v2445_v44 }
 0x655   : > { %1856 = vrot.lane.b32.xlu0 %v5263_v21, %s4821_s21  ;;  %s636_s21 = scalar_lea.vmem [#allocation16], %s3870_s16 }
 0x6cc   : > { %v1799_v55 = vpop.xlane.xlu0 %1798 }
 0x6cd   : > { %4471 = vrcp.f32 %v1799_v55 }
 0x6d0   : > { %v1857_v57 = vpop.permute.xlu0 %1856 }
 0x6d1   : > { %v1860_v58 = vsel %vm1340_vm4, %v1857_v57, 0 }
 0x6d2   : > { %v1863_v60 = vand.u32 4294901760, %v1860_v58 }
 0x6d4   : > { %v1940_v63 = vsub.f32 %v1860_v58, %v1863_v60 }
 0x6d6   : > { %v1941_v3 = vand.u32 4294901760, %v1940_v63 }
 0x6d7   : > { %v4472_v62 = vpop.eup %4471 }
 0x6d8   : > { %v1801_v0 = vmul.f32 %v4472_v62, %v4470_v52  ;;  %v1942_v6 = vsub.f32 %v1940_v63, %v1941_v3 }
 0x6da   : > { %v1802_v2 = vpack.c.bf16 %v1801_v0, %v1801_v0  ;;  %v1943_v9 = vand.u32 4294901760, %v1942_v6 }
 0x6dc   : > { %4109 = vmatmul.mubr.msk.bf16.vlgmr.msra.gmra.mrb[20].mxu1 %vm1340_vm4, %v1802_v2 }
 0x6dd   : > { %4113 = vmatpush3.xpose.msra.mxu1 %v1863_v60  ;;  %4114 = vmatprep.mubr.msk.f32.mxu1 %vm4813_vm1, %v4812_v8 }
 0x6de   : > { %4117 = vmatprep.subr.mxu1 %v4812_v8 }
 0x6e4   : > { %4115 = vmatmul.mubr.f32.vlgmr.msra.gmra.mrb[24].mxu1 %v1932_v7 }
 0x6e5   : > { %4118 = vmatpush3.xpose.msra.mxu1 %v1943_v9  ;;  %4119 = vmatprep.mubr.msk.f32.mxu1 %vm4813_vm1, %v4812_v8 }
 0x6e6   : > { %4122 = vmatprep.subr.mxu1 %v4812_v8 }
 0x6ec   : > { %4120 = vmatmul.mubr.f32.vlgmr.msra.gmra.mrb[24].mxu1 %v1928_v59 }
 0x6ed   : > { %4123 = vmatpush3.xpose.msra.mxu1 %v1940_v63  ;;  %4124 = vmatprep.mubr.msk.f32.mxu1 %vm4813_vm1, %v4812_v8 }
 0x6ee   : > { %4127 = vmatprep.subr.mxu1 %v4812_v8 }
 0x6f4   : > { %4125 = vmatmul.mubr.f32.vlgmr.msra.gmra.mrb[24].mxu1 %v1929_v61 }
 0x6f5   : > { %4128 = vmatpush3.xpose.msra.mxu1 %v1863_v60  ;;  %4129 = vmatprep.mubr.msk.f32.mxu1 %vm4813_vm1, %v4812_v8 }
 0x6f6   : > { %4132 = vmatprep.subr.mxu1 %v4812_v8 }
 0x6fc   : > { %4130 = vmatmul.mubr.f32.vlgmr.msra.gmra.mrb[24].mxu1 %v1930_v1 }
 0x6fd   : > { %4133 = vmatpush3.xpose.msra.mxu1 %v1941_v3  ;;  %4134 = vmatprep.mubr.msk.f32.mxu1 %vm4813_vm1, %v4812_v8 }
 0x6fe   : > { %4137 = vmatprep.subr.mxu1 %v4812_v8 }
 0x704   : > { %4135 = vmatmul.mubr.f32.vlgmr.msra.gmra.mrb[24].mxu1 %v1928_v59 }
 0x705   : > { %4138 = vmatpush3.xpose.msra.mxu1 %v1863_v60  ;;  %4139 = vmatprep.mubr.msk.f32.mxu1 %vm4813_vm1, %v4812_v8 }
 0x706   : > { %4178 = vmatprep.subr.bf16.mxu1 %v4812_v8 }
 0x70c   : > { %4140 = vmatmul.mubr.f32.vlgmr.msra.gmra.mrb[24].mxu1 %v1928_v59 }
 0x70d   : > { %4180 = vmatprep.mubr.msk.bf16.mxu1 %vm4813_vm1, %v4812_v8 }
 0x7af   : > { %v5327_v11 = vpop.f32.mrb[20].mxu1 }
 0x7b0   : > { %v4110_v13 = vpop.f32.mrb[21].mxu1 }
 0x7b1   : > { %v1851_v14 = vpop.f32.mrb[22].mxu1 }
 0x7b2   : > { %v4111_v16 = vpop.f32.mrb[23].mxu1 }
 0x7df   : > { %v2304_v17 = vpop.f32.mrb[24].mxu1 }
 0x7e0   : > { %v4141_v18 = vpop.f32.mrb[25].mxu1  ;;  %v2308_v19 = vsel %vm1340_vm4, %v2304_v17, -inf }
 0x7e1   : > { %2309 = vmax.xlane.f32.xlu0 %v2308_v19 }
 0x7f7   : > { %2834 = vrot.lane.b32.xlu0 %v5269_v25, %s4822_s30  ;;  %s3703_s30 = sshll.u32 %s636_s21, 4  ;;  %s5459_s30 = int_to_ptr.vmem [resolvable:$true] %s3703_s30 }
 0x7f8   : > { %s4715_s25 = scalar_lea.vmem %s5459_s30, 128 }
 0x7f9   : > { %p4716_p8 = scmp.ne.s32.totalorder %s5459_s30, %s4715_s25 }
 0x7fb   : > { %2882 = vrot.lane.b32.xlu0 %v5263_v21, %s4823_s14  ;;  %p4717_p5 = pnand %p4716_p8, %p5578_p11 }
 0x7fd   : > { %p4718_p0 = pneg %p4717_p5 }
 0x86e   : > { %v2310_v20 = vpop.xlane.xlu0 %2309 }
 0x86f   : > { %v2311_v22 = vsub.f32 %v2304_v17, %v2310_v20 }
 0x871   : > { %v2312_v23 = vmul.f32 1.442695, %v2311_v22 }
 0x872   : > { %v2835_v24 = vpop.permute.xlu0 %2834 }
 0x873   : > { %4473 = vpow2.f32 %v2312_v23  ;;  %v2840_v26 = vsel %vm1810_vm5, %v2835_v24, 0 }
 0x874   : > { %4179 = vmatpush3.bf16.msra.mxu1 %v2840_v26 }
 0x875   : > { %4184 = vmatprep.subr.mxu1 %v4812_v8 }
 0x876   : > { %v2883_v62 = vpop.permute.xlu0 %2882 }
 0x877   : > { %v2886_v0 = vsel %vm1340_vm4, %v2883_v62, 0 }
 0x878   : > { %v2956_v3 = vand.u32 4294901760, %v2886_v0 }
 0x87a   : > { %v2957_v6 = vsub.f32 %v2886_v0, %v2956_v3 }
 0x87c   : > { %v2958_v14 = vand.u32 4294901760, %v2957_v6 }
 0x87d   : > { %v4474_v27 = vpop.eup %4473 }
 0x87e   : > { %v2314_v28 = vsel %vm1340_vm4, %v4474_v27, 0.0 }
 0x87f   : > { %2315 = vadd.xlane.f32.xlu1 %v2314_v28 }
 0x890   : > { %2370 = vrot.lane.b32.xlu1 %v5263_v21, %s4824_s22 }
 0x90c   : > { %v2316_v30 = vpop.xlane.xlu1 %2315 }
 0x90d   : > { %4475 = vrcp.f32 %v2316_v30 }
 0x910   : > { %v2371_v32 = vpop.permute.xlu1 %2370 }
 0x911   : > { %v2374_v33 = vsel %vm1340_vm4, %v2371_v32, 0 }
 0x912   : > { %v2377_v35 = vand.u32 4294901760, %v2374_v33 }
 0x914   : > { %v2454_v38 = vsub.f32 %v2374_v33, %v2377_v35 }
 0x916   : > { %v2455_v43 = vand.u32 4294901760, %v2454_v38 }
 0x917   : > { %v4476_v37 = vpop.eup %4475 }
 0x918   : > { %v2318_v39 = vmul.f32 %v4476_v37, %v4474_v27  ;;  %v2456_v45 = vsub.f32 %v2454_v38, %v2455_v43 }
 0x91a   : > { %v2319_v42 = vpack.c.bf16 %v2318_v39, %v2318_v39  ;;  %v2457_v47 = vand.u32 4294901760, %v2456_v45 }
 0x91c   : > { %4145 = vmatmul.mubr.msk.bf16.vlgmr.msra.gmra.mrb[16].mxu0 %vm1340_vm4, %v2319_v42  ;;  %v4452_v42 = vld [vmem:[%s5510_s10 + $0x8] sm:$0xff]  }
 0x91d   : > { %4149 = vmatpush3.xpose.msra.mxu0 %v2377_v35  ;;  %4150 = vmatprep.mubr.msk.f32.mxu0 %vm4813_vm1, %v4812_v8 }
 0x91e   : > { %4153 = vmatprep.subr.mxu0 %v4812_v8 }
 0x924   : > { %4151 = vmatmul.mubr.f32.vlgmr.msra.gmra.mrb[14].mxu0 %v2446_v46 }
 0x925   : > { %4154 = vmatpush3.xpose.msra.mxu0 %v2457_v47  ;;  %4155 = vmatprep.mubr.msk.f32.mxu0 %vm4813_vm1, %v4812_v8 }
 0x926   : > { %4158 = vmatprep.subr.mxu0 %v4812_v8 }
 0x92c   : > { %4156 = vmatmul.mubr.f32.vlgmr.msra.gmra.mrb[14].mxu0 %v2442_v34 }
 0x92d   : > { %4159 = vmatpush3.xpose.msra.mxu0 %v2454_v38  ;;  %4160 = vmatprep.mubr.msk.f32.mxu0 %vm4813_vm1, %v4812_v8 }
 0x92e   : > { %4163 = vmatprep.subr.mxu0 %v4812_v8 }
 0x934   : > { %4161 = vmatmul.mubr.f32.vlgmr.msra.gmra.mrb[14].mxu0 %v2443_v36 }
 0x935   : > { %4164 = vmatpush3.xpose.msra.mxu0 %v2377_v35  ;;  %4165 = vmatprep.mubr.msk.f32.mxu0 %vm4813_vm1, %v4812_v8 }
 0x936   : > { %4168 = vmatprep.subr.mxu0 %v4812_v8 }
 0x93c   : > { %4166 = vmatmul.mubr.f32.vlgmr.msra.gmra.mrb[14].mxu0 %v2444_v41 }
 0x93d   : > { %4169 = vmatpush3.xpose.msra.mxu0 %v2455_v43  ;;  %4170 = vmatprep.mubr.msk.f32.mxu0 %vm4813_vm1, %v4812_v8 }
 0x93e   : > { %4173 = vmatprep.subr.mxu0 %v4812_v8 }
 0x944   : > { %4171 = vmatmul.mubr.f32.vlgmr.msra.gmra.mrb[14].mxu0 %v2442_v34 }
 0x945   : > { %4174 = vmatpush3.xpose.msra.mxu0 %v2377_v35  ;;  %4175 = vmatprep.mubr.msk.f32.mxu0 %vm4813_vm1, %v4812_v8 }
 0x946   : > { %4214 = vmatprep.subr.bf16.mxu0 %v4812_v8 }
 0x94c   : > { %4176 = vmatmul.mubr.f32.vlgmr.msra.gmra.mrb[14].mxu0 %v2442_v34 }
 0x94d   : > { %4216 = vmatprep.mubr.msk.bf16.mxu0 %vm4813_vm1, %v4812_v8 }
 0x9ef   : > { %v5359_v49 = vpop.f32.mrb[16].mxu0 }
 0x9f0   : > { %v4146_v51 = vpop.f32.mrb[17].mxu0 }
 0x9f1   : > { %v2365_v52 = vpop.f32.mrb[18].mxu0 }
 0x9f2   : > { %v4147_v53 = vpop.f32.mrb[19].mxu0 }
 0xa1f   : > { %v2818_v54 = vpop.f32.mrb[14].mxu0 }
 0xa20   : > { %v4177_v55 = vpop.f32.mrb[15].mxu0  ;;  %v2822_v56 = vsel %vm1340_vm4, %v2818_v54, -inf }
 0xa21   : > { %2823 = vmax.xlane.f32.xlu1 %v2822_v56  ;;  %v3882_v56 = vld [vmem:[#allocation7 + $0x1] ss:$0 sm:$0xff] }
 0xaae   : > { %v2824_v57 = vpop.xlane.xlu1 %2823 }
 0xaaf   : > { %v2825_v58 = vsub.f32 %v2818_v54, %v2824_v57  ;;  %v952_v57 = vadd.f32 %v3882_v56, %v5257_v5 }
 0xab1   : > { %v2826_v59 = vmul.f32 1.442695, %v2825_v58  ;;  %v3912_v58 = vld [vmem:[%s5511_s11] ss:$0 sm:$0xff] }
 0xab3   : > { %4477 = vpow2.f32 %v2826_v59 }
 0xabd   : > { %v4478_v60 = vpop.eup %4477 }
 0xabe   : > { %v2828_v61 = vsel %vm1340_vm4, %v4478_v60, 0.0 }
 0xabf   : > { %2829 = vadd.xlane.f32.xlu0 %v2828_v61 }
 0xad5   : > { %2884 = vrot.lane.b32.xlu0 %v5263_v21, %s4825_s24  ;;  %v2959_v21 = vsub.f32 %v2957_v6, %v2958_v14  ;;  %s5576_s24 = sld [smem:[#allocation35_spill]] }
 0xad7   : > { %v2960_v19 = vand.u32 4294901760, %v2959_v21 }
 0xb4c   : > { %v2830_v63 = vpop.xlane.xlu0 %2829 }
 0xb4d   : > { %4479 = vrcp.f32 %v2830_v63 }
 0xb50   : > { %v2885_v1 = vpop.permute.xlu0 %2884 }
 0xb51   : > { %v2888_v2 = vsel %vm1340_vm4, %v2885_v1, 0 }
 0xb52   : > { %v2891_v4 = vand.u32 4294901760, %v2888_v2 }
 0xb54   : > { %v2968_v9 = vsub.f32 %v2888_v2, %v2891_v4 }
 0xb56   : > { %v2969_v17 = vand.u32 4294901760, %v2968_v9 }
 0xb57   : > { %v4480_v7 = vpop.eup %4479 }
 0xb58   : > { %v2832_v13 = vmul.f32 %v4480_v7, %v4478_v60  ;;  %v2970_v18 = vsub.f32 %v2968_v9, %v2969_v17  ;;  %v3478_v60 = vrot.slane %v952_v57, %v5196_v12 }
 0xb5a   : > { %v2833_v16 = vpack.c.bf16 %v2832_v13, %v2832_v13  ;;  %v2971_v20 = vand.u32 4294901760, %v2970_v18  ;;  %v4454_v13 = vld [vmem:[#allocation14 + $0x8] sm:$0xff]  }
 0xb5b   : > { %v3898_v18 = vld [vmem:[#allocation7 + $0x5] ss:$0 sm:$0xff] }
 0xb5c   : > { %4181 = vmatmul.mubr.msk.bf16.vlgmr.msra.gmra.mrb[28].mxu1 %vm1340_vm4, %v2833_v16 }
 0xb5d   : > { %4185 = vmatpush3.xpose.msra.mxu1 %v2891_v4  ;;  %4186 = vmatprep.mubr.msk.f32.mxu1 %vm4813_vm1, %v4812_v8 }
 0xb5e   : > { %4189 = vmatprep.subr.mxu1 %v4812_v8 }
 0xb64   : > { %4187 = vmatmul.mubr.f32.vlgmr.msra.gmra.mrb[26].mxu1 %v2960_v19  ;;  %v3916_v19 = vld [vmem:[#allocation8 + $0x1] ss:$0 sm:$0xff] }
 0xb65   : > { %4190 = vmatpush3.xpose.msra.mxu1 %v2971_v20  ;;  %4191 = vmatprep.mubr.msk.f32.mxu1 %vm4813_vm1, %v4812_v8 }
 0xb66   : > { %4194 = vmatprep.subr.mxu1 %v4812_v8 }
 0xb6c   : > { %4192 = vmatmul.mubr.f32.vlgmr.msra.gmra.mrb[26].mxu1 %v2956_v3 }
 0xb6d   : > { %4195 = vmatpush3.xpose.msra.mxu1 %v2968_v9  ;;  %4196 = vmatprep.mubr.msk.f32.mxu1 %vm4813_vm1, %v4812_v8  ;;  %v4453_v9 = vld [vmem:[#allocation14] sm:$0xff]  }
 0xb6e   : > { %4199 = vmatprep.subr.mxu1 %v4812_v8 }
 0xb74   : > { %4197 = vmatmul.mubr.f32.vlgmr.msra.gmra.mrb[26].mxu1 %v2957_v6 }
 0xb75   : > { %4200 = vmatpush3.xpose.msra.mxu1 %v2891_v4  ;;  %4201 = vmatprep.mubr.msk.f32.mxu1 %vm4813_vm1, %v4812_v8 }
 0xb76   : > { %4204 = vmatprep.subr.mxu1 %v4812_v8 }
 0xb7c   : > { %4202 = vmatmul.mubr.f32.vlgmr.msra.gmra.mrb[26].mxu1 %v2958_v14 }
 0xb7d   : > { %4205 = vmatpush3.xpose.msra.mxu1 %v2969_v17  ;;  %4206 = vmatprep.mubr.msk.f32.mxu1 %vm4813_vm1, %v4812_v8  ;;  %v3890_v17 = vld [vmem:[#allocation7 + $0x3] ss:$0 sm:$0xff] }
 0xb7e   : > { %4209 = vmatprep.subr.mxu1 %v4812_v8  ;;  %v1092_v20 = vadd.f32 %v3890_v17, %v5259_v10  ;;  %v4456_v10 = vld [vmem:[%s5571_s27 + $0x8] sm:$0xff]  }
 0xb84   : > { %4207 = vmatmul.mubr.f32.vlgmr.msra.gmra.mrb[26].mxu1 %v2956_v3 }
 0xb85   : > { %4210 = vmatpush3.xpose.msra.mxu1 %v2891_v4  ;;  %4211 = vmatprep.mubr.msk.f32.mxu1 %vm4813_vm1, %v4812_v8 }
 0xb86   : > { %4228 = vmatprep.subr.bf16.mxu1 %v4812_v8 }
 0xb8c   : > { %4212 = vmatmul.mubr.f32.vlgmr.msra.gmra.mrb[26].mxu1 %v2956_v3 }
 0xb8d   : > { %4232 = vmatprep.mubr.msk.bf16.mxu1 %vm4813_vm1, %v4812_v8  ;;  %4229 = vmatpush3.bf16.msra.mxu1 %v4453_v9 }
 0xb8e   : > { %4230 = vmatprep.subr.bf16.mxu1 %v4812_v8 }
 0xb91   : > { %4231 = vmatpush3.bf16.msra.mxu1 %v4454_v13 }
 0xc2f   : > { %v2876_v22 = vpop.f32.mrb[28].mxu1 }
 0xc30   : > { %v4182_v23 = vpop.f32.mrb[29].mxu1 }
 0xc31   : > { %v2879_v24 = vpop.f32.mrb[30].mxu1  ;;  %v3917_v23 = vld [vmem:[#allocation10 + $0x1] ss:$0 sm:$0xff] }
 0xc32   : > { %v4183_v26 = vpop.f32.mrb[31].mxu1  ;;  %v1232_v24 = vadd.f32 %v3898_v18, %v5261_v15  ;;  %v4457_v15 = vld [vmem:[%s5571_s27 + $0x10] sm:$0xff]  }
 0xc5f   : > { %v3332_v27 = vpop.f32.mrb[26].mxu1 }
 0xc60   : > { %v4213_v28 = vpop.f32.mrb[27].mxu1  ;;  %v3336_v29 = vsel %vm1340_vm4, %v3332_v27, -inf }
 0xc61   : > { %3337 = vmax.xlane.f32.xlu0 %v3336_v29  ;;  %v3516_v29 = vrot.slane %v1232_v24, %v5196_v12 }
 0xcee   : > { %v3338_v30 = vpop.xlane.xlu0 %3337 }
 0xcef   : > { %v3339_v31 = vsub.f32 %v3332_v27, %v3338_v30  ;;  %v3511_v27 = vrot.slane %v1092_v20, %v5196_v12 }
 0xcf1   : > { %v3340_v32 = vmul.f32 1.442695, %v3339_v31 }
 0xcf3   : > { %4481 = vpow2.f32 %v3340_v32 }
 0xcfd   : > { %v4482_v33 = vpop.eup %4481 }
 0xcfe   : > { %v3342_v34 = vsel %vm1340_vm4, %v4482_v33, 0.0 }
 0xcff   : > { %3343 = vadd.xlane.f32.xlu1 %v3342_v34  ;;  %v4458_v34 = vld [vmem:[%s5571_s27 + $0x18] sm:$0xff]  }
 0xd10   : > { %3348 = vrot.lane.b32.xlu1 %v5269_v25, %s4826_s23  ;;  %v4451_v25 = vld [vmem:[%s5510_s10] sm:$0xff]   ;;  %s5457_s23 = scalar_lea.hbm %s5576_s24, %s3929_s0 }
 0xd14   : > { %3397 = vrot.lane.b32.xlu1 %v5359_v49, %s4827_s20  ;;  %s5577_s20 = smov %s5576_s24 }
 0xd18   : > { %3401 = vrot.lane.b32.xlu1 %v2876_v22, %s4828_s13  ;;  %s3690_s13 = scalar_lea.sflag [#allocation4], %s634_s15 }
 0xd8c   : > { %v3344_v35 = vpop.xlane.xlu1 %3343 }
 0xd8d   : > { %4483 = vrcp.f32 %v3344_v35  ;;  %v3918_v35 = vld [vmem:[%s5572_s28] ss:$0 sm:$0xff]  ;;  %s4830_s28 = smov [#allocation16]  }
 0xd8e   : > { %s4719_s29 = sshll.u32 %s4830_s28, 4  ;;  %s4720_s29 = int_to_ptr.vmem [resolvable:$false] %s4719_s29 }
 0xd8f   : > { %s4721_s16 = scalar_lea.vmem %s4720_s29, 256  ;;  %p4722_p6 = scmp.lt.s32.totalorder %s5459_s30, %s4720_s29 }
 0xd90   : > { %v3349_v36 = vpop.permute.xlu1 %3348  ;;  %p4723_p9 = scmp.lt.s32.totalorder %s4721_s16, %s4715_s25 }
 0xd91   : > { %v3354_v37 = vsel %vm1810_vm5, %v3349_v36, 0 }
 0xd92   : > { %4215 = vmatpush3.bf16.msra.mxu0 %v3354_v37  ;;  %p4724_p10 = por %p4723_p9, %p4722_p6 }
 0xd93   : > { %4220 = vmatprep.subr.bf16.mxu0 %v4812_v8 }
 0xd94   : > { %v3398_v47 = vpop.permute.xlu1 %3397  ;;  %p4725_p13 = pnand %p4724_p10, %p4718_p0 }
 0xd95   : > { %v3408_v51 = vsel %vm1340_vm4, %v5327_v11, %v3398_v47 }
 0xd97   : > { %v4484_v38 = vpop.eup %4483 }
 0xd98   : > { %v3346_v39 = vmul.f32 %v4484_v38, %v4482_v33  ;;  %v3402_v49 = vpop.permute.xlu1 %3401  ;;  %v4455_v33 = vld [vmem:[%s5571_s27] sm:$0xff]  }
 0xd99   : > { %v3410_v52 = vsel %vm3409_vm6, %v3408_v51, %v3402_v49 }
 0xd9a   : > { %v3347_v41 = vpack.c.bf16 %v3346_v39, %v3346_v39 }
 0xd9c   : > { %4217 = vmatmul.mubr.msk.bf16.vlgmr.msra.gmra.mrb[20].mxu0 %vm1340_vm4, %v3347_v41 }
 0xd9d   : > { %4224 = vmatprep.mubr.msk.bf16.mxu0 %vm4813_vm1, %v4812_v8  ;;  %4221 = vmatpush3.bf16.msra.mxu0 %v4451_v25 }
 0xd9e   : > { %4222 = vmatprep.subr.bf16.mxu0 %v4812_v8 }
 0xda1   : > { %4223 = vmatpush3.bf16.msra.mxu0 %v4452_v42 }
 0xda2   : > { %4236 = vmatprep.subr.bf16.mxu0 %v4812_v8 }
 0xe6f   : > { %v3390_v43 = vpop.f32.mrb[20].mxu0 }
 0xe70   : > { %3405 = vrot.lane.b32.xlu1 %v3390_v43, %s4829_s17  ;;  %v4218_v44 = vpop.f32.mrb[21].mxu0 }
 0xe71   : > { %v3393_v45 = vpop.f32.mrb[22].mxu0 }
 0xe72   : > { %v4219_v46 = vpop.f32.mrb[23].mxu0 }
 0xee2   : > { %v3406_v53 = vpop.permute.xlu1 %3405 }
 0xee3   : > { %v3412_v54 = vsel %vm3411_vm7, %v3410_v52, %v3406_v53 }
 0xee4   : > { %v3413_v55 = vpack.c.bf16 %v3412_v54, %v3412_v54 }
 0xee6   : > { %4225 = vmatmul.mubr.msk.bf16.vlgmr.msra.gmra.mrb[24].mxu0 %vm720_vm0, %v3413_v55 }
 0xee7   : > { %4244 = vmatprep.mubr.msk.bf16.mxu0 %vm4813_vm1, %v4812_v8  ;;  %4237 = vmatpush3.bf16.msra.mxu0 %v4455_v33 }
 0xee8   : > { %4238 = vmatprep.subr.bf16.mxu0 %v4812_v8 }
 0xeeb   : > { %4239 = vmatpush3.bf16.msra.mxu0 %v4456_v10 }
 0xeec   : > { %4240 = vmatprep.subr.bf16.mxu0 %v4812_v8 }
 0xeef   : > { %4241 = vmatpush3.bf16.msra.mxu0 %v4457_v15 }
 0xef0   : > { %4242 = vmatprep.subr.bf16.mxu0 %v4812_v8 }
 0xef3   : > { %4243 = vmatpush3.bf16.msra.mxu0 %v4458_v34 }
 0xfb9   : > { %v3469_v59 = vpop.f32.mrb[24].mxu0 }
 0xfba   : > { %v3470_v11 = vadd.f32 %v3912_v58, %v3469_v59  ;;  %v4226_v61 = vpop.f32.mrb[25].mxu0 }
 0xfbb   : > { %v3472_v62 = vpop.f32.mrb[26].mxu0 }
 0xfbc   : > { %v3479_v63 = vmul.f32 %v3478_v60, %v3470_v11  ;;  %v4227_v0 = vpop.f32.mrb[27].mxu0 }
 0xfbe   : > { %v5415_v1 = vadd.f32 %v3479_v63, %v5214_v50 }
 0xfc0   : > { %v3481_v2 = vsel %vm720_vm0, %v5415_v1, 0.0 }
 0xfc1   : > { %3482 = vadd.xlane.f32.xlu0 %v3481_v2 }
0x104e   : > { %v3483_v5 = vpop.xlane.xlu0 %3482 }
0x104f   : > { %v3484_v3 = vmul.f32 0.03125, %v3483_v5 }
0x1051   : > { %v3485_v4 = vsub.f32 %v5415_v1, %v3484_v3  ;;  %v3894_v3 = vld [vmem:[#allocation7 + $0x4] ss:$0 sm:$0xff] }
0x1053   : > { %v3486_v6 = vmul.f32 %v3485_v4, %v3485_v4 }
0x1055   : > { %v3487_v7 = vsel %vm720_vm0, %v3486_v6, 0.0  ;;  %v3922_v6 = vld [vmem:[%s5574_s26] ss:$0 sm:$0xff] }
0x1056   : > { %3488 = vadd.xlane.f32.xlu1 %v3487_v7 }
0x10e3   : > { %v3489_v50 = vpop.xlane.xlu1 %3488 }
0x10e4   : > { %v3490_v14 = vmul.f32 0.03125, %v3489_v50 }
0x10e6   : > { %v3491_v16 = vadd.f32 1e-05, %v3490_v14 }
0x10e8   : > { %4485 = vrsqrt.f32 %v3491_v16 }
0x10f2   : > { %v4486_v21 = vpop.eup %4485 }
0x10f3   : > { %v3493_v22 = vmul.f32 %v4486_v21, %v3485_v4  ;;  %v1161_v4 = vadd.f32 %v3894_v3, %v5243_v48 }
0x10f5   : > { %v3500_v26 = vmul.f32 %v3916_v19, %v3493_v22 }
0x10f7   : > { %v3507_v28 = vadd.f32 %v3917_v23, %v3500_v26 }
0x10f9   : > { %v3512_v30 = vmul.f32 %v3511_v27, %v3507_v28 }
0x10fb   : > { %v3517_v31 = vadd.f32 %v3516_v29, %v3512_v30 }
0x10fd   : > { %v3518_v32 = vpack.c.bf16 %v3517_v31, %v3517_v31 }
0x10ff   : > { %4233 = vmatmul.mubr.msk.bf16.vlgmr.msra.gmra.mrb[32].mxu1 %vm720_vm0, %v3518_v32 }
0x11d2   : > { %v3574_v36 = vpop.f32.mrb[32].mxu1 }
0x11d3   : > { %v3575_v37 = vadd.f32 %v3918_v35, %v3574_v36  ;;  %v4234_v38 = vpop.f32.mrb[33].mxu1 }
0x11d4   : > { %v3577_v39 = vpop.f32.mrb[34].mxu1 }
0x11d5   : > { %v3581_v41 = vmul.f32 0.70710677, %v3575_v37  ;;  %v4235_v25 = vpop.f32.mrb[35].mxu1  ;;  %v3580_v63 = vmul.f32 0.5, %v3575_v37 }
0x11d7   : > { %v3584_v42 = vand.u32 2147483647, %v3581_v41  ;;  %vm3582_vm8 = vcmp.ge.f32.partialorder %v3581_v41, 0.0 }
0x11d8   : > { %v3583_v61 = vsel %vm3582_vm8, 1.0, %v4814_v40  ;;  %v3685_v40 = vrot.slane %v1161_v4, %v5196_v12 }
0x11d9   : > { %v3585_v43 = vmul.f32 0.3275911, %v3584_v42  ;;  %v3598_v8 = vsub.f32 0.0, %v3584_v42 }
0x11db   : > { %v3586_v44 = vadd.f32 1.0, %v3585_v43  ;;  %v3599_v46 = vmul.f32 %v3598_v8, %v3584_v42 }
0x11dd   : > { %4487 = vrcp.f32 %v3586_v44  ;;  %v3600_v51 = vmul.f32 1.442695, %v3599_v46 }
0x11df   : > { %4489 = vpow2.f32 %v3600_v51 }
0x11e7   : > { %v4488_v45 = vpop.eup %4487 }
0x11e8   : > { %v3589_v47 = vmul.f32 1.0614054, %v4488_v45 }
0x11e9   : > { %v4490_v59 = vpop.eup %4489 }
0x11ea   : > { %v3590_v49 = vadd.f32 -1.4531521, %v3589_v47 }
0x11ec   : > { %v3591_v52 = vmul.f32 %v4488_v45, %v3590_v49 }
0x11ee   : > { %v3592_v53 = vadd.f32 1.4214138, %v3591_v52 }
0x11f0   : > { %v3593_v54 = vmul.f32 %v4488_v45, %v3592_v53 }
0x11f2   : > { %v3594_v55 = vadd.f32 -0.28449672, %v3593_v54 }
0x11f4   : > { %v3595_v56 = vmul.f32 %v4488_v45, %v3594_v55 }
0x11f6   : > { %v3596_v57 = vadd.f32 0.2548296, %v3595_v56 }
0x11f8   : > { %v3597_v58 = vmul.f32 %v4488_v45, %v3596_v57 }
0x11fa   : > { %v3602_v60 = vmul.f32 %v4490_v59, %v3597_v58 }
0x11fc   : > { %v3603_v11 = vsub.f32 1.0, %v3602_v60 }
0x11fe   : > { %v3604_v62 = vmul.f32 %v3603_v11, %v3583_v61 }
0x1200   : > { %v3605_v0 = vadd.f32 1.0, %v3604_v62 }
0x1202   : > { %v3606_v2 = vmul.f32 %v3605_v0, %v3580_v63 }
0x1204   : > { %v3607_v5 = vpack.c.bf16 %v3606_v2, %v3606_v2 }
0x1206   : > { %4245 = vmatmul.mubr.msk.bf16.vlgmr.msra.gmra.mrb[28].mxu0 %vm3638_vm9, %v3607_v5 }
0x12d9   : > { %v3676_v7 = vpop.f32.mrb[28].mxu0 }
0x12da   : > { %v3677_v9 = vadd.f32 %v3922_v6, %v3676_v7  ;;  %v4246_v13 = vpop.f32.mrb[29].mxu0 }
0x12db   : > { %v3679_v50 = vpop.f32.mrb[30].mxu0 }
0x12dc   : > { %v3686_v14 = vmul.f32 %v3685_v40, %v3677_v9  ;;  %v4247_v16 = vpop.f32.mrb[31].mxu0 }
0x12de   : > { %v3687_v17 = vadd.f32 %v3686_v14, %v5415_v1 }
0x12e0   : > { %3688 = vst.msk [vmem:[%s636_s21] sm:$0xff] %vm720_vm0, %v3687_v17 }
0x12e1   : > { %4728 = shalt.err (!%p4725_p13)
}
0x12e2   : > { %s4729_s15 = scalar_lea.hbm %s5457_s23, 128  ;;  %s4733_s26 = scalar_lea.hbm %s5577_s20, 256 }
0x12e3   : > { %p4730_p12 = scmp.ne.s32.totalorder %s5457_s23, %s4729_s15  ;;  %p4734_p3 = scmp.lt.u32.totalorder %s5457_s23, %s5577_s20 }
0x12e4   : > { %p4735_p4 = scmp.lt.u32.totalorder %s4733_s26, %s4729_s15  ;;  %p4737_p8 = scmp.lt.u32.totalorder %s4729_s15, %s5457_s23 }
0x12e5   : > { %p4731_p1 = pnand %p4730_p12, %p5578_p11 }
0x12e6   : > { %p4736_p7 = por %p4735_p4, %p4734_p3 }
0x12e7   : > { %p4732_p2 = pneg %p4731_p1 }
0x12e8   : > { %p4738_p5 = por %p4737_p8, %p4736_p7 }
0x12ea   : > { %p4739_p0 = pnand %p4738_p5, %p4732_p2 }
0x12ec   : > { %4742 = shalt.err (!%p4739_p0)
}
0x12ed   : > { %4320 = dma.vmem_to_hbm [thread:$0]  (%p5578_p11), %s5459_s30, 128, %s5457_s23, %s3690_s13  }
0x12ee PF: > { %s5579_s14 = sld [smem:[#allocation26_spill]]  ;;  %s5580_s22 = sld [smem:[#allocation23_spill]] }
0x12ef   : > { %s5581_s24 = sld [smem:[#allocation30_spill]] }
0x12f4   : > { %p4367_p6 = scmp.ge.s32.totalorder %s5579_s14, 2  ;;  %s3715_s25 = sand.u32 1, %s5580_s22  }
0x12f5   : > { %p5582_p9 = scmp.ne.s32.totalorder %s5581_s24, 0  ;;  %s3716_s28 = scalar_lea.sflag [#allocation4], %s3715_s25 }
0x12f7   : > { %p4348_p10 = pnand %p4367_p6, %p5582_p9 }
0x12f9   : > { %4780 = dma.done.wait (!%p4348_p10), %s3716_s28, 128  }
0x12fa   : > { %4782 = vsyncadd (!%p4348_p10), %s3716_s28, 4294967168  ;;  %s5583_s24 = sld [smem:[#allocation27_spill]]  ;;  %s5584_s21 = sld [smem:[#allocation24_spill]] }
0x12fb   : > { %s5585_s22 = sld [smem:[#allocation25_spill]]  ;;  %s5586_s23 = sld [smem:[#allocation28_spill]] }
0x1300   : > { %p31_p13 = scmp.ge.s32.totalorder %s5583_s24, 4  }
0x1302   :  { %33 = sbr.rel (!%p31_p13) target bundleno = 14 (0xe), region = 167 }
0x1309   :  { %3721 = vsyncpa [#allocation3], 1 }
0x130a   :  { %3723 = vsyncpa [#allocation3 + $0x1], 1 }
0x130b   :  { %3724 = vsyncpa [#allocation6], 1 }
0x130c   :  { %3725 = vsyncpa [#allocation9], 1 }
0x130d   :  { %3726 = vsyncpa [#allocation12], 1 }
0x130e   :  { %3727 = vsyncpa [#allocation15], 1 }
0x130f   :  { %3728 = vsyncpa [#allocation4], 1 }
0x1310   :  { %3730 = vsyncpa [#allocation4 + $0x1], 1 }

// kernel: tpu_custom_call.1
= control target key start
LH: loop header
LB: loop body
LE: loop exit
PB: predicated region body
PF: predicated region fallthrough
CT: control target
= control target key end

     0   :  { %s5500_s0 = inlined_call_operand.vmem [shape: f32[2,8,32], index: 0, kind: input, shape index: {}]   ;;  %s5501_s1 = inlined_call_operand.vmem [shape: f32[2,1,32], index: 1, kind: input, shape index: {}]   ;;  %s5502_s2 = inlined_call_operand.vmem [shape: bf16[32,192], index: 2, kind: input, shape index: {}]   ;;  %s5503_s3 = inlined_call_operand.hbm [shape: f32[1,192], index: 3, kind: input, shape index: {}]   ;;  %s5504_s4 = inlined_call_operand.hbm [shape: bf16[6,32,32], index: 4, kind: input, shape index: {}]   ;;  %s5505_s5 = inlined_call_operand.hbm [shape: f32[6,1,32], index: 5, kind: input, shape index: {}]   ;;  %s5506_s6 = inlined_call_operand.hbm [shape: f32[2,1,32], index: 6, kind: input, shape index: {}]   ;;  %s5507_s7 = inlined_call_operand.hbm [shape: f32[2,1,32], index: 7, kind: input, shape index: {}]   ;;  %s5508_s8 = inlined_call_operand.hbm [shape: bf16[32,96], index: 8, kind: input, shape index: {}]   ;;  %s5509_s9 = inlined_call_operand.hbm [shape: f32[1,96], index: 9, kind: input, shape index: {}]   ;;  %s5510_s10 = inlined_call_operand.vmem [shape: bf16[32,32], index: 10, kind: input, shape index: {}]   ;;  %s5511_s11 = inlined_call_operand.vmem [shape: f32[1,32], index: 11, kind: input, shape index: {}]   ;;  %s5512_s12 = inlined_call_operand.hbm [shape: bf16[32,64], index: 12, kind: input, shape index: {}]   ;;  %s5513_s13 = inlined_call_operand.vmem [shape: f32[1,64], index: 13, kind: input, shape index: {}]   ;;  %s5514_s14 = inlined_call_operand.vmem [shape: bf16[64,32], index: 14, kind: input, shape index: {}]   ;;  %s5515_s15 = inlined_call_operand.vmem [shape: f32[1,32], index: 15, kind: input, shape index: {}]   ;;  %s5516_s16 = inlined_call_operand.hbm [shape: f32[2,8,32], index: 16, kind: output, shape index: {}]  }
   0x1   :  { %5537 = sst [smem:[#allocation31_spill]] %s5500_s0 }
   0x2   :  { %5538 = sst [smem:[#allocation32_spill]] %s5513_s13 }
   0x3   :  { %5539 = sst [smem:[#allocation33_spill]] %s5514_s14 }
   0x4   :  { %5540 = sst [smem:[#allocation34_spill]] %s5515_s15 }
   0x5   :  { %5541 = sst [smem:[#allocation35_spill]] %s5516_s16 }
   0x6   :  { %21 = vsyncpa [#allocation3], 0 }
   0x7   :  { %22 = vsyncpa [#allocation6], 0 }
   0x8   :  { %23 = vsyncpa [#allocation9], 0 }
   0x9   :  { %24 = vsyncpa [#allocation12], 0 }
   0xa   :  { %25 = vsyncpa [#allocation15], 0 }
   0xb   :  { %26 = vsyncpa [#allocation4], 0 }
   0xc   :  { %28 = vsyncpa [#allocation4 + $0x1], 0  ;;  %s4916_s21 = smov 0   ;;  %s4918_s22 = smov 0  }
   0xd   :  { %s4920_s23 = smov 0   ;;  %s4922_s24 = smov 0  }
   0xe LB: > { %5542 = sst [smem:[#allocation23_spill]] %s4785_s21  ;;  %s4937_s25 = sadd.s32 4294967295, %s4797_s24   ;;  %s4797_s24 = sphi %s4922_s24, %s5583_s24   ;;  %s4793_s23 = sphi %s4920_s23, %s5586_s23   ;;  %s4789_s22 = sphi %s4918_s22, %s5585_s22   ;;  %s4785_s21 = sphi %s4916_s21, %s5584_s21  }
   0xf   : > { %5543 = sst [smem:[#allocation24_spill]] %s4789_s22  ;;  %s3850_s26 = sadd.s32 4294967294, %s4797_s24  }
  0x10   : > { %5544 = sst [smem:[#allocation25_spill]] %s4793_s23  ;;  %s4941_s27 = sadd.s32 1, %s4797_s24  }
  0x11   : > { %5545 = sst [smem:[#allocation26_spill]] %s4797_s24  ;;  %s387_s28 = sadd.s32 1, %s4793_s23 }
  0x12   : > { %5546 = sst [smem:[#allocation27_spill]] %s4941_s27  ;;  %s384_s29 = ssub.s32 %s4797_s24, %s4941_s27 }
  0x13   : > { %p397_p0 = scmp.ne.s32.totalorder %s4793_s23, %s4789_s22  ;;  %p385_p1 = scmp.eq.s32.totalorder %s384_s29, 0 }
  0x14   : > { %p398_p2 = scmp.eq.s32.totalorder %s4937_s25, 1  ;;  %p403_p3 = scmp.ne.s32.totalorder %s4789_s22, %s4785_s21 }
  0x15   : > { %p404_p4 = scmp.eq.s32.totalorder %s3850_s26, 1  ;;  %p3851_p7 = scmp.ge.s32.totalorder %s4797_s24, 1 }
  0x16   : > { %s4952_s30 = scalar_select %p385_p1, %s4793_s23, %s387_s28  }
  0x17   : > { %p4954_p5 = por %p398_p2, %p397_p0  ;;  %p4958_p6 = por %p404_p4, %p403_p3 }
  0x18   : > { %5547 = sst [smem:[#allocation28_spill]] %s4952_s30  ;;  %p411_p8 = scmp.lt.s32.totalorder %s4797_s24, 3 }
  0x19   : > { %s5548_s0 = scalar_select %p4954_p5, 1, 0 }
  0x1a   : > { %s5550_s17 = scalar_select %p4958_p6, 1, 0 }
  0x1b   : > { %5549 = sst [smem:[#allocation29_spill]] %s5548_s0  ;;  %p5524_p9 = scmp.eq.s32.totalorder %s4937_s25, 0 }
  0x1c   : > { %5551 = sst [smem:[#allocation30_spill]] %s5550_s17  ;;  %p4965_p10 = pnand %p3851_p7, %p411_p8 }
  0x1d   : > { %s4799_s19 = smov [#allocation5]   ;;  %s4800_s28 = smov [#allocation8]  }
  0x1e   : > { %s5552_s18 = scalar_select %p4965_p10, 1, 0 }
  0x1f   : > { %s437_s20 = sshll.u32 %s4799_s19, 4  ;;  %p4322_p11 = pneg %p4965_p10  ;;  %s438_s20 = int_to_ptr.vmem [resolvable:$true] %s437_s20 }
  0x20   : > { %s463_s29 = sshll.u32 %s4800_s28, 4  ;;  %s4491_s27 = scalar_lea.hbm %s5504_s4, 1536  ;;  %s464_s29 = int_to_ptr.vmem [resolvable:$true] %s463_s29 }
  0x21   : > { %p4973_p12 = pnand %p5524_p9, %p4322_p11  ;;  %p4492_p13 = scmp.ne.s32.totalorder %s5504_s4, %s4491_s27 }
  0x22   : > { %p4498_p3 = scmp.lt.u32.totalorder %s4491_s27, %s5504_s4 }
  0x23   : > { %p4985_p0 = pneg %p4973_p12 }
  0x25   : > { %p4494_p1 = pnand %p4985_p0, %p4492_p13 }
  0x27   : > { %p4495_p2 = pneg %p4494_p1 }
  0x29   : > { %p4500_p4 = pnand %p4498_p3, %p4495_p2 }
  0x2b   : > { %4503 = shalt.err (!%p4500_p4)
}
  0x2c   : > { %s4504_s23 = scalar_lea.vmem %s438_s20, 1536  ;;  %p4512_p9 = scmp.lt.s32.totalorder %s438_s20, %s438_s20 }
  0x2d   : > { %p4505_p7 = scmp.ne.s32.totalorder %s438_s20, %s4504_s23  ;;  %p4513_p6 = scmp.lt.s32.totalorder %s4504_s23, %s4504_s23 }
  0x2f   : > { %p4507_p8 = pnand %p4505_p7, %p4985_p0  ;;  %p4514_p5 = por %p4513_p6, %p4512_p9 }
  0x31   : > { %p4508_p11 = pneg %p4507_p8 }
  0x33   : > { %p4515_p10 = pnand %p4514_p5, %p4508_p11 }
  0x35   : > { %4518 = shalt.err (!%p4515_p10)
}
  0x36   : > { %s5535_s21 = smov 64   ;;  %s5536_s30 = smov 4  }
  0x37   : > { %4328 = dma.hbm_to_vmem [thread:$0]  (!%p4973_p12), %s5504_s4, 1536, %s438_s20, [#allocation6], %s5535_s21, %s5535_s21, %s5536_s30  }
  0x38   : > { %s4803_s27 = smov [#allocation11]   ;;  %s4519_s0 = scalar_lea.hbm %s5506_s6, 32 }
  0x39   : > { %s489_s17 = sshll.u32 %s4803_s27, 4  ;;  %p4520_p5 = scmp.ne.s32.totalorder %s5506_s6, %s4519_s0  ;;  %s490_s17 = int_to_ptr.vmem [resolvable:$true] %s489_s17 }
  0x3a   : > { %p4526_p10 = scmp.lt.u32.totalorder %s4519_s0, %s5506_s6 }
  0x3b   : > { %p4522_p6 = pnand %p4520_p5, %p4985_p0 }
  0x3d   : > { %p4523_p9 = pneg %p4522_p6 }
  0x3f   : > { %p4528_p13 = pnand %p4526_p10, %p4523_p9 }
  0x41   : > { %4531 = shalt.err (!%p4528_p13)
}
  0x42   : > { %s4532_s20 = scalar_lea.vmem %s464_s29, 32  ;;  %p4540_p4 = scmp.lt.s32.totalorder %s464_s29, %s464_s29 }
  0x43   : > { %p4533_p1 = scmp.ne.s32.totalorder %s464_s29, %s4532_s20  ;;  %p4541_p7 = scmp.lt.s32.totalorder %s4532_s20, %s4532_s20 }
  0x45   : > { %p4535_p2 = pnand %p4533_p1, %p4985_p0  ;;  %p4542_p8 = por %p4541_p7, %p4540_p4 }
  0x47   : > { %p4536_p3 = pneg %p4535_p2 }
  0x49   : > { %p4543_p11 = pnand %p4542_p8, %p4536_p3 }
  0x4b   : > { %4546 = shalt.err (!%p4543_p11)
}
  0x4c   : > { %s5531_s15 = smov 16   ;;  %s5533_s22 = smov 1  }
  0x4d   : > { %4334 = dma.hbm_to_vmem [thread:$0]  (!%p4973_p12), %s5506_s6, 32, %s464_s29, [#allocation9], %s5531_s15, %s5531_s15, %s5533_s22  }
  0x4e   : > { %s4547_s24 = scalar_lea.hbm %s5508_s8, 256 }
  0x4f   : > { %p4548_p5 = scmp.ne.s32.totalorder %s5508_s8, %s4547_s24  ;;  %p4554_p10 = scmp.lt.u32.totalorder %s4547_s24, %s5508_s8 }
  0x51   : > { %p4550_p6 = pnand %p4548_p5, %p4985_p0 }
  0x53   : > { %p4551_p9 = pneg %p4550_p6 }
  0x55   : > { %p4556_p13 = pnand %p4554_p10, %p4551_p9 }
  0x57   : > { %4559 = shalt.err (!%p4556_p13)
}
  0x58   : > { %s4560_s13 = scalar_lea.vmem %s490_s17, 256  ;;  %p4568_p4 = scmp.lt.s32.totalorder %s490_s17, %s490_s17 }
  0x59   : > { %p4561_p1 = scmp.ne.s32.totalorder %s490_s17, %s4560_s13  ;;  %p4569_p7 = scmp.lt.s32.totalorder %s4560_s13, %s4560_s13 }
  0x5b   : > { %p4563_p2 = pnand %p4561_p1, %p4985_p0  ;;  %p4570_p8 = por %p4569_p7, %p4568_p4 }
  0x5d   : > { %p4564_p3 = pneg %p4563_p2 }
  0x5f   : > { %p4571_p11 = pnand %p4570_p8, %p4564_p3 }
  0x61   : > { %4574 = shalt.err (!%p4571_p11)
}
  0x62   : > { %4340 = dma.hbm_to_vmem [thread:$0]  (!%p4973_p12), %s5508_s8, 256, %s490_s17, [#allocation12], %s5535_s21, %s5535_s21, %s5536_s30  }
  0x63   : > { %s4806_s0 = smov [#allocation2]   ;;  %s4807_s24 = smov [#allocation7]  }
  0x64   : > { %s427_s16 = sshll.u32 %s4806_s0, 4  ;;  %s450_s27 = sshll.u32 %s4807_s24, 4  ;;  %s428_s16 = int_to_ptr.vmem [resolvable:$true] %s427_s16  ;;  %s451_s27 = int_to_ptr.vmem [resolvable:$true] %s450_s27 }
  0x65   : > { %s4575_s20 = scalar_lea.hbm %s5503_s3, 32 }
  0x66   : > { %p4576_p5 = scmp.ne.s32.totalorder %s5503_s3, %s4575_s20  ;;  %p4582_p10 = scmp.lt.u32.totalorder %s4575_s20, %s5503_s3 }
  0x68   : > { %p4578_p6 = pnand %p4576_p5, %p4985_p0 }
  0x6a   : > { %p4579_p9 = pneg %p4578_p6 }
  0x6c   : > { %p4584_p13 = pnand %p4582_p10, %p4579_p9 }
  0x6e   : > { %4587 = shalt.err (!%p4584_p13)
}
  0x6f   : > { %s4588_s17 = scalar_lea.vmem %s428_s16, 32  ;;  %p4596_p4 = scmp.lt.s32.totalorder %s428_s16, %s428_s16 }
  0x70   : > { %p4589_p1 = scmp.ne.s32.totalorder %s428_s16, %s4588_s17  ;;  %p4597_p7 = scmp.lt.s32.totalorder %s4588_s17, %s4588_s17 }
  0x72   : > { %p4591_p2 = pnand %p4589_p1, %p4985_p0  ;;  %p4598_p8 = por %p4597_p7, %p4596_p4 }
  0x74   : > { %p4592_p3 = pneg %p4591_p2 }
  0x76   : > { %p4599_p11 = pnand %p4598_p8, %p4592_p3 }
  0x78   : > { %4602 = shalt.err (!%p4599_p11)
}
  0x79   : > { %4325 = dma.hbm_to_vmem [thread:$0]  (!%p4973_p12), %s5503_s3, 32, %s428_s16, [#allocation3]  }
  0x7a   : > { %s4603_s24 = scalar_lea.hbm %s5505_s5, 96 }
  0x7b   : > { %p4604_p5 = scmp.ne.s32.totalorder %s5505_s5, %s4603_s24  ;;  %p4610_p10 = scmp.lt.u32.totalorder %s4603_s24, %s5505_s5 }
  0x7d   : > { %p4606_p6 = pnand %p4604_p5, %p4985_p0 }
  0x7f   : > { %p4607_p9 = pneg %p4606_p6 }
  0x81   : > { %p4612_p13 = pnand %p4610_p10, %p4607_p9 }
  0x83   : > { %4615 = shalt.err (!%p4612_p13)
}
  0x84   : > { %s4616_s29 = scalar_lea.vmem %s451_s27, 96  ;;  %p4624_p4 = scmp.lt.s32.totalorder %s451_s27, %s451_s27 }
  0x85   : > { %p4617_p1 = scmp.ne.s32.totalorder %s451_s27, %s4616_s29  ;;  %p4625_p7 = scmp.lt.s32.totalorder %s4616_s29, %s4616_s29 }
  0x87   : > { %p4619_p2 = pnand %p4617_p1, %p4985_p0  ;;  %p4626_p8 = por %p4625_p7, %p4624_p4 }
  0x89   : > { %p4620_p3 = pneg %p4619_p2 }
  0x8b   : > { %p4627_p11 = pnand %p4626_p8, %p4620_p3 }
  0x8d   : > { %4630 = shalt.err (!%p4627_p11)
}
  0x8e   : > { %s5555_s16 = smov 1   ;;  %s5556_s17 = smov 16  }
  0x8f   : > { %4331 = dma.hbm_to_vmem [thread:$0]  (!%p4973_p12), %s5505_s5, 96, %s451_s27, [#allocation6], %s5556_s17, %s5556_s17, %s5555_s16  }
  0x90   : > { %s4808_s22 = smov [#allocation10]   ;;  %s4809_s24 = smov [#allocation13]  }
  0x91   : > { %s476_s0 = sshll.u32 %s4808_s22, 4  ;;  %s503_s28 = sshll.u32 %s4809_s24, 4  ;;  %s477_s0 = int_to_ptr.vmem [resolvable:$true] %s476_s0  ;;  %s504_s28 = int_to_ptr.vmem [resolvable:$true] %s503_s28 }
  0x92   : > { %s4631_s13 = scalar_lea.hbm %s5507_s7, 32 }
  0x93   : > { %p4632_p5 = scmp.ne.s32.totalorder %s5507_s7, %s4631_s13  ;;  %p4638_p10 = scmp.lt.u32.totalorder %s4631_s13, %s5507_s7 }
  0x95   : > { %p4634_p6 = pnand %p4632_p5, %p4985_p0 }
  0x97   : > { %p4635_p9 = pneg %p4634_p6 }
  0x99   : > { %p4640_p13 = pnand %p4638_p10, %p4635_p9 }
  0x9b   : > { %4643 = shalt.err (!%p4640_p13)
}
  0x9c   : > { %s4644_s27 = scalar_lea.vmem %s477_s0, 32  ;;  %p4652_p4 = scmp.lt.s32.totalorder %s477_s0, %s477_s0 }
  0x9d   : > { %p4645_p1 = scmp.ne.s32.totalorder %s477_s0, %s4644_s27  ;;  %p4653_p7 = scmp.lt.s32.totalorder %s4644_s27, %s4644_s27 }
  0x9f   : > { %p4647_p2 = pnand %p4645_p1, %p4985_p0  ;;  %p4654_p8 = por %p4653_p7, %p4652_p4 }
  0xa1   : > { %p4648_p3 = pneg %p4647_p2 }
  0xa3   : > { %p4655_p11 = pnand %p4654_p8, %p4648_p3 }
  0xa5   : > { %4658 = shalt.err (!%p4655_p11)
}
  0xa6   : > { %4337 = dma.hbm_to_vmem [thread:$0]  (!%p4973_p12), %s5507_s7, 32, %s477_s0, [#allocation9], %s5556_s17, %s5556_s17, %s5555_s16  }
  0xa7   : > { %s4659_s24 = scalar_lea.hbm %s5509_s9, 16 }
  0xa8   : > { %p4660_p5 = scmp.ne.s32.totalorder %s5509_s9, %s4659_s24  ;;  %p4666_p10 = scmp.lt.u32.totalorder %s4659_s24, %s5509_s9 }
  0xaa   : > { %p4662_p6 = pnand %p4660_p5, %p4985_p0 }
  0xac   : > { %p4663_p9 = pneg %p4662_p6 }
  0xae   : > { %p4668_p13 = pnand %p4666_p10, %p4663_p9 }
  0xb0   : > { %4671 = shalt.err (!%p4668_p13)
}
  0xb1   : > { %s4672_s15 = scalar_lea.vmem %s504_s28, 16  ;;  %s4679_s16 = scalar_lea.vmem %s504_s28, 32 }
  0xb2   : > { %p4673_p1 = scmp.ne.s32.totalorder %s504_s28, %s4672_s15  ;;  %p4680_p4 = scmp.lt.s32.totalorder %s504_s28, %s504_s28 }
  0xb3   : > { %p4681_p7 = scmp.lt.s32.totalorder %s4679_s16, %s4672_s15 }
  0xb4   : > { %p4675_p2 = pnand %p4673_p1, %p4985_p0 }
  0xb5   : > { %p4682_p8 = por %p4681_p7, %p4680_p4 }
  0xb6   : > { %p4676_p3 = pneg %p4675_p2 }
  0xb8   : > { %p4683_p11 = pnand %p4682_p8, %p4676_p3 }
  0xba   : > { %4686 = shalt.err (!%p4683_p11)
}
  0xbb   : > { %4343 = dma.hbm_to_vmem [thread:$0]  (!%p4973_p12), %s5509_s9, 16, %s504_s28, [#allocation12]  }
  0xbc   : > { %s4810_s27 = smov [#allocation14]   ;;  %s4687_s22 = scalar_lea.hbm %s5512_s12, 256 }
  0xbd   : > { %s519_s21 = sshll.u32 %s4810_s27, 4  ;;  %p4688_p5 = scmp.ne.s32.totalorder %s5512_s12, %s4687_s22  ;;  %s520_s21 = int_to_ptr.vmem [resolvable:$true] %s519_s21 }
  0xbe   : > { %p4694_p10 = scmp.lt.u32.totalorder %s4687_s22, %s5512_s12 }
  0xbf   : > { %p4690_p6 = pnand %p4688_p5, %p4985_p0 }
  0xc1   : > { %p4691_p9 = pneg %p4690_p6 }
  0xc3   : > { %p4696_p13 = pnand %p4694_p10, %p4691_p9 }
  0xc5   : > { %4699 = shalt.err (!%p4696_p13)
}
  0xc6   : > { %s4700_s28 = scalar_lea.vmem %s520_s21, 256  ;;  %p4708_p4 = scmp.lt.s32.totalorder %s520_s21, %s520_s21 }
  0xc7   : > { %p4701_p1 = scmp.ne.s32.totalorder %s520_s21, %s4700_s28  ;;  %p4709_p7 = scmp.lt.s32.totalorder %s4700_s28, %s4700_s28 }
  0xc9   : > { %p4703_p2 = pnand %p4701_p1, %p4985_p0  ;;  %p4710_p8 = por %p4709_p7, %p4708_p4 }
  0xcb   : > { %p4704_p3 = pneg %p4703_p2 }
  0xcd   : > { %p4711_p11 = pnand %p4710_p8, %p4704_p3 }
  0xcf   : > { %4714 = shalt.err (!%p4711_p11)
}
  0xd0   : > { %s5557_s29 = smov 4   ;;  %s5558_s15 = smov 64  }
  0xd1   : > { %4346 = dma.hbm_to_vmem [thread:$0]  (!%p4973_p12), %s5512_s12, 256, %s520_s21, [#allocation15], %s5558_s15, %s5558_s15, %s5557_s29  }
  0xd2   : > { %p5559_p5 = scmp.ne.s32.totalorder %s5552_s18, 0 }
  0xd3   : > { %p5560_p0 = scmp.eq.s32.totalorder (!%p5559_p5), %s4937_s25, 0 }
  0xd4   : > { %557 = sbr.rel (%p5559_p5) target bundleno = 4846 (0x12ee), region = 84 }
  0xdb   : > { %4760 = dma.done.wait (%p5560_p0), [#allocation3], 32   ;;  %p5561_p6 = pmov %p5560_p0 }
  0xdc   : > { %p5562_p9 = pmov %p5560_p0 }
  0xdd   : > { %4762 = vsyncadd (%p5561_p6), [#allocation3], 4294967264 }
  0xde   : > { %4764 = dma.done.wait (%p5562_p9), [#allocation6], 1632   ;;  %p5563_p10 = pmov %p5560_p0 }
  0xdf   : > { %p5564_p13 = pmov %p5560_p0 }
  0xe0   : > { %4766 = vsyncadd (%p5563_p10), [#allocation6], 4294965664 }
  0xe1   : > { %4768 = dma.done.wait (%p5564_p13), [#allocation9], 64   ;;  %p5565_p12 = pmov %p5560_p0 }
  0xe2   : > { %p5566_p1 = pmov %p5560_p0 }
  0xe3   : > { %4770 = vsyncadd (%p5565_p12), [#allocation9], 4294967232 }
  0xe4   : > { %4772 = dma.done.wait (%p5566_p1), [#allocation12], 272   ;;  %p5567_p2 = pmov %p5560_p0 }
  0xe5   : > { %p5568_p3 = pmov %p5560_p0 }
  0xe6   : > { %4774 = vsyncadd (%p5567_p2), [#allocation12], 4294967024 }
  0xe7   : > { %4776 = dma.done.wait (%p5568_p3), [#allocation15], 256   ;;  %p5569_p4 = pmov %p5560_p0 }
  0xe8   : > { %p637_p7 = scmp.lt.s32.totalorder %s4937_s25, 1  ;;  %v4811_v0 = vmov 0   ;;  %v4431_v1 = vld [vmem:[%s5502_s2 + $0x4] ss:$8 sps:$4 sm:$0xff]   ;;  %v4433_v2 = vld [vmem:[%s5502_s2] ss:$8 sps:$4 sm:$0xff]   ;;  %v690_v10 = vlaneseq }
  0xe9   : > { %4778 = vsyncadd (%p5569_p4), [#allocation15], 4294967040  ;;  %756 = vmatprep.mubr.bf16.mxu1 %v4811_v0  ;;  %724 = vmatprep.subr.bf16.mxu1 %v4431_v1  ;;  %v4434_v3 = vld [vmem:[%s5502_s2 + $0x14] ss:$8 sps:$4 sm:$0xff]   ;;  %v4436_v4 = vld [vmem:[%s5502_s2 + $0x10] ss:$8 sps:$4 sm:$0xff]  }
  0xea   : > { %s5169_s18 = scalar_select %p637_p7, %s4937_s25, 1  ;;  %vm720_vm0 = vcmask 261120   ;;  %725 = vmatpush1.bf16.msra.mxu1 %v4433_v2  ;;  %v4437_v7 = vld [vmem:[#allocation5] sm:$0xff]   ;;  %v4812_v8 = vmov 0.0   ;;  %v4438_v9 = vld [vmem:[#allocation5 + $0x8] sm:$0xff]   ;;  %vm4813_vm1 = vmmov 0  }
  0xeb   : > { %726 = vmatprep.subr.bf16.mxu1 %v4434_v3  ;;  %4028 = vmatprep.subr.bf16.mxu0 %v4812_v8  ;;  %v691_v11 = vshrl.u32 %v690_v10, 7  ;;  %v649_v13 = vld [vmem:[#allocation2] sm:$0x3]  ;;  %v4814_v40 = vmov -1.0   ;;  %v4439_v46 = vld [vmem:[#allocation5 + $0x20] sm:$0xff]   ;;  %s4815_s13 = smov 64  }
  0xec   : > { %s643_s21 = scalar_lea.vmem %s5501_s1, %s5169_s18  ;;  %4032 = vmatprep.mubr.msk.bf16.mxu0 %vm4813_vm1, %v4812_v8  ;;  %v4440_v48 = vld [vmem:[#allocation5 + $0x28] sm:$0xff]   ;;  %s3871_s28 = sshll.u32 %s5169_s18, 3  ;;  %vm1340_vm4 = vcmask 64512   ;;  %vm1810_vm5 = vcmask 1043456   ;;  %vm3409_vm6 = vcmask 130048   ;;  %vm3411_vm7 = vcmask 195584  }
  0xed   : > { %v3872_v5 = vld [vmem:[%s643_s21] ss:$0 sm:$0xff]  ;;  %v5196_v12 = vsub.s32 0, %v691_v11  ;;  %s5570_s16 = sld [smem:[#allocation31_spill]]  ;;  %v696_v49 = vsub.s32 1, %v691_v11  ;;  %s4816_s18 = smov 96  }
  0xee   : > { %v688_v6 = vpack.c.bf16 %v3872_v5, %v3872_v5  ;;  %727 = vmatpush1.bf16.msra.mxu1 %v4436_v4  ;;  %v4443_v4 = vld [vmem:[#allocation5 + $0x10] sm:$0xff]   ;;  %s4817_s26 = smov 32   ;;  %s4818_s19 = smov 120   ;;  %vm3638_vm9 = vcmask 523264  }
  0xef   : > { %4020 = vmatprep.subr.bf16.mxu1 %v4812_v8  ;;  %v693_v14 = vrot.slane %v649_v13, %v5196_v12  ;;  %v697_v51 = vrot.slane %v649_v13, %v696_v49  ;;  %4029 = vmatpush3.bf16.msra.mxu0 %v4443_v4  ;;  %s4819_s0 = smov 56   ;;  %s4820_s27 = smov 112  }
  0xf0   : > { %4030 = vmatprep.subr.bf16.mxu0 %v4812_v8  ;;  %s4821_s21 = smov 88   ;;  %s4822_s30 = smov 48  }
  0xf1   : > { %3877 = vmatmul.mubr.msk.bf16.vlgmr.msra.gmra.mrb[0].mxu1 %vm720_vm0, %v688_v6  ;;  %s4823_s14 = smov 104   ;;  %s4824_s22 = smov 80  }
  0xf2   : > { %4021 = vmatpush3.bf16.msra.mxu1 %v4437_v7  ;;  %4024 = vmatprep.mubr.msk.bf16.mxu1 %vm4813_vm1, %v4812_v8  ;;  %s4825_s24 = smov 72   ;;  %s4826_s23 = smov 40  }
  0xf3   : > { %4022 = vmatprep.subr.bf16.mxu1 %v4812_v8  ;;  %s640_s17 = scalar_lea.vmem %s5570_s16, %s3871_s28  ;;  %s4827_s20 = smov 8  }
  0xf4   : > { %v5214_v50 = vld [vmem:[%s640_s17] sm:$0xff]  ;;  %s4829_s17 = smov 24   ;;  %s5572_s28 = sld [smem:[#allocation32_spill]] }
  0xf5   : > { %v1237_v52 = vsel %vm720_vm0, %v5214_v50, 0.0  ;;  %s5573_s29 = sld [smem:[#allocation24_spill]] }
  0xf6   : > { %4023 = vmatpush3.bf16.msra.mxu1 %v4438_v9 }
  0xf7   : > { %4036 = vmatprep.subr.bf16.mxu1 %v4812_v8 }
  0xfb   : > { %s634_s15 = sand.u32 1, %s5573_s29  }
  0xfc   : > { %s3870_s16 = sshll.u32 %s634_s15, 3 }
 0x1c4   : > { %v758_v15 = vpop.f32.mrb[0].mxu1 }
 0x1c5   : > { %v759_v16 = vadd.f32 %v758_v15, %v693_v14  ;;  %v760_v17 = vpop.f32.mrb[1].mxu1  ;;  %v4441_v15 = vld [vmem:[#allocation5 + $0x40] sm:$0xff]  }
 0x1c6   : > { %v762_v18 = vpop.f32.mrb[2].mxu1  ;;  %v761_v53 = vadd.f32 %v760_v17, %v697_v51  ;;  %v4448_v51 = vld [vmem:[#allocation5 + $0x58] sm:$0xff]  }
 0x1c7   : > { %v767_v19 = vmul.f32 0.70710677, %v759_v16  ;;  %v763_v20 = vpop.f32.mrb[3].mxu1  ;;  %v765_v43 = vmul.f32 0.5, %v759_v16 }
 0x1c8   : > { %v768_v54 = vmul.f32 0.70710677, %v761_v53  ;;  %v766_v18 = vmul.f32 0.5, %v761_v53  ;;  %v3902_v53 = vld [vmem:[#allocation8] ss:$0 sm:$0xff] }
 0x1c9   : > { %v773_v21 = vand.u32 2147483647, %v767_v19  ;;  %vm769_vm2 = vcmp.ge.f32.partialorder %v767_v19, 0.0  ;;  %v4442_v19 = vld [vmem:[#allocation5 + $0x48] sm:$0xff]  }
 0x1ca   : > { %v771_v41 = vsel %vm769_vm2, 1.0, %v4814_v40  ;;  %v774_v55 = vand.u32 2147483647, %v768_v54  ;;  %vm770_vm3 = vcmp.ge.f32.partialorder %v768_v54, 0.0  ;;  %v3886_v54 = vld [vmem:[#allocation7 + $0x2] ss:$0 sm:$0xff] }
 0x1cb   : > { %v775_v22 = vmul.f32 0.3275911, %v773_v21  ;;  %v801_v24 = vsub.f32 0.0, %v773_v21  ;;  %v772_v13 = vsel %vm770_vm3, 1.0, %v4814_v40 }
 0x1cc   : > { %v776_v56 = vmul.f32 0.3275911, %v774_v55  ;;  %v802_v63 = vsub.f32 0.0, %v774_v55 }
 0x1cd   : > { %v777_v23 = vadd.f32 1.0, %v775_v22  ;;  %v803_v26 = vmul.f32 %v801_v24, %v773_v21 }
 0x1ce   : > { %v778_v57 = vadd.f32 1.0, %v776_v56  ;;  %v804_v1 = vmul.f32 %v802_v63, %v774_v55 }
 0x1cf   : > { %4459 = vrcp.f32 %v777_v23  ;;  %v805_v29 = vmul.f32 1.442695, %v803_v26 }
 0x1d0   : > { %v807_v3 = vmul.f32 1.442695, %v804_v1 }
 0x1d1   : > { %4461 = vpow2.f32 %v805_v29 }
 0x1d2   : > { %4463 = vrcp.f32 %v778_v57 }
 0x1d3   : > { %4465 = vpow2.f32 %v807_v3 }
 0x1d9   : > { %v4460_v25 = vpop.eup %4459 }
 0x1da   : > { %v783_v27 = vmul.f32 1.0614054, %v4460_v25 }
 0x1db   : > { %v4462_v37 = vpop.eup %4461 }
 0x1dc   : > { %v785_v28 = vadd.f32 -1.4531521, %v783_v27  ;;  %v4464_v58 = vpop.eup %4463  ;;  %v4444_v27 = vld [vmem:[#allocation5 + $0x18] sm:$0xff]  }
 0x1dd   : > { %v784_v59 = vmul.f32 1.0614054, %v4464_v58  ;;  %v4466_v9 = vpop.eup %4465  ;;  %4031 = vmatpush3.bf16.msra.mxu0 %v4444_v27 }
 0x1de   : > { %v787_v30 = vmul.f32 %v4460_v25, %v785_v28  ;;  %4044 = vmatprep.subr.bf16.mxu0 %v4812_v8 }
 0x1df   : > { %v786_v60 = vadd.f32 -1.4531521, %v784_v59  ;;  %v3903_v59 = vld [vmem:[#allocation10] ss:$0 sm:$0xff] }
 0x1e0   : > { %v789_v31 = vadd.f32 1.4214138, %v787_v30  ;;  %v4449_v30 = vld [vmem:[#allocation11] sm:$0xff]  }
 0x1e1   : > { %v788_v61 = vmul.f32 %v4464_v58, %v786_v60 }
 0x1e2   : > { %v791_v32 = vmul.f32 %v4460_v25, %v789_v31 }
 0x1e3   : > { %v790_v62 = vadd.f32 1.4214138, %v788_v61 }
 0x1e4   : > { %v793_v33 = vadd.f32 -0.28449672, %v791_v32 }
 0x1e5   : > { %v792_v0 = vmul.f32 %v4464_v58, %v790_v62 }
 0x1e6   : > { %v795_v34 = vmul.f32 %v4460_v25, %v793_v33  ;;  %v4450_v33 = vld [vmem:[#allocation11 + $0x8] sm:$0xff]  }
 0x1e7   : > { %v794_v2 = vadd.f32 -0.28449672, %v792_v0 }
 0x1e8   : > { %v797_v35 = vadd.f32 0.2548296, %v795_v34 }
 0x1e9   : > { %v796_v5 = vmul.f32 %v4464_v58, %v794_v2 }
 0x1ea   : > { %v799_v36 = vmul.f32 %v4460_v25, %v797_v35 }
 0x1eb   : > { %v798_v6 = vadd.f32 0.2548296, %v796_v5 }
 0x1ec   : > { %v809_v38 = vmul.f32 %v4462_v37, %v799_v36  ;;  %v4445_v36 = vld [vmem:[#allocation5 + $0x30] sm:$0xff]  }
 0x1ed   : > { %v800_v7 = vmul.f32 %v4464_v58, %v798_v6 }
 0x1ee   : > { %v811_v39 = vsub.f32 1.0, %v809_v38 }
 0x1ef   : > { %v810_v10 = vmul.f32 %v4466_v9, %v800_v7 }
 0x1f0   : > { %v813_v42 = vmul.f32 %v811_v39, %v771_v41 }
 0x1f1   : > { %v812_v11 = vsub.f32 1.0, %v810_v10 }
 0x1f2   : > { %v815_v44 = vadd.f32 1.0, %v813_v42  ;;  %v4446_v42 = vld [vmem:[#allocation5 + $0x38] sm:$0xff]  }
 0x1f3   : > { %v814_v14 = vmul.f32 %v812_v11, %v772_v13 }
 0x1f4   : > { %v817_v45 = vmul.f32 %v815_v44, %v765_v43 }
 0x1f5   : > { %v816_v16 = vadd.f32 1.0, %v814_v14 }
 0x1f6   : > { %v5200_v47 = vpack.c.bf16 %v817_v45, %v817_v45  ;;  %v4447_v45 = vld [vmem:[#allocation5 + $0x50] sm:$0xff]  }
 0x1f7   : > { %v818_v20 = vmul.f32 %v816_v16, %v766_v18 }
 0x1f8   : > { %970 = vrot.lane.b32.xlu0 %v5200_v47, %s4815_s13  ;;  %4025 = vmatmul.mubr.msk.bf16.vlgmr.msra.gmra.mrb[4].mxu1 %vm720_vm0, %v5200_v47 }
 0x1f9   : > { %4037 = vmatpush3.bf16.msra.mxu1 %v4439_v46  ;;  %4040 = vmatprep.mubr.msk.bf16.mxu1 %vm4813_vm1, %v4812_v8  ;;  %v1102_v21 = vpack.c.bf16 %v818_v20, %v818_v20 }
 0x1fa   : > { %4038 = vmatprep.subr.bf16.mxu1 %v4812_v8 }
 0x1fd   : > { %4039 = vmatpush3.bf16.msra.mxu1 %v4440_v48 }
 0x1fe   : > { %4052 = vmatprep.subr.bf16.mxu1 %v4812_v8 }
 0x217   : > { %1238 = vadd.xlane.f32.xlu0 %v1237_v52 }
 0x26a   : > { %v971_v17 = vpop.permute.xlu0 %970 }
 0x26b   : > { %4041 = vmatmul.mubr.msk.bf16.vlgmr.msra.gmra.mrb[8].mxu1 %vm720_vm0, %v971_v17 }
 0x26c   : > { %4053 = vmatpush3.bf16.msra.mxu1 %v4441_v15  ;;  %4056 = vmatprep.mubr.msk.bf16.mxu1 %vm4813_vm1, %v4812_v8 }
 0x26d   : > { %4054 = vmatprep.subr.bf16.mxu1 %v4812_v8 }
 0x270   : > { %4055 = vmatpush3.bf16.msra.mxu1 %v4442_v19  ;;  %v3904_v19 = vld [vmem:[#allocation13] ss:$0 sm:$0xff] }
 0x271   : > { %4068 = vmatprep.subr.bf16.mxu1 %v4812_v8 }
 0x273   : > { %4057 = vmatmul.mubr.msk.bf16.vlgmr.msra.gmra.mrb[12].mxu1 %vm720_vm0, %v1102_v21 }
 0x274   : > { %4072 = vmatprep.mubr.msk.bf16.mxu1 %vm4813_vm1, %v4812_v8  ;;  %4069 = vmatpush3.bf16.msra.mxu1 %v4449_v30 }
 0x275   : > { %4070 = vmatprep.subr.bf16.mxu1 %v4812_v8 }
 0x278   : > { %4071 = vmatpush3.bf16.msra.mxu1 %v4450_v33 }
 0x279   : > { %4106 = vmatprep.subr.bf16.mxu1 %v4812_v8 }
 0x2a4   : > { %v1239_v22 = vpop.xlane.xlu0 %1238 }
 0x2a5   : > { %v1241_v23 = vmul.f32 0.03125, %v1239_v22 }
 0x2a7   : > { %v1242_v24 = vsub.f32 %v5214_v50, %v1241_v23 }
 0x2a9   : > { %v1243_v25 = vmul.f32 %v1242_v24, %v1242_v24 }
 0x2ab   : > { %v1244_v26 = vsel %vm720_vm0, %v1243_v25, 0.0 }
 0x2ac   : > { %1245 = vadd.xlane.f32.xlu1 %v1244_v26 }
 0x2bd   : > { %900 = vrot.lane.b32.xlu1 %v5200_v47, %s4816_s18 }
 0x2c1   : > { %1040 = vrot.lane.b32.xlu1 %v5200_v47, %s4817_s26  ;;  %v3878_v47 = vld [vmem:[#allocation7] ss:$0 sm:$0xff]  ;;  %s5574_s26 = sld [smem:[#allocation34_spill]] }
 0x2c5   : > { %1180 = vrot.lane.b32.xlu1 %v1102_v21, %s4816_s18 }
 0x2cb   : > { %v880_v28 = vpop.f32.mrb[4].mxu1 }
 0x2cc   : > { %v4026_v29 = vpop.f32.mrb[5].mxu1  ;;  %v881_v56 = vadd.f32 %v3878_v47, %v880_v28 }
 0x2cd   : > { %v883_v31 = vpop.f32.mrb[6].mxu1 }
 0x2ce   : > { %v4027_v32 = vpop.f32.mrb[7].mxu1  ;;  %v1268_v62 = vrot.slane %v881_v56, %v5196_v12 }
 0x339   : > { %v1246_v34 = vpop.xlane.xlu1 %1245 }
 0x33a   : > { %v1247_v35 = vmul.f32 0.03125, %v1246_v34 }
 0x33c   : > { %v1248_v37 = vadd.f32 1e-05, %v1247_v35 }
 0x33d   : > { %v901_v38 = vpop.permute.xlu1 %900 }
 0x33e   : > { %4467 = vrsqrt.f32 %v1248_v37  ;;  %4033 = vmatmul.mubr.msk.bf16.vlgmr.msra.gmra.mrb[0].mxu0 %vm720_vm0, %v901_v38  ;;  %v1021_v39 = vpop.f32.mrb[8].mxu1 }
 0x33f   : > { %v4042_v41 = vpop.f32.mrb[9].mxu1  ;;  %4045 = vmatpush3.bf16.msra.mxu0 %v4445_v36  ;;  %4048 = vmatprep.mubr.msk.bf16.mxu0 %vm4813_vm1, %v4812_v8  ;;  %v1022_v60 = vadd.f32 %v3886_v54, %v1021_v39 }
 0x340   : > { %v1024_v43 = vpop.f32.mrb[10].mxu1  ;;  %4046 = vmatprep.subr.bf16.mxu0 %v4812_v8 }
 0x341   : > { %v4043_v44 = vpop.f32.mrb[11].mxu1  ;;  %v1041_v46 = vpop.permute.xlu1 %1040  ;;  %v1273_v2 = vrot.slane %v1022_v60, %v5196_v12 }
 0x343   : > { %4047 = vmatpush3.bf16.msra.mxu0 %v4446_v42 }
 0x344   : > { %4060 = vmatprep.subr.bf16.mxu0 %v4812_v8 }
 0x345   : > { %v1181_v0 = vpop.permute.xlu1 %1180 }
 0x346   : > { %4049 = vmatmul.mubr.msk.bf16.vlgmr.msra.gmra.mrb[4].mxu0 %vm720_vm0, %v1041_v46  ;;  %v5243_v48 = vpop.f32.mrb[12].mxu1 }
 0x347   : > { %v4058_v49 = vpop.f32.mrb[13].mxu1  ;;  %4061 = vmatpush3.bf16.msra.mxu0 %v4447_v45  ;;  %4064 = vmatprep.mubr.msk.bf16.mxu0 %vm4813_vm1, %v4812_v8 }
 0x348   : > { %v4468_v52 = vpop.eup %4467  ;;  %v1163_v55 = vpop.f32.mrb[14].mxu1  ;;  %4062 = vmatprep.subr.bf16.mxu0 %v4812_v8 }
 0x349   : > { %v1250_v57 = vmul.f32 %v4468_v52, %v1242_v24  ;;  %v4059_v58 = vpop.f32.mrb[15].mxu1 }
 0x34b   : > { %v1257_v61 = vmul.f32 %v3902_v53, %v1250_v57  ;;  %4063 = vmatpush3.bf16.msra.mxu0 %v4448_v51 }
 0x34c   : > { %4076 = vmatprep.subr.mxu0 %v4812_v8 }
 0x34d   : > { %v1264_v63 = vadd.f32 %v3903_v59, %v1257_v61 }
 0x34e   : > { %4065 = vmatmul.mubr.msk.bf16.vlgmr.msra.gmra.mrb[8].mxu0 %vm720_vm0, %v1181_v0 }
 0x34f   : > { %v1269_v1 = vmul.f32 %v1268_v62, %v1264_v63  ;;  %4078 = vmatprep.mubr.msk.f32.mxu0 %vm4813_vm1, %v4812_v8 }
 0x351   : > { %v1274_v3 = vadd.f32 %v1273_v2, %v1269_v1 }
 0x353   : > { %v1275_v4 = vpack.c.bf16 %v1274_v3, %v1274_v3 }
 0x355   : > { %4073 = vmatmul.mubr.msk.bf16.vlgmr.msra.gmra.mrb[16].mxu1 %vm720_vm0, %v1275_v4 }
 0x356   : > { %4108 = vmatprep.mubr.msk.bf16.mxu1 %vm4813_vm1, %v4812_v8 }
 0x411   : > { %v5257_v5 = vpop.f32.mrb[0].mxu0 }
 0x412   : > { %v4034_v6 = vpop.f32.mrb[1].mxu0 }
 0x413   : > { %v954_v7 = vpop.f32.mrb[2].mxu0 }
 0x414   : > { %v4035_v9 = vpop.f32.mrb[3].mxu0 }
 0x419   : > { %v5259_v10 = vpop.f32.mrb[4].mxu0 }
 0x41a   : > { %v4050_v11 = vpop.f32.mrb[5].mxu0 }
 0x41b   : > { %v1094_v13 = vpop.f32.mrb[6].mxu0 }
 0x41c   : > { %v4051_v14 = vpop.f32.mrb[7].mxu0 }
 0x421   : > { %v5261_v15 = vpop.f32.mrb[8].mxu0 }
 0x422   : > { %v4066_v16 = vpop.f32.mrb[9].mxu0 }
 0x423   : > { %v1234_v17 = vpop.f32.mrb[10].mxu0 }
 0x424   : > { %v4067_v18 = vpop.f32.mrb[11].mxu0 }
 0x428   : > { %v1331_v20 = vpop.f32.mrb[16].mxu1 }
 0x429   : > { %v5263_v21 = vadd.f32 %v3904_v19, %v1331_v20  ;;  %v4074_v22 = vpop.f32.mrb[17].mxu1 }
 0x42a   : > { %v1334_v23 = vpop.f32.mrb[18].mxu1 }
 0x42b   : > { %1338 = vrot.lane.b32.xlu1 %v5263_v21, %s4816_s18  ;;  %v4075_v24 = vpop.f32.mrb[19].mxu1  ;;  %v5269_v25 = vpack.c.bf16 %v5263_v21, %v5263_v21  ;;  %v1341_v26 = vsel %vm1340_vm4, %v5263_v21, 0 }
 0x42c   : > { %v1411_v27 = vand.u32 4294901760, %v1341_v26 }
 0x42d   : > { %1805 = vrot.lane.b32.xlu0 %v5269_v25, %s4815_s13  ;;  %s4828_s13 = smov 16  }
 0x42e   : > { %v1412_v28 = vsub.f32 %v1341_v26, %v1411_v27 }
 0x430   : > { %v1413_v29 = vand.u32 4294901760, %v1412_v28 }
 0x431   : > { %1854 = vrot.lane.b32.xlu0 %v5263_v21, %s4818_s19  ;;  %s5575_s19 = sld [smem:[#allocation29_spill]] }
 0x432   : > { %v1414_v32 = vsub.f32 %v1412_v28, %v1413_v29 }
 0x434   : > { %v1415_v37 = vand.u32 4294901760, %v1414_v32 }
 0x437   : > { %p5578_p11 = scmp.ne.s32.totalorder %s5575_s19, 0 }
 0x49d   : > { %v1339_v30 = vpop.permute.xlu1 %1338 }
 0x49e   : > { %v1343_v31 = vsel %vm1340_vm4, %v1339_v30, 0 }
 0x49f   : > { %v1346_v33 = vand.u32 4294901760, %v1343_v31  ;;  %v1806_v34 = vpop.permute.xlu0 %1805 }
 0x4a0   : > { %v1812_v35 = vsel %vm1810_vm5, %v1806_v34, 0 }
 0x4a1   : > { %v1423_v36 = vsub.f32 %v1343_v31, %v1346_v33  ;;  %4077 = vmatpush3.xpose.msra.mxu0 %v1346_v33  ;;  %4107 = vmatpush3.bf16.msra.mxu1 %v1812_v35 }
 0x4a2   : > { %4081 = vmatprep.subr.mxu0 %v4812_v8  ;;  %4112 = vmatprep.subr.mxu1 %v4812_v8 }
 0x4a3   : > { %v1424_v38 = vand.u32 4294901760, %v1423_v36  ;;  %v1855_v54 = vpop.permute.xlu0 %1854 }
 0x4a4   : > { %4079 = vmatmul.mubr.f32.vlgmr.msra.gmra.mrb[12].mxu0 %v1415_v37  ;;  %v1858_v56 = vsel %vm1340_vm4, %v1855_v54, 0 }
 0x4a5   : > { %v1425_v39 = vsub.f32 %v1423_v36, %v1424_v38  ;;  %4083 = vmatprep.mubr.msk.f32.mxu0 %vm4813_vm1, %v4812_v8  ;;  %v1928_v59 = vand.u32 4294901760, %v1858_v56 }
 0x4a7   : > { %v1426_v41 = vand.u32 4294901760, %v1425_v39  ;;  %v1929_v61 = vsub.f32 %v1858_v56, %v1928_v59 }
 0x4a9   : > { %4082 = vmatpush3.xpose.msra.mxu0 %v1426_v41  ;;  %v1930_v1 = vand.u32 4294901760, %v1929_v61 }
 0x4aa   : > { %4086 = vmatprep.subr.mxu0 %v4812_v8 }
 0x4ab   : > { %v1931_v4 = vsub.f32 %v1929_v61, %v1930_v1 }
 0x4ac   : > { %4084 = vmatmul.mubr.f32.vlgmr.msra.gmra.mrb[12].mxu0 %v1411_v27 }
 0x4ad   : > { %4087 = vmatpush3.xpose.msra.mxu0 %v1423_v36  ;;  %4088 = vmatprep.mubr.msk.f32.mxu0 %vm4813_vm1, %v4812_v8  ;;  %v1932_v7 = vand.u32 4294901760, %v1931_v4 }
 0x4ae   : > { %4091 = vmatprep.subr.mxu0 %v4812_v8 }
 0x4b4   : > { %4089 = vmatmul.mubr.f32.vlgmr.msra.gmra.mrb[12].mxu0 %v1412_v28 }
 0x4b5   : > { %4092 = vmatpush3.xpose.msra.mxu0 %v1346_v33  ;;  %4093 = vmatprep.mubr.msk.f32.mxu0 %vm4813_vm1, %v4812_v8 }
 0x4b6   : > { %4096 = vmatprep.subr.mxu0 %v4812_v8 }
 0x4bc   : > { %4094 = vmatmul.mubr.f32.vlgmr.msra.gmra.mrb[12].mxu0 %v1413_v29 }
 0x4bd   : > { %4097 = vmatpush3.xpose.msra.mxu0 %v1424_v38  ;;  %4098 = vmatprep.mubr.msk.f32.mxu0 %vm4813_vm1, %v4812_v8 }
 0x4be   : > { %4101 = vmatprep.subr.mxu0 %v4812_v8 }
 0x4c4   : > { %4099 = vmatmul.mubr.f32.vlgmr.msra.gmra.mrb[12].mxu0 %v1411_v27 }
 0x4c5   : > { %4102 = vmatpush3.xpose.msra.mxu0 %v1346_v33  ;;  %4103 = vmatprep.mubr.msk.f32.mxu0 %vm4813_vm1, %v4812_v8 }
 0x4c6   : > { %4142 = vmatprep.subr.bf16.mxu0 %v4812_v8 }
 0x4cc   : > { %4104 = vmatmul.mubr.f32.vlgmr.msra.gmra.mrb[12].mxu0 %v1411_v27 }
 0x4cd   : > { %4144 = vmatprep.mubr.msk.bf16.mxu0 %vm4813_vm1, %v4812_v8 }
 0x59f   : > { %v1787_v42 = vpop.f32.mrb[12].mxu0 }
 0x5a0   : > { %v4105_v43 = vpop.f32.mrb[13].mxu0  ;;  %v1791_v44 = vsel %vm1340_vm4, %v1787_v42, -inf }
 0x5a1   : > { %1792 = vmax.xlane.f32.xlu1 %v1791_v44 }
 0x5b2   : > { %2320 = vrot.lane.b32.xlu1 %v5269_v25, %s4819_s0  ;;  %s3929_s0 = sshll.u32 %s4937_s25, 7 }
 0x5b6   : > { %2368 = vrot.lane.b32.xlu1 %v5263_v21, %s4820_s27  ;;  %s5571_s27 = sld [smem:[#allocation33_spill]] }
 0x62e   : > { %v1793_v45 = vpop.xlane.xlu1 %1792 }
 0x62f   : > { %v1794_v46 = vsub.f32 %v1787_v42, %v1793_v45 }
 0x631   : > { %v1795_v47 = vmul.f32 1.442695, %v1794_v46 }
 0x632   : > { %v2321_v49 = vpop.permute.xlu1 %2320 }
 0x633   : > { %4469 = vpow2.f32 %v1795_v47  ;;  %v2326_v51 = vsel %vm1810_vm5, %v2321_v49, 0 }
 0x634   : > { %4143 = vmatpush3.bf16.msra.mxu0 %v2326_v51 }
 0x635   : > { %4148 = vmatprep.subr.mxu0 %v4812_v8 }
 0x636   : > { %v2369_v29 = vpop.permute.xlu1 %2368 }
 0x637   : > { %v2372_v31 = vsel %vm1340_vm4, %v2369_v29, 0 }
 0x638   : > { %v2442_v34 = vand.u32 4294901760, %v2372_v31 }
 0x63a   : > { %v2443_v36 = vsub.f32 %v2372_v31, %v2442_v34 }
 0x63c   : > { %v2444_v41 = vand.u32 4294901760, %v2443_v36 }
 0x63d   : > { %v4470_v52 = vpop.eup %4469 }
 0x63e   : > { %v1797_v53 = vsel %vm1340_vm4, %v4470_v52, 0.0  ;;  %v2445_v44 = vsub.f32 %v2443_v36, %v2444_v41 }
 0x63f   : > { %1798 = vadd.xlane.f32.xlu0 %v1797_v53 }
 0x640   : > { %v2446_v46 = vand.u32 4294901760, %v2445_v44 }
 0x655   : > { %1856 = vrot.lane.b32.xlu0 %v5263_v21, %s4821_s21  ;;  %s636_s21 = scalar_lea.vmem [#allocation16], %s3870_s16 }
 0x6cc   : > { %v1799_v55 = vpop.xlane.xlu0 %1798 }
 0x6cd   : > { %4471 = vrcp.f32 %v1799_v55 }
 0x6d0   : > { %v1857_v57 = vpop.permute.xlu0 %1856 }
 0x6d1   : > { %v1860_v58 = vsel %vm1340_vm4, %v1857_v57, 0 }
 0x6d2   : > { %v1863_v60 = vand.u32 4294901760, %v1860_v58 }
 0x6d4   : > { %v1940_v63 = vsub.f32 %v1860_v58, %v1863_v60 }
 0x6d6   : > { %v1941_v3 = vand.u32 4294901760, %v1940_v63 }
 0x6d7   : > { %v4472_v62 = vpop.eup %4471 }
 0x6d8   : > { %v1801_v0 = vmul.f32 %v4472_v62, %v4470_v52  ;;  %v1942_v6 = vsub.f32 %v1940_v63, %v1941_v3 }
 0x6da   : > { %v1802_v2 = vpack.c.bf16 %v1801_v0, %v1801_v0  ;;  %v1943_v9 = vand.u32 4294901760, %v1942_v6 }
 0x6dc   : > { %4109 = vmatmul.mubr.msk.bf16.vlgmr.msra.gmra.mrb[20].mxu1 %vm1340_vm4, %v1802_v2 }
 0x6dd   : > { %4113 = vmatpush3.xpose.msra.mxu1 %v1863_v60  ;;  %4114 = vmatprep.mubr.msk.f32.mxu1 %vm4813_vm1, %v4812_v8 }
 0x6de   : > { %4117 = vmatprep.subr.mxu1 %v4812_v8 }
 0x6e4   : > { %4115 = vmatmul.mubr.f32.vlgmr.msra.gmra.mrb[24].mxu1 %v1932_v7 }
 0x6e5   : > { %4118 = vmatpush3.xpose.msra.mxu1 %v1943_v9  ;;  %4119 = vmatprep.mubr.msk.f32.mxu1 %vm4813_vm1, %v4812_v8 }
 0x6e6   : > { %4122 = vmatprep.subr.mxu1 %v4812_v8 }
 0x6ec   : > { %4120 = vmatmul.mubr.f32.vlgmr.msra.gmra.mrb[24].mxu1 %v1928_v59 }
 0x6ed   : > { %4123 = vmatpush3.xpose.msra.mxu1 %v1940_v63  ;;  %4124 = vmatprep.mubr.msk.f32.mxu1 %vm4813_vm1, %v4812_v8 }
 0x6ee   : > { %4127 = vmatprep.subr.mxu1 %v4812_v8 }
 0x6f4   : > { %4125 = vmatmul.mubr.f32.vlgmr.msra.gmra.mrb[24].mxu1 %v1929_v61 }
 0x6f5   : > { %4128 = vmatpush3.xpose.msra.mxu1 %v1863_v60  ;;  %4129 = vmatprep.mubr.msk.f32.mxu1 %vm4813_vm1, %v4812_v8 }
 0x6f6   : > { %4132 = vmatprep.subr.mxu1 %v4812_v8 }
 0x6fc   : > { %4130 = vmatmul.mubr.f32.vlgmr.msra.gmra.mrb[24].mxu1 %v1930_v1 }
 0x6fd   : > { %4133 = vmatpush3.xpose.msra.mxu1 %v1941_v3  ;;  %4134 = vmatprep.mubr.msk.f32.mxu1 %vm4813_vm1, %v4812_v8 }
 0x6fe   : > { %4137 = vmatprep.subr.mxu1 %v4812_v8 }
 0x704   : > { %4135 = vmatmul.mubr.f32.vlgmr.msra.gmra.mrb[24].mxu1 %v1928_v59 }
 0x705   : > { %4138 = vmatpush3.xpose.msra.mxu1 %v1863_v60  ;;  %4139 = vmatprep.mubr.msk.f32.mxu1 %vm4813_vm1, %v4812_v8 }
 0x706   : > { %4178 = vmatprep.subr.bf16.mxu1 %v4812_v8 }
 0x70c   : > { %4140 = vmatmul.mubr.f32.vlgmr.msra.gmra.mrb[24].mxu1 %v1928_v59 }
 0x70d   : > { %4180 = vmatprep.mubr.msk.bf16.mxu1 %vm4813_vm1, %v4812_v8 }
 0x7af   : > { %v5327_v11 = vpop.f32.mrb[20].mxu1 }
 0x7b0   : > { %v4110_v13 = vpop.f32.mrb[21].mxu1 }
 0x7b1   : > { %v1851_v14 = vpop.f32.mrb[22].mxu1 }
 0x7b2   : > { %v4111_v16 = vpop.f32.mrb[23].mxu1 }
 0x7df   : > { %v2304_v17 = vpop.f32.mrb[24].mxu1 }
 0x7e0   : > { %v4141_v18 = vpop.f32.mrb[25].mxu1  ;;  %v2308_v19 = vsel %vm1340_vm4, %v2304_v17, -inf }
 0x7e1   : > { %2309 = vmax.xlane.f32.xlu0 %v2308_v19 }
 0x7f7   : > { %2834 = vrot.lane.b32.xlu0 %v5269_v25, %s4822_s30  ;;  %s3703_s30 = sshll.u32 %s636_s21, 4  ;;  %s5459_s30 = int_to_ptr.vmem [resolvable:$true] %s3703_s30 }
 0x7f8   : > { %s4715_s25 = scalar_lea.vmem %s5459_s30, 128 }
 0x7f9   : > { %p4716_p8 = scmp.ne.s32.totalorder %s5459_s30, %s4715_s25 }
 0x7fb   : > { %2882 = vrot.lane.b32.xlu0 %v5263_v21, %s4823_s14  ;;  %p4717_p5 = pnand %p4716_p8, %p5578_p11 }
 0x7fd   : > { %p4718_p0 = pneg %p4717_p5 }
 0x86e   : > { %v2310_v20 = vpop.xlane.xlu0 %2309 }
 0x86f   : > { %v2311_v22 = vsub.f32 %v2304_v17, %v2310_v20 }
 0x871   : > { %v2312_v23 = vmul.f32 1.442695, %v2311_v22 }
 0x872   : > { %v2835_v24 = vpop.permute.xlu0 %2834 }
 0x873   : > { %4473 = vpow2.f32 %v2312_v23  ;;  %v2840_v26 = vsel %vm1810_vm5, %v2835_v24, 0 }
 0x874   : > { %4179 = vmatpush3.bf16.msra.mxu1 %v2840_v26 }
 0x875   : > { %4184 = vmatprep.subr.mxu1 %v4812_v8 }
 0x876   : > { %v2883_v62 = vpop.permute.xlu0 %2882 }
 0x877   : > { %v2886_v0 = vsel %vm1340_vm4, %v2883_v62, 0 }
 0x878   : > { %v2956_v3 = vand.u32 4294901760, %v2886_v0 }
 0x87a   : > { %v2957_v6 = vsub.f32 %v2886_v0, %v2956_v3 }
 0x87c   : > { %v2958_v14 = vand.u32 4294901760, %v2957_v6 }
 0x87d   : > { %v4474_v27 = vpop.eup %4473 }
 0x87e   : > { %v2314_v28 = vsel %vm1340_vm4, %v4474_v27, 0.0 }
 0x87f   : > { %2315 = vadd.xlane.f32.xlu1 %v2314_v28 }
 0x890   : > { %2370 = vrot.lane.b32.xlu1 %v5263_v21, %s4824_s22 }
 0x90c   : > { %v2316_v30 = vpop.xlane.xlu1 %2315 }
 0x90d   : > { %4475 = vrcp.f32 %v2316_v30 }
 0x910   : > { %v2371_v32 = vpop.permute.xlu1 %2370 }
 0x911   : > { %v2374_v33 = vsel %vm1340_vm4, %v2371_v32, 0 }
 0x912   : > { %v2377_v35 = vand.u32 4294901760, %v2374_v33 }
 0x914   : > { %v2454_v38 = vsub.f32 %v2374_v33, %v2377_v35 }
 0x916   : > { %v2455_v43 = vand.u32 4294901760, %v2454_v38 }
 0x917   : > { %v4476_v37 = vpop.eup %4475 }
 0x918   : > { %v2318_v39 = vmul.f32 %v4476_v37, %v4474_v27  ;;  %v2456_v45 = vsub.f32 %v2454_v38, %v2455_v43 }
 0x91a   : > { %v2319_v42 = vpack.c.bf16 %v2318_v39, %v2318_v39  ;;  %v2457_v47 = vand.u32 4294901760, %v2456_v45 }
 0x91c   : > { %4145 = vmatmul.mubr.msk.bf16.vlgmr.msra.gmra.mrb[16].mxu0 %vm1340_vm4, %v2319_v42  ;;  %v4452_v42 = vld [vmem:[%s5510_s10 + $0x8] sm:$0xff]  }
 0x91d   : > { %4149 = vmatpush3.xpose.msra.mxu0 %v2377_v35  ;;  %4150 = vmatprep.mubr.msk.f32.mxu0 %vm4813_vm1, %v4812_v8 }
 0x91e   : > { %4153 = vmatprep.subr.mxu0 %v4812_v8 }
 0x924   : > { %4151 = vmatmul.mubr.f32.vlgmr.msra.gmra.mrb[14].mxu0 %v2446_v46 }
 0x925   : > { %4154 = vmatpush3.xpose.msra.mxu0 %v2457_v47  ;;  %4155 = vmatprep.mubr.msk.f32.mxu0 %vm4813_vm1, %v4812_v8 }
 0x926   : > { %4158 = vmatprep.subr.mxu0 %v4812_v8 }
 0x92c   : > { %4156 = vmatmul.mubr.f32.vlgmr.msra.gmra.mrb[14].mxu0 %v2442_v34 }
 0x92d   : > { %4159 = vmatpush3.xpose.msra.mxu0 %v2454_v38  ;;  %4160 = vmatprep.mubr.msk.f32.mxu0 %vm4813_vm1, %v4812_v8 }
 0x92e   : > { %4163 = vmatprep.subr.mxu0 %v4812_v8 }
 0x934   : > { %4161 = vmatmul.mubr.f32.vlgmr.msra.gmra.mrb[14].mxu0 %v2443_v36 }
 0x935   : > { %4164 = vmatpush3.xpose.msra.mxu0 %v2377_v35  ;;  %4165 = vmatprep.mubr.msk.f32.mxu0 %vm4813_vm1, %v4812_v8 }
 0x936   : > { %4168 = vmatprep.subr.mxu0 %v4812_v8 }
 0x93c   : > { %4166 = vmatmul.mubr.f32.vlgmr.msra.gmra.mrb[14].mxu0 %v2444_v41 }
 0x93d   : > { %4169 = vmatpush3.xpose.msra.mxu0 %v2455_v43  ;;  %4170 = vmatprep.mubr.msk.f32.mxu0 %vm4813_vm1, %v4812_v8 }
 0x93e   : > { %4173 = vmatprep.subr.mxu0 %v4812_v8 }
 0x944   : > { %4171 = vmatmul.mubr.f32.vlgmr.msra.gmra.mrb[14].mxu0 %v2442_v34 }
 0x945   : > { %4174 = vmatpush3.xpose.msra.mxu0 %v2377_v35  ;;  %4175 = vmatprep.mubr.msk.f32.mxu0 %vm4813_vm1, %v4812_v8 }
 0x946   : > { %4214 = vmatprep.subr.bf16.mxu0 %v4812_v8 }
 0x94c   : > { %4176 = vmatmul.mubr.f32.vlgmr.msra.gmra.mrb[14].mxu0 %v2442_v34 }
 0x94d   : > { %4216 = vmatprep.mubr.msk.bf16.mxu0 %vm4813_vm1, %v4812_v8 }
 0x9ef   : > { %v5359_v49 = vpop.f32.mrb[16].mxu0 }
 0x9f0   : > { %v4146_v51 = vpop.f32.mrb[17].mxu0 }
 0x9f1   : > { %v2365_v52 = vpop.f32.mrb[18].mxu0 }
 0x9f2   : > { %v4147_v53 = vpop.f32.mrb[19].mxu0 }
 0xa1f   : > { %v2818_v54 = vpop.f32.mrb[14].mxu0 }
 0xa20   : > { %v4177_v55 = vpop.f32.mrb[15].mxu0  ;;  %v2822_v56 = vsel %vm1340_vm4, %v2818_v54, -inf }
 0xa21   : > { %2823 = vmax.xlane.f32.xlu1 %v2822_v56  ;;  %v3882_v56 = vld [vmem:[#allocation7 + $0x1] ss:$0 sm:$0xff] }
 0xaae   : > { %v2824_v57 = vpop.xlane.xlu1 %2823 }
 0xaaf   : > { %v2825_v58 = vsub.f32 %v2818_v54, %v2824_v57  ;;  %v952_v57 = vadd.f32 %v3882_v56, %v5257_v5 }
 0xab1   : > { %v2826_v59 = vmul.f32 1.442695, %v2825_v58  ;;  %v3912_v58 = vld [vmem:[%s5511_s11] ss:$0 sm:$0xff] }
 0xab3   : > { %4477 = vpow2.f32 %v2826_v59 }
 0xabd   : > { %v4478_v60 = vpop.eup %4477 }
 0xabe   : > { %v2828_v61 = vsel %vm1340_vm4, %v4478_v60, 0.0 }
 0xabf   : > { %2829 = vadd.xlane.f32.xlu0 %v2828_v61 }
 0xad5   : > { %2884 = vrot.lane.b32.xlu0 %v5263_v21, %s4825_s24  ;;  %v2959_v21 = vsub.f32 %v2957_v6, %v2958_v14  ;;  %s5576_s24 = sld [smem:[#allocation35_spill]] }
 0xad7   : > { %v2960_v19 = vand.u32 4294901760, %v2959_v21 }
 0xb4c   : > { %v2830_v63 = vpop.xlane.xlu0 %2829 }
 0xb4d   : > { %4479 = vrcp.f32 %v2830_v63 }
 0xb50   : > { %v2885_v1 = vpop.permute.xlu0 %2884 }
 0xb51   : > { %v2888_v2 = vsel %vm1340_vm4, %v2885_v1, 0 }
 0xb52   : > { %v2891_v4 = vand.u32 4294901760, %v2888_v2 }
 0xb54   : > { %v2968_v9 = vsub.f32 %v2888_v2, %v2891_v4 }
 0xb56   : > { %v2969_v17 = vand.u32 4294901760, %v2968_v9 }
 0xb57   : > { %v4480_v7 = vpop.eup %4479 }
 0xb58   : > { %v2832_v13 = vmul.f32 %v4480_v7, %v4478_v60  ;;  %v2970_v18 = vsub.f32 %v2968_v9, %v2969_v17  ;;  %v3478_v60 = vrot.slane %v952_v57, %v5196_v12 }
 0xb5a   : > { %v2833_v16 = vpack.c.bf16 %v2832_v13, %v2832_v13  ;;  %v2971_v20 = vand.u32 4294901760, %v2970_v18  ;;  %v4454_v13 = vld [vmem:[#allocation14 + $0x8] sm:$0xff]  }
 0xb5b   : > { %v3898_v18 = vld [vmem:[#allocation7 + $0x5] ss:$0 sm:$0xff] }
 0xb5c   : > { %4181 = vmatmul.mubr.msk.bf16.vlgmr.msra.gmra.mrb[28].mxu1 %vm1340_vm4, %v2833_v16 }
 0xb5d   : > { %4185 = vmatpush3.xpose.msra.mxu1 %v2891_v4  ;;  %4186 = vmatprep.mubr.msk.f32.mxu1 %vm4813_vm1, %v4812_v8 }
 0xb5e   : > { %4189 = vmatprep.subr.mxu1 %v4812_v8 }
 0xb64   : > { %4187 = vmatmul.mubr.f32.vlgmr.msra.gmra.mrb[26].mxu1 %v2960_v19  ;;  %v3916_v19 = vld [vmem:[#allocation8 + $0x1] ss:$0 sm:$0xff] }
 0xb65   : > { %4190 = vmatpush3.xpose.msra.mxu1 %v2971_v20  ;;  %4191 = vmatprep.mubr.msk.f32.mxu1 %vm4813_vm1, %v4812_v8 }
 0xb66   : > { %4194 = vmatprep.subr.mxu1 %v4812_v8 }
 0xb6c   : > { %4192 = vmatmul.mubr.f32.vlgmr.msra.gmra.mrb[26].mxu1 %v2956_v3 }
 0xb6d   : > { %4195 = vmatpush3.xpose.msra.mxu1 %v2968_v9  ;;  %4196 = vmatprep.mubr.msk.f32.mxu1 %vm4813_vm1, %v4812_v8  ;;  %v4453_v9 = vld [vmem:[#allocation14] sm:$0xff]  }
 0xb6e   : > { %4199 = vmatprep.subr.mxu1 %v4812_v8 }
 0xb74   : > { %4197 = vmatmul.mubr.f32.vlgmr.msra.gmra.mrb[26].mxu1 %v2957_v6 }
 0xb75   : > { %4200 = vmatpush3.xpose.msra.mxu1 %v2891_v4  ;;  %4201 = vmatprep.mubr.msk.f32.mxu1 %vm4813_vm1, %v4812_v8 }
 0xb76   : > { %4204 = vmatprep.subr.mxu1 %v4812_v8 }
 0xb7c   : > { %4202 = vmatmul.mubr.f32.vlgmr.msra.gmra.mrb[26].mxu1 %v2958_v14 }
 0xb7d   : > { %4205 = vmatpush3.xpose.msra.mxu1 %v2969_v17  ;;  %4206 = vmatprep.mubr.msk.f32.mxu1 %vm4813_vm1, %v4812_v8  ;;  %v3890_v17 = vld [vmem:[#allocation7 + $0x3] ss:$0 sm:$0xff] }
 0xb7e   : > { %4209 = vmatprep.subr.mxu1 %v4812_v8  ;;  %v1092_v20 = vadd.f32 %v3890_v17, %v5259_v10  ;;  %v4456_v10 = vld [vmem:[%s5571_s27 + $0x8] sm:$0xff]  }
 0xb84   : > { %4207 = vmatmul.mubr.f32.vlgmr.msra.gmra.mrb[26].mxu1 %v2956_v3 }
 0xb85   : > { %4210 = vmatpush3.xpose.msra.mxu1 %v2891_v4  ;;  %4211 = vmatprep.mubr.msk.f32.mxu1 %vm4813_vm1, %v4812_v8 }
 0xb86   : > { %4228 = vmatprep.subr.bf16.mxu1 %v4812_v8 }
 0xb8c   : > { %4212 = vmatmul.mubr.f32.vlgmr.msra.gmra.mrb[26].mxu1 %v2956_v3 }
 0xb8d   : > { %4232 = vmatprep.mubr.msk.bf16.mxu1 %vm4813_vm1, %v4812_v8  ;;  %4229 = vmatpush3.bf16.msra.mxu1 %v4453_v9 }
 0xb8e   : > { %4230 = vmatprep.subr.bf16.mxu1 %v4812_v8 }
 0xb91   : > { %4231 = vmatpush3.bf16.msra.mxu1 %v4454_v13 }
 0xc2f   : > { %v2876_v22 = vpop.f32.mrb[28].mxu1 }
 0xc30   : > { %v4182_v23 = vpop.f32.mrb[29].mxu1 }
 0xc31   : > { %v2879_v24 = vpop.f32.mrb[30].mxu1  ;;  %v3917_v23 = vld [vmem:[#allocation10 + $0x1] ss:$0 sm:$0xff] }
 0xc32   : > { %v4183_v26 = vpop.f32.mrb[31].mxu1  ;;  %v1232_v24 = vadd.f32 %v3898_v18, %v5261_v15  ;;  %v4457_v15 = vld [vmem:[%s5571_s27 + $0x10] sm:$0xff]  }
 0xc5f   : > { %v3332_v27 = vpop.f32.mrb[26].mxu1 }
 0xc60   : > { %v4213_v28 = vpop.f32.mrb[27].mxu1  ;;  %v3336_v29 = vsel %vm1340_vm4, %v3332_v27, -inf }
 0xc61   : > { %3337 = vmax.xlane.f32.xlu0 %v3336_v29  ;;  %v3516_v29 = vrot.slane %v1232_v24, %v5196_v12 }
 0xcee   : > { %v3338_v30 = vpop.xlane.xlu0 %3337 }
 0xcef   : > { %v3339_v31 = vsub.f32 %v3332_v27, %v3338_v30  ;;  %v3511_v27 = vrot.slane %v1092_v20, %v5196_v12 }
 0xcf1   : > { %v3340_v32 = vmul.f32 1.442695, %v3339_v31 }
 0xcf3   : > { %4481 = vpow2.f32 %v3340_v32 }
 0xcfd   : > { %v4482_v33 = vpop.eup %4481 }
 0xcfe   : > { %v3342_v34 = vsel %vm1340_vm4, %v4482_v33, 0.0 }
 0xcff   : > { %3343 = vadd.xlane.f32.xlu1 %v3342_v34  ;;  %v4458_v34 = vld [vmem:[%s5571_s27 + $0x18] sm:$0xff]  }
 0xd10   : > { %3348 = vrot.lane.b32.xlu1 %v5269_v25, %s4826_s23  ;;  %v4451_v25 = vld [vmem:[%s5510_s10] sm:$0xff]   ;;  %s5457_s23 = scalar_lea.hbm %s5576_s24, %s3929_s0 }
 0xd14   : > { %3397 = vrot.lane.b32.xlu1 %v5359_v49, %s4827_s20  ;;  %s5577_s20 = smov %s5576_s24 }
 0xd18   : > { %3401 = vrot.lane.b32.xlu1 %v2876_v22, %s4828_s13  ;;  %s3690_s13 = scalar_lea.sflag [#allocation4], %s634_s15 }
 0xd8c   : > { %v3344_v35 = vpop.xlane.xlu1 %3343 }
 0xd8d   : > { %4483 = vrcp.f32 %v3344_v35  ;;  %v3918_v35 = vld [vmem:[%s5572_s28] ss:$0 sm:$0xff]  ;;  %s4830_s28 = smov [#allocation16]  }
 0xd8e   : > { %s4719_s29 = sshll.u32 %s4830_s28, 4  ;;  %s4720_s29 = int_to_ptr.vmem [resolvable:$false] %s4719_s29 }
 0xd8f   : > { %s4721_s16 = scalar_lea.vmem %s4720_s29, 256  ;;  %p4722_p6 = scmp.lt.s32.totalorder %s5459_s30, %s4720_s29 }
 0xd90   : > { %v3349_v36 = vpop.permute.xlu1 %3348  ;;  %p4723_p9 = scmp.lt.s32.totalorder %s4721_s16, %s4715_s25 }
 0xd91   : > { %v3354_v37 = vsel %vm1810_vm5, %v3349_v36, 0 }
 0xd92   : > { %4215 = vmatpush3.bf16.msra.mxu0 %v3354_v37  ;;  %p4724_p10 = por %p4723_p9, %p4722_p6 }
 0xd93   : > { %4220 = vmatprep.subr.bf16.mxu0 %v4812_v8 }
 0xd94   : > { %v3398_v47 = vpop.permute.xlu1 %3397  ;;  %p4725_p13 = pnand %p4724_p10, %p4718_p0 }
 0xd95   : > { %v3408_v51 = vsel %vm1340_vm4, %v5327_v11, %v3398_v47 }
 0xd97   : > { %v4484_v38 = vpop.eup %4483 }
 0xd98   : > { %v3346_v39 = vmul.f32 %v4484_v38, %v4482_v33  ;;  %v3402_v49 = vpop.permute.xlu1 %3401  ;;  %v4455_v33 = vld [vmem:[%s5571_s27] sm:$0xff]  }
 0xd99   : > { %v3410_v52 = vsel %vm3409_vm6, %v3408_v51, %v3402_v49 }
 0xd9a   : > { %v3347_v41 = vpack.c.bf16 %v3346_v39, %v3346_v39 }
 0xd9c   : > { %4217 = vmatmul.mubr.msk.bf16.vlgmr.msra.gmra.mrb[20].mxu0 %vm1340_vm4, %v3347_v41 }
 0xd9d   : > { %4224 = vmatprep.mubr.msk.bf16.mxu0 %vm4813_vm1, %v4812_v8  ;;  %4221 = vmatpush3.bf16.msra.mxu0 %v4451_v25 }
 0xd9e   : > { %4222 = vmatprep.subr.bf16.mxu0 %v4812_v8 }
 0xda1   : > { %4223 = vmatpush3.bf16.msra.mxu0 %v4452_v42 }
 0xda2   : > { %4236 = vmatprep.subr.bf16.mxu0 %v4812_v8 }
 0xe6f   : > { %v3390_v43 = vpop.f32.mrb[20].mxu0 }
 0xe70   : > { %3405 = vrot.lane.b32.xlu1 %v3390_v43, %s4829_s17  ;;  %v4218_v44 = vpop.f32.mrb[21].mxu0 }
 0xe71   : > { %v3393_v45 = vpop.f32.mrb[22].mxu0 }
 0xe72   : > { %v4219_v46 = vpop.f32.mrb[23].mxu0 }
 0xee2   : > { %v3406_v53 = vpop.permute.xlu1 %3405 }
 0xee3   : > { %v3412_v54 = vsel %vm3411_vm7, %v3410_v52, %v3406_v53 }
 0xee4   : > { %v3413_v55 = vpack.c.bf16 %v3412_v54, %v3412_v54 }
 0xee6   : > { %4225 = vmatmul.mubr.msk.bf16.vlgmr.msra.gmra.mrb[24].mxu0 %vm720_vm0, %v3413_v55 }
 0xee7   : > { %4244 = vmatprep.mubr.msk.bf16.mxu0 %vm4813_vm1, %v4812_v8  ;;  %4237 = vmatpush3.bf16.msra.mxu0 %v4455_v33 }
 0xee8   : > { %4238 = vmatprep.subr.bf16.mxu0 %v4812_v8 }
 0xeeb   : > { %4239 = vmatpush3.bf16.msra.mxu0 %v4456_v10 }
 0xeec   : > { %4240 = vmatprep.subr.bf16.mxu0 %v4812_v8 }
 0xeef   : > { %4241 = vmatpush3.bf16.msra.mxu0 %v4457_v15 }
 0xef0   : > { %4242 = vmatprep.subr.bf16.mxu0 %v4812_v8 }
 0xef3   : > { %4243 = vmatpush3.bf16.msra.mxu0 %v4458_v34 }
 0xfb9   : > { %v3469_v59 = vpop.f32.mrb[24].mxu0 }
 0xfba   : > { %v3470_v11 = vadd.f32 %v3912_v58, %v3469_v59  ;;  %v4226_v61 = vpop.f32.mrb[25].mxu0 }
 0xfbb   : > { %v3472_v62 = vpop.f32.mrb[26].mxu0 }
 0xfbc   : > { %v3479_v63 = vmul.f32 %v3478_v60, %v3470_v11  ;;  %v4227_v0 = vpop.f32.mrb[27].mxu0 }
 0xfbe   : > { %v5415_v1 = vadd.f32 %v3479_v63, %v5214_v50 }
 0xfc0   : > { %v3481_v2 = vsel %vm720_vm0, %v5415_v1, 0.0 }
 0xfc1   : > { %3482 = vadd.xlane.f32.xlu0 %v3481_v2 }
0x104e   : > { %v3483_v5 = vpop.xlane.xlu0 %3482 }
0x104f   : > { %v3484_v3 = vmul.f32 0.03125, %v3483_v5 }
0x1051   : > { %v3485_v4 = vsub.f32 %v5415_v1, %v3484_v3  ;;  %v3894_v3 = vld [vmem:[#allocation7 + $0x4] ss:$0 sm:$0xff] }
0x1053   : > { %v3486_v6 = vmul.f32 %v3485_v4, %v3485_v4 }
0x1055   : > { %v3487_v7 = vsel %vm720_vm0, %v3486_v6, 0.0  ;;  %v3922_v6 = vld [vmem:[%s5574_s26] ss:$0 sm:$0xff] }
0x1056   : > { %3488 = vadd.xlane.f32.xlu1 %v3487_v7 }
0x10e3   : > { %v3489_v50 = vpop.xlane.xlu1 %3488 }
0x10e4   : > { %v3490_v14 = vmul.f32 0.03125, %v3489_v50 }
0x10e6   : > { %v3491_v16 = vadd.f32 1e-05, %v3490_v14 }
0x10e8   : > { %4485 = vrsqrt.f32 %v3491_v16 }
0x10f2   : > { %v4486_v21 = vpop.eup %4485 }
0x10f3   : > { %v3493_v22 = vmul.f32 %v4486_v21, %v3485_v4  ;;  %v1161_v4 = vadd.f32 %v3894_v3, %v5243_v48 }
0x10f5   : > { %v3500_v26 = vmul.f32 %v3916_v19, %v3493_v22 }
0x10f7   : > { %v3507_v28 = vadd.f32 %v3917_v23, %v3500_v26 }
0x10f9   : > { %v3512_v30 = vmul.f32 %v3511_v27, %v3507_v28 }
0x10fb   : > { %v3517_v31 = vadd.f32 %v3516_v29, %v3512_v30 }
0x10fd   : > { %v3518_v32 = vpack.c.bf16 %v3517_v31, %v3517_v31 }
0x10ff   : > { %4233 = vmatmul.mubr.msk.bf16.vlgmr.msra.gmra.mrb[32].mxu1 %vm720_vm0, %v3518_v32 }
0x11d2   : > { %v3574_v36 = vpop.f32.mrb[32].mxu1 }
0x11d3   : > { %v3575_v37 = vadd.f32 %v3918_v35, %v3574_v36  ;;  %v4234_v38 = vpop.f32.mrb[33].mxu1 }
0x11d4   : > { %v3577_v39 = vpop.f32.mrb[34].mxu1 }
0x11d5   : > { %v3581_v41 = vmul.f32 0.70710677, %v3575_v37  ;;  %v4235_v25 = vpop.f32.mrb[35].mxu1  ;;  %v3580_v63 = vmul.f32 0.5, %v3575_v37 }
0x11d7   : > { %v3584_v42 = vand.u32 2147483647, %v3581_v41  ;;  %vm3582_vm8 = vcmp.ge.f32.partialorder %v3581_v41, 0.0 }
0x11d8   : > { %v3583_v61 = vsel %vm3582_vm8, 1.0, %v4814_v40  ;;  %v3685_v40 = vrot.slane %v1161_v4, %v5196_v12 }
0x11d9   : > { %v3585_v43 = vmul.f32 0.3275911, %v3584_v42  ;;  %v3598_v8 = vsub.f32 0.0, %v3584_v42 }
0x11db   : > { %v3586_v44 = vadd.f32 1.0, %v3585_v43  ;;  %v3599_v46 = vmul.f32 %v3598_v8, %v3584_v42 }
0x11dd   : > { %4487 = vrcp.f32 %v3586_v44  ;;  %v3600_v51 = vmul.f32 1.442695, %v3599_v46 }
0x11df   : > { %4489 = vpow2.f32 %v3600_v51 }
0x11e7   : > { %v4488_v45 = vpop.eup %4487 }
0x11e8   : > { %v3589_v47 = vmul.f32 1.0614054, %v4488_v45 }
0x11e9   : > { %v4490_v59 = vpop.eup %4489 }
0x11ea   : > { %v3590_v49 = vadd.f32 -1.4531521, %v3589_v47 }
0x11ec   : > { %v3591_v52 = vmul.f32 %v4488_v45, %v3590_v49 }
0x11ee   : > { %v3592_v53 = vadd.f32 1.4214138, %v3591_v52 }
0x11f0   : > { %v3593_v54 = vmul.f32 %v4488_v45, %v3592_v53 }
0x11f2   : > { %v3594_v55 = vadd.f32 -0.28449672, %v3593_v54 }
0x11f4   : > { %v3595_v56 = vmul.f32 %v4488_v45, %v3594_v55 }
0x11f6   : > { %v3596_v57 = vadd.f32 0.2548296, %v3595_v56 }
0x11f8   : > { %v3597_v58 = vmul.f32 %v4488_v45, %v3596_v57 }
0x11fa   : > { %v3602_v60 = vmul.f32 %v4490_v59, %v3597_v58 }
0x11fc   : > { %v3603_v11 = vsub.f32 1.0, %v3602_v60 }
0x11fe   : > { %v3604_v62 = vmul.f32 %v3603_v11, %v3583_v61 }
0x1200   : > { %v3605_v0 = vadd.f32 1.0, %v3604_v62 }
0x1202   : > { %v3606_v2 = vmul.f32 %v3605_v0, %v3580_v63 }
0x1204   : > { %v3607_v5 = vpack.c.bf16 %v3606_v2, %v3606_v2 }
0x1206   : > { %4245 = vmatmul.mubr.msk.bf16.vlgmr.msra.gmra.mrb[28].mxu0 %vm3638_vm9, %v3607_v5 }
0x12d9   : > { %v3676_v7 = vpop.f32.mrb[28].mxu0 }
0x12da   : > { %v3677_v9 = vadd.f32 %v3922_v6, %v3676_v7  ;;  %v4246_v13 = vpop.f32.mrb[29].mxu0 }
0x12db   : > { %v3679_v50 = vpop.f32.mrb[30].mxu0 }
0x12dc   : > { %v3686_v14 = vmul.f32 %v3685_v40, %v3677_v9  ;;  %v4247_v16 = vpop.f32.mrb[31].mxu0 }
0x12de   : > { %v3687_v17 = vadd.f32 %v3686_v14, %v5415_v1 }
0x12e0   : > { %3688 = vst.msk [vmem:[%s636_s21] sm:$0xff] %vm720_vm0, %v3687_v17 }
0x12e1   : > { %4728 = shalt.err (!%p4725_p13)
}
0x12e2   : > { %s4729_s15 = scalar_lea.hbm %s5457_s23, 128  ;;  %s4733_s26 = scalar_lea.hbm %s5577_s20, 256 }
0x12e3   : > { %p4730_p12 = scmp.ne.s32.totalorder %s5457_s23, %s4729_s15  ;;  %p4734_p3 = scmp.lt.u32.totalorder %s5457_s23, %s5577_s20 }
0x12e4   : > { %p4735_p4 = scmp.lt.u32.totalorder %s4733_s26, %s4729_s15  ;;  %p4737_p8 = scmp.lt.u32.totalorder %s4729_s15, %s5457_s23 }
0x12e5   : > { %p4731_p1 = pnand %p4730_p12, %p5578_p11 }
0x12e6   : > { %p4736_p7 = por %p4735_p4, %p4734_p3 }
0x12e7   : > { %p4732_p2 = pneg %p4731_p1 }
0x12e8   : > { %p4738_p5 = por %p4737_p8, %p4736_p7 }
0x12ea   : > { %p4739_p0 = pnand %p4738_p5, %p4732_p2 }
0x12ec   : > { %4742 = shalt.err (!%p4739_p0)
}
0x12ed   : > { %4320 = dma.vmem_to_hbm [thread:$0]  (%p5578_p11), %s5459_s30, 128, %s5457_s23, %s3690_s13  }
0x12ee PF: > { %s5579_s14 = sld [smem:[#allocation26_spill]]  ;;  %s5580_s22 = sld [smem:[#allocation23_spill]] }
0x12ef   : > { %s5581_s24 = sld [smem:[#allocation30_spill]] }
0x12f4   : > { %p4367_p6 = scmp.ge.s32.totalorder %s5579_s14, 2  ;;  %s3715_s25 = sand.u32 1, %s5580_s22  }
0x12f5   : > { %p5582_p9 = scmp.ne.s32.totalorder %s5581_s24, 0  ;;  %s3716_s28 = scalar_lea.sflag [#allocation4], %s3715_s25 }
0x12f7   : > { %p4348_p10 = pnand %p4367_p6, %p5582_p9 }
0x12f9   : > { %4780 = dma.done.wait (!%p4348_p10), %s3716_s28, 128  }
0x12fa   : > { %4782 = vsyncadd (!%p4348_p10), %s3716_s28, 4294967168  ;;  %s5583_s24 = sld [smem:[#allocation27_spill]]  ;;  %s5584_s21 = sld [smem:[#allocation24_spill]] }
0x12fb   : > { %s5585_s22 = sld [smem:[#allocation25_spill]]  ;;  %s5586_s23 = sld [smem:[#allocation28_spill]] }
0x1300   : > { %p31_p13 = scmp.ge.s32.totalorder %s5583_s24, 4  }
0x1302   :  { %33 = sbr.rel (!%p31_p13) target bundleno = 14 (0xe), region = 167 }
0x1309   :  { %3721 = vsyncpa [#allocation3], 1 }
0x130a   :  { %3723 = vsyncpa [#allocation3 + $0x1], 1 }
0x130b   :  { %3724 = vsyncpa [#allocation6], 1 }
0x130c   :  { %3725 = vsyncpa [#allocation9], 1 }
0x130d   :  { %3726 = vsyncpa [#allocation12], 1 }
0x130e   :  { %3727 = vsyncpa [#allocation15], 1 }
0x130f   :  { %3728 = vsyncpa [#allocation4], 1 }
0x1310   :  { %3730 = vsyncpa [#allocation4 + $0x1], 1 }

</bundles_post_ra>
